<compile_context>
chip_gen: v7x
topology: tpu7x:2x2x1
jax: 0.10.0
libtpu: 0.0.40
codegen_flags: <defaults>
</compile_context>

<pallas_src>
import jax
import jax.numpy as jnp
from jax.experimental import pallas as pl
from jax.experimental.pallas import tpu as pltpu


# ----------------------------- Pallas kernels ------------------------------

def _conv_bias_stats_kernel(x_ref, w_ref, b_ref, y_ref, sum_ref, ssq_ref):
    """3x3 SAME conv (+bias) for one image + per-image BatchNorm partial sums.

    x_ref  : (1, H+2, W+2, Cin)  spatially padded NHWC tile (one image)
    w_ref  : (3, 3, Cin, Cout)   weights, constant index_map -> DMA'd once
    b_ref  : (1, Cout)           conv bias, constant index_map
    y_ref  : (H*W, Cout)         pre-BN conv output rows for this image
    sum_ref, ssq_ref : (1, 1, Cout) per-image sum / sum-of-squares (BN stats)
    """
    Hp2, Wp2, cin = x_ref.shape[1], x_ref.shape[2], x_ref.shape[3]
    H, W = Hp2 - 2, Wp2 - 2
    cout = y_ref.shape[-1]

    # The 9 taps are static shifted slices of the VMEM-resident padded tile;
    # each feeds one accumulated MXU matmul (im2col never touches HBM).
    acc = jnp.zeros((H * W, cout), jnp.float32)
    for ky in range(3):
        for kx in range(3):
            a = x_ref[0, ky:ky + H, kx:kx + W, :].reshape(H * W, cin)
            acc = acc + jnp.dot(a, w_ref[ky, kx],
                                preferred_element_type=jnp.float32)

    y = acc + b_ref[...]                       # (H*W, Cout) + (1, Cout)
    y_ref[...] = y
    sum_ref[0] = jnp.sum(y, axis=0, keepdims=True)
    ssq_ref[0] = jnp.sum(y * y, axis=0, keepdims=True)


def _affine_relu_kernel(y_ref, s_ref, t_ref, o_ref):
    """Lane-dense BN-apply + ReLU:  out = max(y * scale + shift, 0).

    y_ref / o_ref : (TM, W*Cout)  rows = (n, h), lanes = (w, cout) -> 128-dense
    s_ref / t_ref : (1, W*Cout)   per-channel scale / shift tiled over W
    """
    o_ref[...] = jnp.maximum(y_ref[...] * s_ref[...] + t_ref[...], 0.0)


# ------------------------------ wrappers ------------------------------------

def _row_tile(rows, target=256):
    """Largest row block <= target dividing `rows` (multiple of 8 when possible)."""
    if rows <= target:
        return rows
    for tm in range(target, 0, -1):
        if rows % tm == 0 and tm % 8 == 0:
            return tm
    return rows


def conv3x3_bn_relu(x_nhwc, w, b, gamma, beta):
    """Conv3x3(pad=1) + training-mode BatchNorm2d (eps=1e-5) + ReLU.

    Two Pallas passes:
      1) conv+bias per image (grid over batch, "parallel") with per-image
         sum / sumsq outputs so the BN batch statistics are exact,
      2) lane-dense elementwise y*scale + shift + ReLU over row tiles.
    """
    N, H, W, C = x_nhwc.shape
    cout = w.shape[-1]
    M = H * W

    # SAME-conv halo only (a +2 pad), NOT a 9x im2col matrix.
    xp = jnp.pad(x_nhwc, ((0, 0), (1, 1), (1, 1), (0, 0)))

    y_pre, psum, pssq = pl.pallas_call(
        _conv_bias_stats_kernel,
        out_shape=(jax.ShapeDtypeStruct((N * M, cout), jnp.float32),
                   jax.ShapeDtypeStruct((N, 1, cout), jnp.float32),
                   jax.ShapeDtypeStruct((N, 1, cout), jnp.float32)),
        grid=(N,),
        in_specs=[pl.BlockSpec((1, H + 2, W + 2, C), lambda n: (n, 0, 0, 0)),
                  pl.BlockSpec((3, 3, C, cout), lambda n: (0, 0, 0, 0)),
                  pl.BlockSpec((1, cout), lambda n: (0, 0))],
        out_specs=(pl.BlockSpec((M, cout), lambda n: (n, 0)),
                   pl.BlockSpec((1, 1, cout), lambda n: (n, 0, 0)),
                   pl.BlockSpec((1, 1, cout), lambda n: (n, 0, 0))),
        compiler_params=pltpu.CompilerParams(
            dimension_semantics=("parallel",),
            vmem_limit_bytes=32 * 1024 * 1024),   # safe on v5e/v6e/v7x
        cost_estimate=pl.CostEstimate(
            flops=2 * N * M * 9 * C * cout,
            transcendentals=0,
            bytes_accessed=4 * (N * (H + 2) * (W + 2) * C
                                + 9 * C * cout + N * M * cout)),
    )(xp, w, b.reshape(1, cout))

    # Exact batch statistics (two-pass BN): tiny reduction done in XLA.
    cnt = jnp.float32(N * M)
    mean = jnp.sum(psum, axis=(0, 1)) / cnt
    var = jnp.sum(pssq, axis=(0, 1)) / cnt - mean * mean      # biased, like PyTorch
    scale = gamma * jax.lax.rsqrt(var + 1e-5)
    shift = beta - mean * scale

    # Lane-dense BN-apply + ReLU over a (N*H, W*Cout) view (free reshape).
    R, L = N * H, W * cout
    tm = _row_tile(R)
    out = pl.pallas_call(
        _affine_relu_kernel,
        out_shape=jax.ShapeDtypeStruct((R, L), jnp.float32),
        grid=(R // tm,),
        in_specs=[pl.BlockSpec((tm, L), lambda i: (i, 0)),
                  pl.BlockSpec((1, L), lambda i: (0, 0)),
                  pl.BlockSpec((1, L), lambda i: (0, 0))],
        out_specs=pl.BlockSpec((tm, L), lambda i: (i, 0)),
        compiler_params=pltpu.CompilerParams(
            dimension_semantics=("parallel",),
            vmem_limit_bytes=32 * 1024 * 1024),
    )(y_pre.reshape(R, L),
      jnp.tile(scale, W).reshape(1, L),
      jnp.tile(shift, W).reshape(1, L))
    return out.reshape(N, H, W, cout)


def _interp_matrix(out_size, in_size):
    """Linear-interp matrix for bilinear upsample with align_corners=True."""
    if in_size == 1:
        return jnp.ones((out_size, 1), jnp.float32)
    src = jnp.arange(out_size, dtype=jnp.float32) * (in_size - 1) / max(out_size - 1, 1)
    i0 = jnp.clip(jnp.floor(src).astype(jnp.int32), 0, in_size - 2)
    t = src - i0.astype(jnp.float32)
    rows = jnp.arange(out_size)
    m = jnp.zeros((out_size, in_size), jnp.float32)
    return m.at[rows, i0].add(1.0 - t).at[rows, i0 + 1].add(t)


def bilinear_up2x(x_nhwc):
    """nn.Upsample(scale_factor=2, mode='bilinear', align_corners=True), NHWC."""
    _, H, W, _ = x_nhwc.shape
    wr = _interp_matrix(2 * H, H)
    wc = _interp_matrix(2 * W, W)
    y = jnp.einsum('oh,nhwc->nowc', wr, x_nhwc)
    return jnp.einsum('pw,nowc->nopc', wc, y)


def up_forward(x1_nchw, x2_nchw, params):
    # NCHW -> NHWC (channels on the TPU lane dim).
    x1 = jnp.transpose(x1_nchw, (0, 2, 3, 1))
    x2 = jnp.transpose(x2_nchw, (0, 2, 3, 1))

    # Upsample / pad / concat: cheap interpolation & layout glue, left to XLA
    # (per review); the Pallas kernels carry the heavy conv/BN/ReLU work.
    x1 = bilinear_up2x(x1)
    dY = x2.shape[1] - x1.shape[1]   # standard UNet: always >= 0
    dX = x2.shape[2] - x1.shape[2]
    x1 = jnp.pad(x1, ((0, 0), (dY // 2, dY - dY // 2),
                      (dX // 2, dX - dX // 2), (0, 0)))
    x = jnp.concatenate([x2, x1], axis=-1)        # torch.cat([x2, x1], dim=1)

    x = conv3x3_bn_relu(x, params['w1'], params['b1'], params['g1'], params['be1'])
    x = conv3x3_bn_relu(x, params['w2'], params['b2'], params['g2'], params['be2'])
    return jnp.transpose(x, (0, 3, 1, 2))         # NHWC -> NCHW


# ---------------- pure-JAX reference (for correctness check) ----------------

def _bilinear_up_ref(x_nhwc, Hout, Wout):
    # Independent gather+lerp formulation of align_corners=True bilinear.
    N, H, W, C = x_nhwc.shape
    ys = jnp.arange(Hout, dtype=jnp.float32) * (H - 1) / max(Hout - 1, 1)
    xs = jnp.arange(Wout, dtype=jnp.float32) * (W - 1) / max(Wout - 1, 1)
    y0 = jnp.clip(jnp.floor(ys).astype(jnp.int32), 0, max(H - 2, 0))
    x0 = jnp.clip(jnp.floor(xs).astype(jnp.int32), 0, max(W - 2, 0))
    ty = ys - y0.astype(jnp.float32)
    tx = xs - x0.astype(jnp.float32)
    y1 = jnp.minimum(y0 + 1, H - 1)
    x1 = jnp.minimum(x0 + 1, W - 1)
    rows = (x_nhwc[:, y0] * (1.0 - ty)[None, :, None, None]
            + x_nhwc[:, y1] * ty[None, :, None, None])
    return (rows[:, :, x0] * (1.0 - tx)[None, None, :, None]
            + rows[:, :, x1] * tx[None, None, :, None])


def _ref_forward(x1_nchw, x2_nchw, params):
    x1 = jnp.transpose(x1_nchw, (0, 2, 3, 1))
    x2 = jnp.transpose(x2_nchw, (0, 2, 3, 1))
    x1 = _bilinear_up_ref(x1, 2 * x1.shape[1], 2 * x1.shape[2])
    dY = x2.shape[1] - x1.shape[1]
    dX = x2.shape[2] - x1.shape[2]
    x1 = jnp.pad(x1, ((0, 0), (dY // 2, dY - dY // 2),
                      (dX // 2, dX - dX // 2), (0, 0)))
    x = jnp.concatenate([x2, x1], axis=-1)

    def block(x, w, b, g, be):
        y = jax.lax.conv_general_dilated(
            x, w, window_strides=(1, 1), padding='SAME',
            dimension_numbers=('NHWC', 'HWIO', 'NHWC')) + b
        m = y.mean(axis=(0, 1, 2))
        v = ((y - m) ** 2).mean(axis=(0, 1, 2))
        return jnp.maximum((y - m) * jax.lax.rsqrt(v + 1e-5) * g + be, 0.0)

    x = block(x, params['w1'], params['b1'], params['g1'], params['be1'])
    x = block(x, params['w2'], params['b2'], params['g2'], params['be2'])
    return jnp.transpose(x, (0, 3, 1, 2))


# ---------------------------------- test -------------------------------------

if __name__ == "__main__":
    key = jax.random.PRNGKey(0)
    N = 2
    c1, c2 = 8, 8            # channels of x1 (deep features) and x2 (skip)
    H1 = W1 = 8              # x1 spatial; x2 spatial is 2x -> 16x16
    H2 = W2 = 16
    in_ch = c1 + c2          # DoubleConv input channels after concat
    out_ch = 8

    ks = jax.random.split(key, 4)
    x1 = jax.random.normal(ks[0], (N, c1, H1, W1), jnp.float32)
    x2 = jax.random.normal(ks[1], (N, c2, H2, W2), jnp.float32)

    # Deterministic synthetic parameters (shapes from DoubleConv(in_ch, out_ch)).
    params = {
        'w1': jax.random.normal(ks[2], (3, 3, in_ch, out_ch), jnp.float32)
              * (2.0 / (9 * in_ch)) ** 0.5,
        'b1': 0.01 * jnp.arange(out_ch, dtype=jnp.float32),
        'g1': 1.0 + 0.1 * jnp.arange(out_ch, dtype=jnp.float32),
        'be1': 0.05 * jnp.arange(out_ch, dtype=jnp.float32),
        'w2': jax.random.normal(ks[3], (3, 3, out_ch, out_ch), jnp.float32)
              * (2.0 / (9 * out_ch)) ** 0.5,
        'b2': -0.01 * jnp.arange(out_ch, dtype=jnp.float32),
        'g2': 1.0 - 0.05 * jnp.arange(out_ch, dtype=jnp.float32),
        'be2': 0.02 * jnp.arange(out_ch, dtype=jnp.float32),
    }

    up = jax.jit(up_forward)
    out = jax.block_until_ready(up(x1, x2, params))
    ref = jax.block_until_ready(jax.jit(_ref_forward)(x1, x2, params))

    assert out.shape == (N, out_ch, H2, W2), out.shape
    err = float(jnp.max(jnp.abs(out - ref)))
    assert err < 1e-3, f"max abs error {err}"
    print("KERNEL_OK")
</pallas_src>

<mosaic_0001>
module attributes {stable_mosaic.version = 11 : i64} {
  func.func private @main(%arg0: i32) attributes {dimension_semantics = [#tpu.dimension_semantics<core_parallel>], iteration_bounds = array<i64: 2>, tpu.core_type = #tpu.core_type<sc_scalar_subcore>, window_params = []} {
    return
  }
}

module attributes {stable_mosaic.version = 11 : i64} {
  func.func private @main(%arg0: i32) attributes {dimension_semantics = [#tpu.dimension_semantics<core_parallel>], iteration_bounds = array<i64: 2>, tpu.core_type = #tpu.core_type<sc_scalar_subcore>, window_params = []} {
    return
  }
}

module attributes {stable_mosaic.version = 11 : i64} {
  func.func @_conv_bias_stats_kernel(%arg0: i32, %arg1: memref<1x18x18x16xf32, #tpu.memory_space<vmem>>, %arg2: memref<3x3x16x8xf32, #tpu.memory_space<vmem>>, %arg3: memref<1x8xf32, #tpu.memory_space<vmem>>, %arg4: memref<256x8xf32, #tpu.memory_space<vmem>>, %arg5: memref<1x1x8xf32, #tpu.memory_space<vmem>>, %arg6: memref<1x1x8xf32, #tpu.memory_space<vmem>>) attributes {dimension_semantics = [#tpu.dimension_semantics<parallel>], iteration_bounds = array<i64: 2>, scalar_prefetch = 0 : i64, scratch_operands = 0 : i64, tpu.core_type = #tpu.core_type<tc>, window_params = [{transform_indices = @transform_0, window_bounds = array<i64: 1, 18, 18, 16>}, {pipeline_mode = #tpu.pipeline_mode<synchronous>, transform_indices = @transform_1, window_bounds = array<i64: 3, 3, 16, 8>}, {pipeline_mode = #tpu.pipeline_mode<synchronous>, transform_indices = @transform_2, window_bounds = array<i64: 1, 8>}, {transform_indices = @transform_3, window_bounds = array<i64: 256, 8>}, {transform_indices = @transform_4, window_bounds = array<i64: 1, 1, 8>}, {transform_indices = @transform_5, window_bounds = array<i64: 1, 1, 8>}]} {
    %cst = arith.constant 0.000000e+00 : f32
    %0 = vector.broadcast %cst : f32 to vector<256x8xf32>
    %c0 = arith.constant 0 : index
    %c0_0 = arith.constant 0 : index
    %c0_1 = arith.constant 0 : index
    %c0_2 = arith.constant 0 : index
    %1 = vector.load %arg1[%c0, %c0_0, %c0_1, %c0_2] : memref<1x18x18x16xf32, #tpu.memory_space<vmem>>, vector<1x16x16x16xf32>
    %2 = vector.shape_cast %1 : vector<1x16x16x16xf32> to vector<16x16x16xf32>
    %3 = vector.shape_cast %2 : vector<16x16x16xf32> to vector<256x16xf32>
    %c0_3 = arith.constant 0 : index
    %c0_4 = arith.constant 0 : index
    %c0_5 = arith.constant 0 : index
    %c0_6 = arith.constant 0 : index
    %4 = vector.load %arg2[%c0_3, %c0_4, %c0_5, %c0_6] : memref<3x3x16x8xf32, #tpu.memory_space<vmem>>, vector<1x1x16x8xf32>
    %5 = vector.shape_cast %4 : vector<1x1x16x8xf32> to vector<16x8xf32>
    %cst_7 = arith.constant dense<0.000000e+00> : vector<256x8xf32>
    %6 = tpu.matmul %3, %5, %cst_7 {dimension_numbers = #tpu.dot_dimension_numbers<[1], [0], [0], [1], [0, 0, 1, 1], [], []>} : vector<256x16xf32>, vector<16x8xf32>, vector<256x8xf32> -> vector<256x8xf32>
    %7 = arith.addf %0, %6 : vector<256x8xf32>
    %c0_8 = arith.constant 0 : index
    %c0_9 = arith.constant 0 : index
    %c1 = arith.constant 1 : index
    %c0_10 = arith.constant 0 : index
    %8 = vector.load %arg1[%c0_8, %c0_9, %c1, %c0_10] : memref<1x18x18x16xf32, #tpu.memory_space<vmem>>, vector<1x16x16x16xf32>
    %9 = vector.shape_cast %8 : vector<1x16x16x16xf32> to vector<16x16x16xf32>
    %10 = vector.shape_cast %9 : vector<16x16x16xf32> to vector<256x16xf32>
    %c0_11 = arith.constant 0 : index
    %c1_12 = arith.constant 1 : index
    %c0_13 = arith.constant 0 : index
    %c0_14 = arith.constant 0 : index
    %11 = vector.load %arg2[%c0_11, %c1_12, %c0_13, %c0_14] : memref<3x3x16x8xf32, #tpu.memory_space<vmem>>, vector<1x1x16x8xf32>
    %12 = vector.shape_cast %11 : vector<1x1x16x8xf32> to vector<16x8xf32>
    %cst_15 = arith.constant dense<0.000000e+00> : vector<256x8xf32>
    %13 = tpu.matmul %10, %12, %cst_15 {dimension_numbers = #tpu.dot_dimension_numbers<[1], [0], [0], [1], [0, 0, 1, 1], [], []>} : vector<256x16xf32>, vector<16x8xf32>, vector<256x8xf32> -> vector<256x8xf32>
    %14 = arith.addf %7, %13 : vector<256x8xf32>
    %c0_16 = arith.constant 0 : index
    %c0_17 = arith.constant 0 : index
    %c2 = arith.constant 2 : index
    %c0_18 = arith.constant 0 : index
    %15 = vector.load %arg1[%c0_16, %c0_17, %c2, %c0_18] : memref<1x18x18x16xf32, #tpu.memory_space<vmem>>, vector<1x16x16x16xf32>
    %16 = vector.shape_cast %15 : vector<1x16x16x16xf32> to vector<16x16x16xf32>
    %17 = vector.shape_cast %16 : vector<16x16x16xf32> to vector<256x16xf32>
    %c0_19 = arith.constant 0 : index
    %c2_20 = arith.constant 2 : index
    %c0_21 = arith.constant 0 : index
    %c0_22 = arith.constant 0 : index
    %18 = vector.load %arg2[%c0_19, %c2_20, %c0_21, %c0_22] : memref<3x3x16x8xf32, #tpu.memory_space<vmem>>, vector<1x1x16x8xf32>
    %19 = vector.shape_cast %18 : vector<1x1x16x8xf32> to vector<16x8xf32>
    %cst_23 = arith.constant dense<0.000000e+00> : vector<256x8xf32>
    %20 = tpu.matmul %17, %19, %cst_23 {dimension_numbers = #tpu.dot_dimension_numbers<[1], [0], [0], [1], [0, 0, 1, 1], [], []>} : vector<256x16xf32>, vector<16x8xf32>, vector<256x8xf32> -> vector<256x8xf32>
    %21 = arith.addf %14, %20 : vector<256x8xf32>
    %c0_24 = arith.constant 0 : index
    %c1_25 = arith.constant 1 : index
    %c0_26 = arith.constant 0 : index
    %c0_27 = arith.constant 0 : index
    %22 = vector.load %arg1[%c0_24, %c1_25, %c0_26, %c0_27] : memref<1x18x18x16xf32, #tpu.memory_space<vmem>>, vector<1x16x16x16xf32>
    %23 = vector.shape_cast %22 : vector<1x16x16x16xf32> to vector<16x16x16xf32>
    %24 = vector.shape_cast %23 : vector<16x16x16xf32> to vector<256x16xf32>
    %c1_28 = arith.constant 1 : index
    %c0_29 = arith.constant 0 : index
    %c0_30 = arith.constant 0 : index
    %c0_31 = arith.constant 0 : index
    %25 = vector.load %arg2[%c1_28, %c0_29, %c0_30, %c0_31] : memref<3x3x16x8xf32, #tpu.memory_space<vmem>>, vector<1x1x16x8xf32>
    %26 = vector.shape_cast %25 : vector<1x1x16x8xf32> to vector<16x8xf32>
    %cst_32 = arith.constant dense<0.000000e+00> : vector<256x8xf32>
    %27 = tpu.matmul %24, %26, %cst_32 {dimension_numbers = #tpu.dot_dimension_numbers<[1], [0], [0], [1], [0, 0, 1, 1], [], []>} : vector<256x16xf32>, vector<16x8xf32>, vector<256x8xf32> -> vector<256x8xf32>
    %28 = arith.addf %21, %27 : vector<256x8xf32>
    %c0_33 = arith.constant 0 : index
    %c1_34 = arith.constant 1 : index
    %c1_35 = arith.constant 1 : index
    %c0_36 = arith.constant 0 : index
    %29 = vector.load %arg1[%c0_33, %c1_34, %c1_35, %c0_36] : memref<1x18x18x16xf32, #tpu.memory_space<vmem>>, vector<1x16x16x16xf32>
    %30 = vector.shape_cast %29 : vector<1x16x16x16xf32> to vector<16x16x16xf32>
    %31 = vector.shape_cast %30 : vector<16x16x16xf32> to vector<256x16xf32>
    %c1_37 = arith.constant 1 : index
    %c1_38 = arith.constant 1 : index
    %c0_39 = arith.constant 0 : index
    %c0_40 = arith.constant 0 : index
    %32 = vector.load %arg2[%c1_37, %c1_38, %c0_39, %c0_40] : memref<3x3x16x8xf32, #tpu.memory_space<vmem>>, vector<1x1x16x8xf32>
    %33 = vector.shape_cast %32 : vector<1x1x16x8xf32> to vector<16x8xf32>
    %cst_41 = arith.constant dense<0.000000e+00> : vector<256x8xf32>
    %34 = tpu.matmul %31, %33, %cst_41 {dimension_numbers = #tpu.dot_dimension_numbers<[1], [0], [0], [1], [0, 0, 1, 1], [], []>} : vector<256x16xf32>, vector<16x8xf32>, vector<256x8xf32> -> vector<256x8xf32>
    %35 = arith.addf %28, %34 : vector<256x8xf32>
    %c0_42 = arith.constant 0 : index
    %c1_43 = arith.constant 1 : index
    %c2_44 = arith.constant 2 : index
    %c0_45 = arith.constant 0 : index
    %36 = vector.load %arg1[%c0_42, %c1_43, %c2_44, %c0_45] : memref<1x18x18x16xf32, #tpu.memory_space<vmem>>, vector<1x16x16x16xf32>
    %37 = vector.shape_cast %36 : vector<1x16x16x16xf32> to vector<16x16x16xf32>
    %38 = vector.shape_cast %37 : vector<16x16x16xf32> to vector<256x16xf32>
    %c1_46 = arith.constant 1 : index
    %c2_47 = arith.constant 2 : index
    %c0_48 = arith.constant 0 : index
    %c0_49 = arith.constant 0 : index
    %39 = vector.load %arg2[%c1_46, %c2_47, %c0_48, %c0_49] : memref<3x3x16x8xf32, #tpu.memory_space<vmem>>, vector<1x1x16x8xf32>
    %40 = vector.shape_cast %39 : vector<1x1x16x8xf32> to vector<16x8xf32>
    %cst_50 = arith.constant dense<0.000000e+00> : vector<256x8xf32>
    %41 = tpu.matmul %38, %40, %cst_50 {dimension_numbers = #tpu.dot_dimension_numbers<[1], [0], [0], [1], [0, 0, 1, 1], [], []>} : vector<256x16xf32>, vector<16x8xf32>, vector<256x8xf32> -> vector<256x8xf32>
    %42 = arith.addf %35, %41 : vector<256x8xf32>
    %c0_51 = arith.constant 0 : index
    %c2_52 = arith.constant 2 : index
    %c0_53 = arith.constant 0 : index
    %c0_54 = arith.constant 0 : index
    %43 = vector.load %arg1[%c0_51, %c2_52, %c0_53, %c0_54] : memref<1x18x18x16xf32, #tpu.memory_space<vmem>>, vector<1x16x16x16xf32>
    %44 = vector.shape_cast %43 : vector<1x16x16x16xf32> to vector<16x16x16xf32>
    %45 = vector.shape_cast %44 : vector<16x16x16xf32> to vector<256x16xf32>
    %c2_55 = arith.constant 2 : index
    %c0_56 = arith.constant 0 : index
    %c0_57 = arith.constant 0 : index
    %c0_58 = arith.constant 0 : index
    %46 = vector.load %arg2[%c2_55, %c0_56, %c0_57, %c0_58] : memref<3x3x16x8xf32, #tpu.memory_space<vmem>>, vector<1x1x16x8xf32>
    %47 = vector.shape_cast %46 : vector<1x1x16x8xf32> to vector<16x8xf32>
    %cst_59 = arith.constant dense<0.000000e+00> : vector<256x8xf32>
    %48 = tpu.matmul %45, %47, %cst_59 {dimension_numbers = #tpu.dot_dimension_numbers<[1], [0], [0], [1], [0, 0, 1, 1], [], []>} : vector<256x16xf32>, vector<16x8xf32>, vector<256x8xf32> -> vector<256x8xf32>
    %49 = arith.addf %42, %48 : vector<256x8xf32>
    %c0_60 = arith.constant 0 : index
    %c2_61 = arith.constant 2 : index
    %c1_62 = arith.constant 1 : index
    %c0_63 = arith.constant 0 : index
    %50 = vector.load %arg1[%c0_60, %c2_61, %c1_62, %c0_63] : memref<1x18x18x16xf32, #tpu.memory_space<vmem>>, vector<1x16x16x16xf32>
    %51 = vector.shape_cast %50 : vector<1x16x16x16xf32> to vector<16x16x16xf32>
    %52 = vector.shape_cast %51 : vector<16x16x16xf32> to vector<256x16xf32>
    %c2_64 = arith.constant 2 : index
    %c1_65 = arith.constant 1 : index
    %c0_66 = arith.constant 0 : index
    %c0_67 = arith.constant 0 : index
    %53 = vector.load %arg2[%c2_64, %c1_65, %c0_66, %c0_67] : memref<3x3x16x8xf32, #tpu.memory_space<vmem>>, vector<1x1x16x8xf32>
    %54 = vector.shape_cast %53 : vector<1x1x16x8xf32> to vector<16x8xf32>
    %cst_68 = arith.constant dense<0.000000e+00> : vector<256x8xf32>
    %55 = tpu.matmul %52, %54, %cst_68 {dimension_numbers = #tpu.dot_dimension_numbers<[1], [0], [0], [1], [0, 0, 1, 1], [], []>} : vector<256x16xf32>, vector<16x8xf32>, vector<256x8xf32> -> vector<256x8xf32>
    %56 = arith.addf %49, %55 : vector<256x8xf32>
    %c0_69 = arith.constant 0 : index
    %c2_70 = arith.constant 2 : index
    %c2_71 = arith.constant 2 : index
    %c0_72 = arith.constant 0 : index
    %57 = vector.load %arg1[%c0_69, %c2_70, %c2_71, %c0_72] : memref<1x18x18x16xf32, #tpu.memory_space<vmem>>, vector<1x16x16x16xf32>
    %58 = vector.shape_cast %57 : vector<1x16x16x16xf32> to vector<16x16x16xf32>
    %59 = vector.shape_cast %58 : vector<16x16x16xf32> to vector<256x16xf32>
    %c2_73 = arith.constant 2 : index
    %c2_74 = arith.constant 2 : index
    %c0_75 = arith.constant 0 : index
    %c0_76 = arith.constant 0 : index
    %60 = vector.load %arg2[%c2_73, %c2_74, %c0_75, %c0_76] : memref<3x3x16x8xf32, #tpu.memory_space<vmem>>, vector<1x1x16x8xf32>
    %61 = vector.shape_cast %60 : vector<1x1x16x8xf32> to vector<16x8xf32>
    %cst_77 = arith.constant dense<0.000000e+00> : vector<256x8xf32>
    %62 = tpu.matmul %59, %61, %cst_77 {dimension_numbers = #tpu.dot_dimension_numbers<[1], [0], [0], [1], [0, 0, 1, 1], [], []>} : vector<256x16xf32>, vector<16x8xf32>, vector<256x8xf32> -> vector<256x8xf32>
    %63 = arith.addf %56, %62 : vector<256x8xf32>
    %c0_78 = arith.constant 0 : index
    %c0_79 = arith.constant 0 : index
    %64 = vector.load %arg3[%c0_78, %c0_79] : memref<1x8xf32, #tpu.memory_space<vmem>>, vector<1x8xf32>
    %65 = vector.broadcast %64 : vector<1x8xf32> to vector<256x8xf32>
    %66 = arith.addf %63, %65 : vector<256x8xf32>
    %c0_80 = arith.constant 0 : index
    %c0_81 = arith.constant 0 : index
    %67 = vector.load %arg4[%c0_80, %c0_81] : memref<256x8xf32, #tpu.memory_space<vmem>>, vector<256x8xf32>
    tpu.vector_store %arg4[%c0_80, %c0_81], %66 {strides = array<i32>} : memref<256x8xf32, #tpu.memory_space<vmem>>, vector<256x8xf32>,
    %cst_82 = arith.constant dense<0.000000e+00> : vector<8xf32>
    %68 = vector.multi_reduction <add>, %66, %cst_82 [0] : vector<256x8xf32> to vector<8xf32>
    %69 = vector.shape_cast %68 : vector<8xf32> to vector<1x8xf32>
    %c0_83 = arith.constant 0 : index
    %c0_84 = arith.constant 0 : index
    %c0_85 = arith.constant 0 : index
    %70 = vector.load %arg5[%c0_83, %c0_84, %c0_85] : memref<1x1x8xf32, #tpu.memory_space<vmem>>, vector<1x1x8xf32>
    %71 = vector.shape_cast %70 : vector<1x1x8xf32> to vector<1x8xf32>
    %72 = vector.shape_cast %69 : vector<1x8xf32> to vector<1x1x8xf32>
    tpu.vector_store %arg5[%c0_83, %c0_84, %c0_85], %72 {strides = array<i32>} : memref<1x1x8xf32, #tpu.memory_space<vmem>>, vector<1x1x8xf32>,
    %73 = arith.mulf %66, %66 : vector<256x8xf32>
    %cst_86 = arith.constant dense<0.000000e+00> : vector<8xf32>
    %74 = vector.multi_reduction <add>, %73, %cst_86 [0] : vector<256x8xf32> to vector<8xf32>
    %75 = vector.shape_cast %74 : vector<8xf32> to vector<1x8xf32>
    %c0_87 = arith.constant 0 : index
    %c0_88 = arith.constant 0 : index
    %c0_89 = arith.constant 0 : index
    %76 = vector.load %arg6[%c0_87, %c0_88, %c0_89] : memref<1x1x8xf32, #tpu.memory_space<vmem>>, vector<1x1x8xf32>
    %77 = vector.shape_cast %76 : vector<1x1x8xf32> to vector<1x8xf32>
    %78 = vector.shape_cast %75 : vector<1x8xf32> to vector<1x1x8xf32>
    tpu.vector_store %arg6[%c0_87, %c0_88, %c0_89], %78 {strides = array<i32>} : memref<1x1x8xf32, #tpu.memory_space<vmem>>, vector<1x1x8xf32>,
    return
  }
  func.func @transform_0(%arg0: i32) -> (i32, i32, i32, i32) {
    %c0_i32 = arith.constant 0 : i32
    %c0_i32_0 = arith.constant 0 : i32
    %c0_i32_1 = arith.constant 0 : i32
    %c0_i32_2 = arith.constant 0 : i32
    return %arg0, %c0_i32, %c0_i32_0, %c0_i32_1 : i32, i32, i32, i32
  }
  func.func @transform_1(%arg0: i32) -> (i32, i32, i32, i32) {
    %c0_i32 = arith.constant 0 : i32
    %c0_i32_0 = arith.constant 0 : i32
    %c0_i32_1 = arith.constant 0 : i32
    %c0_i32_2 = arith.constant 0 : i32
    %c0_i32_3 = arith.constant 0 : i32
    return %c0_i32, %c0_i32_0, %c0_i32_1, %c0_i32_2 : i32, i32, i32, i32
  }
  func.func @transform_2(%arg0: i32) -> (i32, i32) {
    %c0_i32 = arith.constant 0 : i32
    %c0_i32_0 = arith.constant 0 : i32
    %c0_i32_1 = arith.constant 0 : i32
    return %c0_i32, %c0_i32_0 : i32, i32
  }
  func.func @transform_3(%arg0: i32) -> (i32, i32) {
    %c0_i32 = arith.constant 0 : i32
    %c0_i32_0 = arith.constant 0 : i32
    return %arg0, %c0_i32 : i32, i32
  }
  func.func @transform_4(%arg0: i32) -> (i32, i32, i32) {
    %c0_i32 = arith.constant 0 : i32
    %c0_i32_0 = arith.constant 0 : i32
    %c0_i32_1 = arith.constant 0 : i32
    return %arg0, %c0_i32, %c0_i32_0 : i32, i32, i32
  }
  func.func @transform_5(%arg0: i32) -> (i32, i32, i32) {
    %c0_i32 = arith.constant 0 : i32
    %c0_i32_0 = arith.constant 0 : i32
    %c0_i32_1 = arith.constant 0 : i32
    return %arg0, %c0_i32, %c0_i32_0 : i32, i32, i32
  }
}

module attributes {stable_mosaic.version = 11 : i64} {
  func.func @_affine_relu_kernel(%arg0: i32, %arg1: memref<32x128xf32, #tpu.memory_space<vmem>>, %arg2: memref<1x128xf32, #tpu.memory_space<vmem>>, %arg3: memref<1x128xf32, #tpu.memory_space<vmem>>, %arg4: memref<32x128xf32, #tpu.memory_space<vmem>>) attributes {dimension_semantics = [#tpu.dimension_semantics<parallel>], iteration_bounds = array<i64: 1>, scalar_prefetch = 0 : i64, scratch_operands = 0 : i64, tpu.core_type = #tpu.core_type<tc>, window_params = [{transform_indices = @transform_0, window_bounds = array<i64: 32, 128>}, {pipeline_mode = #tpu.pipeline_mode<synchronous>, transform_indices = @transform_1, window_bounds = array<i64: 1, 128>}, {pipeline_mode = #tpu.pipeline_mode<synchronous>, transform_indices = @transform_2, window_bounds = array<i64: 1, 128>}, {transform_indices = @transform_3, window_bounds = array<i64: 32, 128>}]} {
    %c0 = arith.constant 0 : index
    %c0_0 = arith.constant 0 : index
    %0 = vector.load %arg1[%c0, %c0_0] : memref<32x128xf32, #tpu.memory_space<vmem>>, vector<32x128xf32>
    %c0_1 = arith.constant 0 : index
    %c0_2 = arith.constant 0 : index
    %1 = vector.load %arg2[%c0_1, %c0_2] : memref<1x128xf32, #tpu.memory_space<vmem>>, vector<1x128xf32>
    %2 = vector.broadcast %1 : vector<1x128xf32> to vector<32x128xf32>
    %3 = arith.mulf %0, %2 : vector<32x128xf32>
    %c0_3 = arith.constant 0 : index
    %c0_4 = arith.constant 0 : index
    %4 = vector.load %arg3[%c0_3, %c0_4] : memref<1x128xf32, #tpu.memory_space<vmem>>, vector<1x128xf32>
    %5 = vector.broadcast %4 : vector<1x128xf32> to vector<32x128xf32>
    %6 = arith.addf %3, %5 : vector<32x128xf32>
    %cst = arith.constant 0.000000e+00 : f32
    %7 = vector.broadcast %cst : f32 to vector<32x128xf32>
    %8 = arith.maximumf %6, %7 : vector<32x128xf32>
    %c0_5 = arith.constant 0 : index
    %c0_6 = arith.constant 0 : index
    %9 = vector.load %arg4[%c0_5, %c0_6] : memref<32x128xf32, #tpu.memory_space<vmem>>, vector<32x128xf32>
    tpu.vector_store %arg4[%c0_5, %c0_6], %8 {strides = array<i32>} : memref<32x128xf32, #tpu.memory_space<vmem>>, vector<32x128xf32>,
    return
  }
  func.func @transform_0(%arg0: i32) -> (i32, i32) {
    %c0_i32 = arith.constant 0 : i32
    %c0_i32_0 = arith.constant 0 : i32
    return %arg0, %c0_i32 : i32, i32
  }
  func.func @transform_1(%arg0: i32) -> (i32, i32) {
    %c0_i32 = arith.constant 0 : i32
    %c0_i32_0 = arith.constant 0 : i32
    %c0_i32_1 = arith.constant 0 : i32
    return %c0_i32, %c0_i32_0 : i32, i32
  }
  func.func @transform_2(%arg0: i32) -> (i32, i32) {
    %c0_i32 = arith.constant 0 : i32
    %c0_i32_0 = arith.constant 0 : i32
    %c0_i32_1 = arith.constant 0 : i32
    return %c0_i32, %c0_i32_0 : i32, i32
  }
  func.func @transform_3(%arg0: i32) -> (i32, i32) {
    %c0_i32 = arith.constant 0 : i32
    %c0_i32_0 = arith.constant 0 : i32
    return %arg0, %c0_i32 : i32, i32
  }
}

module attributes {stable_mosaic.version = 11 : i64} {
  func.func @_conv_bias_stats_kernel(%arg0: i32, %arg1: memref<1x18x18x8xf32, #tpu.memory_space<vmem>>, %arg2: memref<3x3x8x8xf32, #tpu.memory_space<vmem>>, %arg3: memref<1x8xf32, #tpu.memory_space<vmem>>, %arg4: memref<256x8xf32, #tpu.memory_space<vmem>>, %arg5: memref<1x1x8xf32, #tpu.memory_space<vmem>>, %arg6: memref<1x1x8xf32, #tpu.memory_space<vmem>>) attributes {dimension_semantics = [#tpu.dimension_semantics<parallel>], iteration_bounds = array<i64: 2>, scalar_prefetch = 0 : i64, scratch_operands = 0 : i64, tpu.core_type = #tpu.core_type<tc>, window_params = [{transform_indices = @transform_0, window_bounds = array<i64: 1, 18, 18, 8>}, {pipeline_mode = #tpu.pipeline_mode<synchronous>, transform_indices = @transform_1, window_bounds = array<i64: 3, 3, 8, 8>}, {pipeline_mode = #tpu.pipeline_mode<synchronous>, transform_indices = @transform_2, window_bounds = array<i64: 1, 8>}, {transform_indices = @transform_3, window_bounds = array<i64: 256, 8>}, {transform_indices = @transform_4, window_bounds = array<i64: 1, 1, 8>}, {transform_indices = @transform_5, window_bounds = array<i64: 1, 1, 8>}]} {
    %cst = arith.constant 0.000000e+00 : f32
    %0 = vector.broadcast %cst : f32 to vector<256x8xf32>
    %c0 = arith.constant 0 : index
    %c0_0 = arith.constant 0 : index
    %c0_1 = arith.constant 0 : index
    %c0_2 = arith.constant 0 : index
    %1 = vector.load %arg1[%c0, %c0_0, %c0_1, %c0_2] : memref<1x18x18x8xf32, #tpu.memory_space<vmem>>, vector<1x16x16x8xf32>
    %2 = vector.shape_cast %1 : vector<1x16x16x8xf32> to vector<16x16x8xf32>
    %3 = vector.shape_cast %2 : vector<16x16x8xf32> to vector<256x8xf32>
    %c0_3 = arith.constant 0 : index
    %c0_4 = arith.constant 0 : index
    %c0_5 = arith.constant 0 : index
    %c0_6 = arith.constant 0 : index
    %4 = vector.load %arg2[%c0_3, %c0_4, %c0_5, %c0_6] : memref<3x3x8x8xf32, #tpu.memory_space<vmem>>, vector<1x1x8x8xf32>
    %5 = vector.shape_cast %4 : vector<1x1x8x8xf32> to vector<8x8xf32>
    %cst_7 = arith.constant dense<0.000000e+00> : vector<256x8xf32>
    %6 = tpu.matmul %3, %5, %cst_7 {dimension_numbers = #tpu.dot_dimension_numbers<[1], [0], [0], [1], [0, 0, 1, 1], [], []>} : vector<256x8xf32>, vector<8x8xf32>, vector<256x8xf32> -> vector<256x8xf32>
    %7 = arith.addf %0, %6 : vector<256x8xf32>
    %c0_8 = arith.constant 0 : index
    %c0_9 = arith.constant 0 : index
    %c1 = arith.constant 1 : index
    %c0_10 = arith.constant 0 : index
    %8 = vector.load %arg1[%c0_8, %c0_9, %c1, %c0_10] : memref<1x18x18x8xf32, #tpu.memory_space<vmem>>, vector<1x16x16x8xf32>
    %9 = vector.shape_cast %8 : vector<1x16x16x8xf32> to vector<16x16x8xf32>
    %10 = vector.shape_cast %9 : vector<16x16x8xf32> to vector<256x8xf32>
    %c0_11 = arith.constant 0 : index
    %c1_12 = arith.constant 1 : index
    %c0_13 = arith.constant 0 : index
    %c0_14 = arith.constant 0 : index
    %11 = vector.load %arg2[%c0_11, %c1_12, %c0_13, %c0_14] : memref<3x3x8x8xf32, #tpu.memory_space<vmem>>, vector<1x1x8x8xf32>
    %12 = vector.shape_cast %11 : vector<1x1x8x8xf32> to vector<8x8xf32>
    %cst_15 = arith.constant dense<0.000000e+00> : vector<256x8xf32>
    %13 = tpu.matmul %10, %12, %cst_15 {dimension_numbers = #tpu.dot_dimension_numbers<[1], [0], [0], [1], [0, 0, 1, 1], [], []>} : vector<256x8xf32>, vector<8x8xf32>, vector<256x8xf32> -> vector<256x8xf32>
    %14 = arith.addf %7, %13 : vector<256x8xf32>
    %c0_16 = arith.constant 0 : index
    %c0_17 = arith.constant 0 : index
    %c2 = arith.constant 2 : index
    %c0_18 = arith.constant 0 : index
    %15 = vector.load %arg1[%c0_16, %c0_17, %c2, %c0_18] : memref<1x18x18x8xf32, #tpu.memory_space<vmem>>, vector<1x16x16x8xf32>
    %16 = vector.shape_cast %15 : vector<1x16x16x8xf32> to vector<16x16x8xf32>
    %17 = vector.shape_cast %16 : vector<16x16x8xf32> to vector<256x8xf32>
    %c0_19 = arith.constant 0 : index
    %c2_20 = arith.constant 2 : index
    %c0_21 = arith.constant 0 : index
    %c0_22 = arith.constant 0 : index
    %18 = vector.load %arg2[%c0_19, %c2_20, %c0_21, %c0_22] : memref<3x3x8x8xf32, #tpu.memory_space<vmem>>, vector<1x1x8x8xf32>
    %19 = vector.shape_cast %18 : vector<1x1x8x8xf32> to vector<8x8xf32>
    %cst_23 = arith.constant dense<0.000000e+00> : vector<256x8xf32>
    %20 = tpu.matmul %17, %19, %cst_23 {dimension_numbers = #tpu.dot_dimension_numbers<[1], [0], [0], [1], [0, 0, 1, 1], [], []>} : vector<256x8xf32>, vector<8x8xf32>, vector<256x8xf32> -> vector<256x8xf32>
    %21 = arith.addf %14, %20 : vector<256x8xf32>
    %c0_24 = arith.constant 0 : index
    %c1_25 = arith.constant 1 : index
    %c0_26 = arith.constant 0 : index
    %c0_27 = arith.constant 0 : index
    %22 = vector.load %arg1[%c0_24, %c1_25, %c0_26, %c0_27] : memref<1x18x18x8xf32, #tpu.memory_space<vmem>>, vector<1x16x16x8xf32>
    %23 = vector.shape_cast %22 : vector<1x16x16x8xf32> to vector<16x16x8xf32>
    %24 = vector.shape_cast %23 : vector<16x16x8xf32> to vector<256x8xf32>
    %c1_28 = arith.constant 1 : index
    %c0_29 = arith.constant 0 : index
    %c0_30 = arith.constant 0 : index
    %c0_31 = arith.constant 0 : index
    %25 = vector.load %arg2[%c1_28, %c0_29, %c0_30, %c0_31] : memref<3x3x8x8xf32, #tpu.memory_space<vmem>>, vector<1x1x8x8xf32>
    %26 = vector.shape_cast %25 : vector<1x1x8x8xf32> to vector<8x8xf32>
    %cst_32 = arith.constant dense<0.000000e+00> : vector<256x8xf32>
    %27 = tpu.matmul %24, %26, %cst_32 {dimension_numbers = #tpu.dot_dimension_numbers<[1], [0], [0], [1], [0, 0, 1, 1], [], []>} : vector<256x8xf32>, vector<8x8xf32>, vector<256x8xf32> -> vector<256x8xf32>
    %28 = arith.addf %21, %27 : vector<256x8xf32>
    %c0_33 = arith.constant 0 : index
    %c1_34 = arith.constant 1 : index
    %c1_35 = arith.constant 1 : index
    %c0_36 = arith.constant 0 : index
    %29 = vector.load %arg1[%c0_33, %c1_34, %c1_35, %c0_36] : memref<1x18x18x8xf32, #tpu.memory_space<vmem>>, vector<1x16x16x8xf32>
    %30 = vector.shape_cast %29 : vector<1x16x16x8xf32> to vector<16x16x8xf32>
    %31 = vector.shape_cast %30 : vector<16x16x8xf32> to vector<256x8xf32>
    %c1_37 = arith.constant 1 : index
    %c1_38 = arith.constant 1 : index
    %c0_39 = arith.constant 0 : index
    %c0_40 = arith.constant 0 : index
    %32 = vector.load %arg2[%c1_37, %c1_38, %c0_39, %c0_40] : memref<3x3x8x8xf32, #tpu.memory_space<vmem>>, vector<1x1x8x8xf32>
    %33 = vector.shape_cast %32 : vector<1x1x8x8xf32> to vector<8x8xf32>
    %cst_41 = arith.constant dense<0.000000e+00> : vector<256x8xf32>
    %34 = tpu.matmul %31, %33, %cst_41 {dimension_numbers = #tpu.dot_dimension_numbers<[1], [0], [0], [1], [0, 0, 1, 1], [], []>} : vector<256x8xf32>, vector<8x8xf32>, vector<256x8xf32> -> vector<256x8xf32>
    %35 = arith.addf %28, %34 : vector<256x8xf32>
    %c0_42 = arith.constant 0 : index
    %c1_43 = arith.constant 1 : index
    %c2_44 = arith.constant 2 : index
    %c0_45 = arith.constant 0 : index
    %36 = vector.load %arg1[%c0_42, %c1_43, %c2_44, %c0_45] : memref<1x18x18x8xf32, #tpu.memory_space<vmem>>, vector<1x16x16x8xf32>
    %37 = vector.shape_cast %36 : vector<1x16x16x8xf32> to vector<16x16x8xf32>
    %38 = vector.shape_cast %37 : vector<16x16x8xf32> to vector<256x8xf32>
    %c1_46 = arith.constant 1 : index
    %c2_47 = arith.constant 2 : index
    %c0_48 = arith.constant 0 : index
    %c0_49 = arith.constant 0 : index
    %39 = vector.load %arg2[%c1_46, %c2_47, %c0_48, %c0_49] : memref<3x3x8x8xf32, #tpu.memory_space<vmem>>, vector<1x1x8x8xf32>
    %40 = vector.shape_cast %39 : vector<1x1x8x8xf32> to vector<8x8xf32>
    %cst_50 = arith.constant dense<0.000000e+00> : vector<256x8xf32>
    %41 = tpu.matmul %38, %40, %cst_50 {dimension_numbers = #tpu.dot_dimension_numbers<[1], [0], [0], [1], [0, 0, 1, 1], [], []>} : vector<256x8xf32>, vector<8x8xf32>, vector<256x8xf32> -> vector<256x8xf32>
    %42 = arith.addf %35, %41 : vector<256x8xf32>
    %c0_51 = arith.constant 0 : index
    %c2_52 = arith.constant 2 : index
    %c0_53 = arith.constant 0 : index
    %c0_54 = arith.constant 0 : index
    %43 = vector.load %arg1[%c0_51, %c2_52, %c0_53, %c0_54] : memref<1x18x18x8xf32, #tpu.memory_space<vmem>>, vector<1x16x16x8xf32>
    %44 = vector.shape_cast %43 : vector<1x16x16x8xf32> to vector<16x16x8xf32>
    %45 = vector.shape_cast %44 : vector<16x16x8xf32> to vector<256x8xf32>
    %c2_55 = arith.constant 2 : index
    %c0_56 = arith.constant 0 : index
    %c0_57 = arith.constant 0 : index
    %c0_58 = arith.constant 0 : index
    %46 = vector.load %arg2[%c2_55, %c0_56, %c0_57, %c0_58] : memref<3x3x8x8xf32, #tpu.memory_space<vmem>>, vector<1x1x8x8xf32>
    %47 = vector.shape_cast %46 : vector<1x1x8x8xf32> to vector<8x8xf32>
    %cst_59 = arith.constant dense<0.000000e+00> : vector<256x8xf32>
    %48 = tpu.matmul %45, %47, %cst_59 {dimension_numbers = #tpu.dot_dimension_numbers<[1], [0], [0], [1], [0, 0, 1, 1], [], []>} : vector<256x8xf32>, vector<8x8xf32>, vector<256x8xf32> -> vector<256x8xf32>
    %49 = arith.addf %42, %48 : vector<256x8xf32>
    %c0_60 = arith.constant 0 : index
    %c2_61 = arith.constant 2 : index
    %c1_62 = arith.constant 1 : index
    %c0_63 = arith.constant 0 : index
    %50 = vector.load %arg1[%c0_60, %c2_61, %c1_62, %c0_63] : memref<1x18x18x8xf32, #tpu.memory_space<vmem>>, vector<1x16x16x8xf32>
    %51 = vector.shape_cast %50 : vector<1x16x16x8xf32> to vector<16x16x8xf32>
    %52 = vector.shape_cast %51 : vector<16x16x8xf32> to vector<256x8xf32>
    %c2_64 = arith.constant 2 : index
    %c1_65 = arith.constant 1 : index
    %c0_66 = arith.constant 0 : index
    %c0_67 = arith.constant 0 : index
    %53 = vector.load %arg2[%c2_64, %c1_65, %c0_66, %c0_67] : memref<3x3x8x8xf32, #tpu.memory_space<vmem>>, vector<1x1x8x8xf32>
    %54 = vector.shape_cast %53 : vector<1x1x8x8xf32> to vector<8x8xf32>
    %cst_68 = arith.constant dense<0.000000e+00> : vector<256x8xf32>
    %55 = tpu.matmul %52, %54, %cst_68 {dimension_numbers = #tpu.dot_dimension_numbers<[1], [0], [0], [1], [0, 0, 1, 1], [], []>} : vector<256x8xf32>, vector<8x8xf32>, vector<256x8xf32> -> vector<256x8xf32>
    %56 = arith.addf %49, %55 : vector<256x8xf32>
    %c0_69 = arith.constant 0 : index
    %c2_70 = arith.constant 2 : index
    %c2_71 = arith.constant 2 : index
    %c0_72 = arith.constant 0 : index
    %57 = vector.load %arg1[%c0_69, %c2_70, %c2_71, %c0_72] : memref<1x18x18x8xf32, #tpu.memory_space<vmem>>, vector<1x16x16x8xf32>
    %58 = vector.shape_cast %57 : vector<1x16x16x8xf32> to vector<16x16x8xf32>
    %59 = vector.shape_cast %58 : vector<16x16x8xf32> to vector<256x8xf32>
    %c2_73 = arith.constant 2 : index
    %c2_74 = arith.constant 2 : index
    %c0_75 = arith.constant 0 : index
    %c0_76 = arith.constant 0 : index
    %60 = vector.load %arg2[%c2_73, %c2_74, %c0_75, %c0_76] : memref<3x3x8x8xf32, #tpu.memory_space<vmem>>, vector<1x1x8x8xf32>
    %61 = vector.shape_cast %60 : vector<1x1x8x8xf32> to vector<8x8xf32>
    %cst_77 = arith.constant dense<0.000000e+00> : vector<256x8xf32>
    %62 = tpu.matmul %59, %61, %cst_77 {dimension_numbers = #tpu.dot_dimension_numbers<[1], [0], [0], [1], [0, 0, 1, 1], [], []>} : vector<256x8xf32>, vector<8x8xf32>, vector<256x8xf32> -> vector<256x8xf32>
    %63 = arith.addf %56, %62 : vector<256x8xf32>
    %c0_78 = arith.constant 0 : index
    %c0_79 = arith.constant 0 : index
    %64 = vector.load %arg3[%c0_78, %c0_79] : memref<1x8xf32, #tpu.memory_space<vmem>>, vector<1x8xf32>
    %65 = vector.broadcast %64 : vector<1x8xf32> to vector<256x8xf32>
    %66 = arith.addf %63, %65 : vector<256x8xf32>
    %c0_80 = arith.constant 0 : index
    %c0_81 = arith.constant 0 : index
    %67 = vector.load %arg4[%c0_80, %c0_81] : memref<256x8xf32, #tpu.memory_space<vmem>>, vector<256x8xf32>
    tpu.vector_store %arg4[%c0_80, %c0_81], %66 {strides = array<i32>} : memref<256x8xf32, #tpu.memory_space<vmem>>, vector<256x8xf32>,
    %cst_82 = arith.constant dense<0.000000e+00> : vector<8xf32>
    %68 = vector.multi_reduction <add>, %66, %cst_82 [0] : vector<256x8xf32> to vector<8xf32>
    %69 = vector.shape_cast %68 : vector<8xf32> to vector<1x8xf32>
    %c0_83 = arith.constant 0 : index
    %c0_84 = arith.constant 0 : index
    %c0_85 = arith.constant 0 : index
    %70 = vector.load %arg5[%c0_83, %c0_84, %c0_85] : memref<1x1x8xf32, #tpu.memory_space<vmem>>, vector<1x1x8xf32>
    %71 = vector.shape_cast %70 : vector<1x1x8xf32> to vector<1x8xf32>
    %72 = vector.shape_cast %69 : vector<1x8xf32> to vector<1x1x8xf32>
    tpu.vector_store %arg5[%c0_83, %c0_84, %c0_85], %72 {strides = array<i32>} : memref<1x1x8xf32, #tpu.memory_space<vmem>>, vector<1x1x8xf32>,
    %73 = arith.mulf %66, %66 : vector<256x8xf32>
    %cst_86 = arith.constant dense<0.000000e+00> : vector<8xf32>
    %74 = vector.multi_reduction <add>, %73, %cst_86 [0] : vector<256x8xf32> to vector<8xf32>
    %75 = vector.shape_cast %74 : vector<8xf32> to vector<1x8xf32>
    %c0_87 = arith.constant 0 : index
    %c0_88 = arith.constant 0 : index
    %c0_89 = arith.constant 0 : index
    %76 = vector.load %arg6[%c0_87, %c0_88, %c0_89] : memref<1x1x8xf32, #tpu.memory_space<vmem>>, vector<1x1x8xf32>
    %77 = vector.shape_cast %76 : vector<1x1x8xf32> to vector<1x8xf32>
    %78 = vector.shape_cast %75 : vector<1x8xf32> to vector<1x1x8xf32>
    tpu.vector_store %arg6[%c0_87, %c0_88, %c0_89], %78 {strides = array<i32>} : memref<1x1x8xf32, #tpu.memory_space<vmem>>, vector<1x1x8xf32>,
    return
  }
  func.func @transform_0(%arg0: i32) -> (i32, i32, i32, i32) {
    %c0_i32 = arith.constant 0 : i32
    %c0_i32_0 = arith.constant 0 : i32
    %c0_i32_1 = arith.constant 0 : i32
    %c0_i32_2 = arith.constant 0 : i32
    return %arg0, %c0_i32, %c0_i32_0, %c0_i32_1 : i32, i32, i32, i32
  }
  func.func @transform_1(%arg0: i32) -> (i32, i32, i32, i32) {
    %c0_i32 = arith.constant 0 : i32
    %c0_i32_0 = arith.constant 0 : i32
    %c0_i32_1 = arith.constant 0 : i32
    %c0_i32_2 = arith.constant 0 : i32
    %c0_i32_3 = arith.constant 0 : i32
    return %c0_i32, %c0_i32_0, %c0_i32_1, %c0_i32_2 : i32, i32, i32, i32
  }
  func.func @transform_2(%arg0: i32) -> (i32, i32) {
    %c0_i32 = arith.constant 0 : i32
    %c0_i32_0 = arith.constant 0 : i32
    %c0_i32_1 = arith.constant 0 : i32
    return %c0_i32, %c0_i32_0 : i32, i32
  }
  func.func @transform_3(%arg0: i32) -> (i32, i32) {
    %c0_i32 = arith.constant 0 : i32
    %c0_i32_0 = arith.constant 0 : i32
    return %arg0, %c0_i32 : i32, i32
  }
  func.func @transform_4(%arg0: i32) -> (i32, i32, i32) {
    %c0_i32 = arith.constant 0 : i32
    %c0_i32_0 = arith.constant 0 : i32
    %c0_i32_1 = arith.constant 0 : i32
    return %arg0, %c0_i32, %c0_i32_0 : i32, i32, i32
  }
  func.func @transform_5(%arg0: i32) -> (i32, i32, i32) {
    %c0_i32 = arith.constant 0 : i32
    %c0_i32_0 = arith.constant 0 : i32
    %c0_i32_1 = arith.constant 0 : i32
    return %arg0, %c0_i32, %c0_i32_0 : i32, i32, i32
  }
}

</mosaic_0001>

<bundles_post_ra>
// kernel: tile.23
= control target key start
LH: loop header
LB: loop body
LE: loop exit
PB: predicated region body
PF: predicated region fallthrough
CT: control target
= control target key end

     0   :  { %s28_s0 = inlined_call_operand.vmem [shape: f32[8], index: 0, kind: input, shape index: {}]   ;;  %s29_s1 = inlined_call_operand.vmem [shape: f32[16,8], index: 1, kind: output, shape index: {}]  }
   0x1   :  { %v4_v0 = vld [vmem:[%s28_s0] ss:$0 sm:$0xff] }
   0x2   :  { %5 = vst [vmem:[%s29_s1] sm:$0xff] %v4_v0  ;;  %8 = vst [vmem:[%s29_s1 + $0x8] sm:$0xff] %v4_v0 }

// kernel: tile.24
= control target key start
LH: loop header
LB: loop body
LE: loop exit
PB: predicated region body
PF: predicated region fallthrough
CT: control target
= control target key end

     0   :  { %s131_s10 = smov 120   ;;  %s132_s11 = smov 104   ;;  %vm3_vm0 = vcmask 64512   ;;  %vm9_vm1 = vcmask 1048512   ;;  %vm15_vm2 = vcmask 982912   ;;  %vm21_vm3 = vcmask 917312   ;;  %s207_s0 = inlined_call_operand.vmem [shape: f32[16,8], index: 0, kind: input, shape index: {}]   ;;  %s208_s1 = inlined_call_operand.vmem [shape: f32[1,128], index: 1, kind: output, shape index: {}]  }
   0x1   :  { %v101_v0 = vld [vmem:[%s207_s0 + $0xf] sm:$0x1]   ;;  %v103_v1 = vld [vmem:[%s207_s0 + $0xd] sm:$0x1]   ;;  %v102_v2 = vld [vmem:[%s207_s0 + $0xe] sm:$0x1]  }
   0x2   :  { %7 = vrot.lane.b32.xlu0 %v101_v0, %s131_s10  ;;  %19 = vrot.lane.b32.xlu1 %v103_v1, %s132_s11  ;;  %v104_v3 = vld [vmem:[%s207_s0 + $0xc] sm:$0x1]   ;;  %s133_s16 = smov 112   ;;  %s134_s17 = smov 96   ;;  %v105_v4 = vld [vmem:[%s207_s0 + $0xb] sm:$0x1]  }
   0x3   :  { %v106_v5 = vld [vmem:[%s207_s0 + $0xa] sm:$0x1]   ;;  %v2_v6 = vld [vmem:[%s207_s0] sm:$0x1]   ;;  %s135_s24 = smov 88   ;;  %s136_s25 = smov 80  }
   0x4   :  { %4 = vst.msk [vmem:[#allocation0] sm:$0x1] %vm3_vm0, %v2_v6   ;;  %v107_v7 = vld [vmem:[%s207_s0 + $0x9] sm:$0x1]   ;;  %v108_v8 = vld [vmem:[%s207_s0 + $0x8] sm:$0x1]  }
   0x5   :  { %s137_s30 = smov 72   ;;  %s138_s2 = smov 64   ;;  %v109_v9 = vld [vmem:[%s207_s0 + $0x7] sm:$0x1]   ;;  %v110_v10 = vld [vmem:[%s207_s0 + $0x6] sm:$0x1]  }
   0x6   :  { %13 = vrot.lane.b32.xlu0 %v102_v2, %s133_s16  ;;  %25 = vrot.lane.b32.xlu1 %v104_v3, %s134_s17  ;;  %s139_s7 = smov 56   ;;  %s140_s8 = smov 48   ;;  %v111_v11 = vld [vmem:[%s207_s0 + $0x5] sm:$0x1]   ;;  %v112_v12 = vld [vmem:[%s207_s0 + $0x4] sm:$0x1]  }
   0x7   :  { %s141_s13 = smov 40   ;;  %s142_s14 = smov 32   ;;  %v113_v13 = vld [vmem:[%s207_s0 + $0x3] sm:$0x1]   ;;  %v114_v14 = vld [vmem:[%s207_s0 + $0x2] sm:$0x1]  }
   0x8   :  { %s143_s19 = smov 24   ;;  %s144_s20 = smov 16   ;;  %v115_v15 = vld [vmem:[%s207_s0 + $0x1] sm:$0x1]   ;;  %vm27_vm4 = vcmask 851712   ;;  %vm33_vm5 = vcmask 786112  }
   0x9   :  { %s145_s0 = smov 8   ;;  %vm39_vm6 = vcmask 720512   ;;  %vm45_vm7 = vcmask 654912   ;;  %vm51_vm8 = vcmask 589312   ;;  %vm57_vm9 = vcmask 523712  }
   0xa   :  { %31 = vrot.lane.b32.xlu0 %v105_v4, %s135_s24  ;;  %37 = vrot.lane.b32.xlu1 %v106_v5, %s136_s25  ;;  %vm63_vm10 = vcmask 458112   ;;  %vm69_vm11 = vcmask 392512   ;;  %vm75_vm12 = vcmask 326912   ;;  %vm81_vm13 = vcmask 261312  }
   0xb   :  { %vm87_vm14 = vcmask 195712   ;;  %vm93_vm15 = vcmask 130112  }
   0xe   :  { %43 = vrot.lane.b32.xlu0 %v107_v7, %s137_s30  ;;  %49 = vrot.lane.b32.xlu1 %v108_v8, %s138_s2 }
  0x12   :  { %55 = vrot.lane.b32.xlu0 %v109_v9, %s139_s7  ;;  %61 = vrot.lane.b32.xlu1 %v110_v10, %s140_s8 }
  0x16   :  { %67 = vrot.lane.b32.xlu0 %v111_v11, %s141_s13  ;;  %73 = vrot.lane.b32.xlu1 %v112_v12, %s142_s14 }
  0x1a   :  { %79 = vrot.lane.b32.xlu0 %v113_v13, %s143_s19  ;;  %85 = vrot.lane.b32.xlu1 %v114_v14, %s144_s20 }
  0x1e   :  { %91 = vrot.lane.b32.xlu0 %v115_v15, %s145_s0 }
  0x74   :  { %v8_v16 = vpop.permute.xlu0 %7   ;;  %v20_v17 = vpop.permute.xlu1 %19  }
  0x75   :  { %10 = vst.msk [vmem:[#allocation0] sm:$0x1] %vm9_vm1, %v8_v16  }
  0x78   :  { %v14_v18 = vpop.permute.xlu0 %13   ;;  %v26_v19 = vpop.permute.xlu1 %25  }
  0x79   :  { %16 = vst.msk [vmem:[#allocation0] sm:$0x1] %vm15_vm2, %v14_v18  }
  0x7a   :  { %22 = vst.msk [vmem:[#allocation0] sm:$0x1] %vm21_vm3, %v20_v17  }
  0x7b   :  { %28 = vst.msk [vmem:[#allocation0] sm:$0x1] %vm27_vm4, %v26_v19  }
  0x7c   :  { %v32_v20 = vpop.permute.xlu0 %31   ;;  %v38_v21 = vpop.permute.xlu1 %37  }
  0x7d   :  { %34 = vst.msk [vmem:[#allocation0] sm:$0x1] %vm33_vm5, %v32_v20  }
  0x7e   :  { %40 = vst.msk [vmem:[#allocation0] sm:$0x1] %vm39_vm6, %v38_v21  }
  0x80   :  { %v44_v22 = vpop.permute.xlu0 %43   ;;  %v50_v23 = vpop.permute.xlu1 %49  }
  0x81   :  { %46 = vst.msk [vmem:[#allocation0] sm:$0x1] %vm45_vm7, %v44_v22  }
  0x82   :  { %52 = vst.msk [vmem:[#allocation0] sm:$0x1] %vm51_vm8, %v50_v23  }
  0x84   :  { %v56_v24 = vpop.permute.xlu0 %55   ;;  %v62_v25 = vpop.permute.xlu1 %61  }
  0x85   :  { %58 = vst.msk [vmem:[#allocation0] sm:$0x1] %vm57_vm9, %v56_v24  }
  0x86   :  { %64 = vst.msk [vmem:[#allocation0] sm:$0x1] %vm63_vm10, %v62_v25  }
  0x88   :  { %v68_v26 = vpop.permute.xlu0 %67   ;;  %v74_v27 = vpop.permute.xlu1 %73  }
  0x89   :  { %70 = vst.msk [vmem:[#allocation0] sm:$0x1] %vm69_vm11, %v68_v26  }
  0x8a   :  { %76 = vst.msk [vmem:[#allocation0] sm:$0x1] %vm75_vm12, %v74_v27  }
  0x8c   :  { %v80_v28 = vpop.permute.xlu0 %79   ;;  %v86_v29 = vpop.permute.xlu1 %85  }
  0x8d   :  { %82 = vst.msk [vmem:[#allocation0] sm:$0x1] %vm81_vm13, %v80_v28  }
  0x8e   :  { %88 = vst.msk [vmem:[#allocation0] sm:$0x1] %vm87_vm14, %v86_v29  }
  0x90   :  { %v92_v30 = vpop.permute.xlu0 %91  }
  0x91   :  { %94 = vst.msk [vmem:[#allocation0] sm:$0x1] %vm93_vm15, %v92_v30  }
  0x98   :  { %v98_v31 = vld [vmem:[#allocation0] sm:$0x1] }
  0x99   :  { %100 = vst [vmem:[%s208_s1] sm:$0x1] %v98_v31 }

// kernel: up_forward.5
= control target key start
LH: loop header
LB: loop body
LE: loop exit
PB: predicated region body
PF: predicated region fallthrough
CT: control target
= control target key end

     0   :  { %s104_s0 = inlined_call_operand.vmem [shape: f32[32,128], index: 0, kind: input, shape index: {}]   ;;  %s105_s1 = inlined_call_operand.vmem [shape: f32[1,128], index: 1, kind: input, shape index: {}]   ;;  %s106_s2 = inlined_call_operand.vmem [shape: f32[1,128], index: 2, kind: input, shape index: {}]   ;;  %s107_s3 = inlined_call_operand.vmem [shape: f32[32,128], index: 3, kind: output, shape index: {}]  }
   0x1   :  { %v14_v0 = vld [vmem:[%s104_s0] sm:$0xff]  ;;  %v15_v4 = vld [vmem:[%s104_s0 + $0x8] sm:$0xff]  ;;  %v16_v5 = vld [vmem:[%s104_s0 + $0x10] sm:$0xff] }
   0x2   :  { %v52_v1 = vld [vmem:[%s105_s1] ss:$0 sm:$0xff]  ;;  %v17_v6 = vld [vmem:[%s104_s0 + $0x18] sm:$0xff] }
   0x3   :  { %v53_v2 = vld [vmem:[%s106_s2] ss:$0 sm:$0xff]  ;;  %v25_v3 = vmul.f32 %v52_v1, %v14_v0  ;;  %v26_v7 = vmul.f32 %v52_v1, %v15_v4  ;;  %v27_v8 = vmul.f32 %v52_v1, %v16_v5  ;;  %v28_v9 = vmul.f32 %v52_v1, %v17_v6 }
   0x5   :  { %v36_v10 = vadd.f32 %v53_v2, %v25_v3  ;;  %v37_v11 = vadd.f32 %v53_v2, %v26_v7  ;;  %v38_v12 = vadd.f32 %v53_v2, %v27_v8  ;;  %v39_v13 = vadd.f32 %v53_v2, %v28_v9 }
   0x7   :  { %v40_v14 = vmax.f32 %v36_v10, 0.0  ;;  %v41_v15 = vmax.f32 %v37_v11, 0.0  ;;  %v42_v16 = vmax.f32 %v38_v12, 0.0  ;;  %v43_v17 = vmax.f32 %v39_v13, 0.0 }
   0x9   :  { %44 = vst [vmem:[%s107_s3] sm:$0xff] %v40_v14  ;;  %45 = vst [vmem:[%s107_s3 + $0x8] sm:$0xff] %v41_v15 }
   0xa   :  { %46 = vst [vmem:[%s107_s3 + $0x10] sm:$0xff] %v42_v16  ;;  %47 = vst [vmem:[%s107_s3 + $0x18] sm:$0xff] %v43_v17 }

// kernel: up_forward.4
= control target key start
LH: loop header
LB: loop body
LE: loop exit
PB: predicated region body
PF: predicated region fallthrough
CT: control target
= control target key end

     0   :  { %s5646_s18 = smov 0   ;;  %s6810_s0 = inlined_call_operand.vmem [shape: f32[2,18,18,16], index: 0, kind: input, shape index: {}]   ;;  %s6811_s1 = inlined_call_operand.vmem [shape: f32[3,3,16,8], index: 1, kind: input, shape index: {}]   ;;  %s6812_s2 = inlined_call_operand.vmem [shape: f32[1,8], index: 2, kind: input, shape index: {}]   ;;  %s6813_s3 = inlined_call_operand.vmem [shape: f32[512,8], index: 3, kind: output, shape index: {0}]   ;;  %s6814_s4 = inlined_call_operand.vmem [shape: f32[2,1,8], index: 4, kind: output, shape index: {1}]   ;;  %s6815_s5 = inlined_call_operand.vmem [shape: f32[2,1,8], index: 5, kind: output, shape index: {2}]  }
   0x1 LB: > { %s5652_s19 = sadd.s32 4294967295, %s5614_s18   ;;  %p4028_p0 = scmp.ge.s32.totalorder %s5614_s18, 1  ;;  %s5614_s18 = sphi %s5646_s18, %s16_s18  }
   0x2   : > { %p192_p1 = scmp.lt.s32.totalorder %s5614_s18, 3 }
   0x4   : > { %p193_p2 = pnand %p4028_p0, %p192_p1 }
   0x6   : > { %196 = sbr.rel (%p193_p2) target bundleno = 543 (0x21f), region = 32 }
   0xd   : > { %v4032_v0 = vld [vmem:[%s6811_s1 + $0x10] sm:$0xff]  ;;  %v4033_v1 = vld [vmem:[%s6811_s1 + $0x18] sm:$0xff]  ;;  %v4230_v2 = vld [vmem:[%s6811_s1 + $0x40] sm:$0xff]  ;;  %p226_p3 = scmp.lt.s32.totalorder %s5652_s19, 1  ;;  %vm312_vm0 = vcmask 130048   ;;  %s4030_s14 = sshll.u32 %s5652_s19, 5 }
   0xe   : > { %v5305_v3 = vpack.c.bf16 %v4033_v1, %v4032_v0  ;;  %v4231_v4 = vld [vmem:[%s6811_s1 + $0x48] sm:$0xff]  ;;  %v275_v5 = vld [vmem:[%s6811_s1] sm:$0xff]  ;;  %v4296_v9 = vld [vmem:[%s6811_s1 + $0x50] sm:$0xff]  ;;  %p232_p4 = scmp.lt.s32.totalorder %s4030_s14, 63  ;;  %vm3712_vm1 = vcmask 64512   ;;  %vm3814_vm2 = vcmask 57344  }
   0xf   : > { %v276_v6 = vld [vmem:[%s6811_s1 + $0x8] sm:$0xff]  ;;  %v5675_v7 = vpack.c.bf16 %v4231_v4, %v4230_v2  ;;  %s5678_s7 = scalar_select %p226_p3, %s5652_s19, 1  ;;  %v4297_v10 = vld [vmem:[%s6811_s1 + $0x58] sm:$0xff]  ;;  %v4362_v12 = vld [vmem:[%s6811_s1 + $0x60] sm:$0xff] }
  0x10   : > { %v5309_v8 = vpack.c.bf16 %v276_v6, %v275_v5  ;;  %5306 = vmatprep.subr.bf16.mxu1 %v5305_v3  ;;  %v5325_v11 = vpack.c.bf16 %v4297_v10, %v4296_v9  ;;  %v4363_v13 = vld [vmem:[%s6811_s1 + $0x68] sm:$0xff]  ;;  %v4098_v14 = vld [vmem:[%s6811_s1 + $0x20] sm:$0xff]  ;;  %v4428_v37 = vld [vmem:[%s6811_s1 + $0x70] sm:$0xff]  ;;  %s6928_s14 = smov (!%p232_p4, %s4030_s14), 63 }
  0x11   : > { %5322 = vmatprep.subr.bf16.mxu0 %v5675_v7  ;;  %5308 = vmatpush3.bf16.msra.mxu1 %v5305_v3  ;;  %s5599_s12 = smul.u32 432, %s5678_s7  ;;  %v4099_v15 = vld [vmem:[%s6811_s1 + $0x28] sm:$0xff]  ;;  %v5329_v21 = vpack.c.bf16 %v4363_v13, %v4362_v12  ;;  %v4429_v38 = vld [vmem:[%s6811_s1 + $0x78] sm:$0xff]  ;;  %s4031_s15 = sshll.u32 %s6928_s14, 3 }
  0x12   : > { %5324 = vmatpush3.bf16.msra.mxu0 %v5675_v7  ;;  %5310 = vmatprep.subr.bf16.mxu1 %v5309_v8  ;;  %v5715_v22 = vpack.c.bf16 %v4099_v15, %v4098_v14  ;;  %v5832_v41 = vpack.c.bf16 %v4429_v38, %v4428_v37  ;;  %v4165_v9 = vld [vmem:[%s6811_s1 + $0x38] sm:$0xff]  ;;  %s6627_s21 = scalar_lea.vmem %s6813_s3, %s4031_s15  ;;  %s239_s24 = scalar_lea.vmem %s6814_s4, %s5678_s7 }
  0x13   : > { %s5704_s25 = scalar_lea.vmem %s6810_s0, %s5599_s12  ;;  %5326 = vmatprep.subr.bf16.mxu0 %v5325_v11  ;;  %s242_s27 = scalar_lea.vmem %s6815_s5, %s5678_s7 }
  0x14   : > { %v277_v16 = vld [vmem:[%s5704_s25 + $0x1] sm:$0xff]  ;;  %v4198_v17 = vld [vmem:[%s5704_s25 + $0x19] sm:$0xff]  ;;  %v278_v18 = vld [vmem:[%s5704_s25 + $0x9] sm:$0xff] }
  0x15   : > { %4841 = vmatprep.mubr.msk.f32.mxu1 %vm312_vm0, %v277_v16  ;;  %5049 = vmatprep.mubr.msk.f32.mxu0 %vm312_vm0, %v4198_v17  ;;  %v4199_v19 = vld [vmem:[%s5704_s25 + $0x21] sm:$0xff]  ;;  %v5713_v20 = vld [vmem:[%s5704_s25 + $0x31] sm:$0xff]  ;;  %v5720_v23 = vld [vmem:[%s5704_s25 + $0x39] sm:$0xff] }
  0x16   : > { %4842 = vmatmul.mubr.msk.f32.vlgmr.msra.gmra.mrb[0].mxu1 %vm312_vm0, %v278_v18  ;;  %5050 = vmatmul.mubr.msk.f32.vlgmr.msra.gmra.mrb[0].mxu0 %vm312_vm0, %v4199_v19  ;;  %v5726_v24 = vld [vmem:[%s5704_s25 + $0x49] sm:$0xff]  ;;  %v5737_v25 = vld [vmem:[%s5704_s25 + $0x51] sm:$0xff]  ;;  %v5740_v26 = vld [vmem:[%s5704_s25 + $0x61] sm:$0xff] }
  0x17   : > { %5312 = vmatpush3.bf16.msra.mxu1 %v5309_v8  ;;  %5328 = vmatpush3.bf16.msra.mxu0 %v5325_v11  ;;  %v5751_v27 = vld [vmem:[%s5704_s25 + $0x69] sm:$0xff]  ;;  %v5754_v28 = vld [vmem:[%s5704_s25 + $0x79] sm:$0xff]  ;;  %v5765_v29 = vld [vmem:[%s5704_s25 + $0x81] sm:$0xff] }
  0x18   : > { %4844 = vmatprep.mubr.msk.f32.mxu1 %vm312_vm0, %v4198_v17  ;;  %5052 = vmatprep.mubr.msk.f32.mxu0 %vm312_vm0, %v5713_v20  ;;  %v5768_v30 = vld [vmem:[%s5704_s25 + $0x91] sm:$0xff]  ;;  %v5779_v31 = vld [vmem:[%s5704_s25 + $0x99] sm:$0xff]  ;;  %v5782_v32 = vld [vmem:[%s5704_s25 + $0xa9] sm:$0xff] }
  0x19   : > { %5330 = vmatprep.subr.bf16.mxu0 %v5329_v21  ;;  %5314 = vmatprep.subr.bf16.mxu1 %v5715_v22  ;;  %v5793_v33 = vld [vmem:[%s5704_s25 + $0xb1] sm:$0xff]  ;;  %v5796_v34 = vld [vmem:[%s5704_s25 + $0xc1] sm:$0xff]  ;;  %v5807_v35 = vld [vmem:[%s5704_s25 + $0xc9] sm:$0xff] }
  0x1a   : > { %4845 = vmatmul.mubr.msk.f32.gmra.mrb[2].mxu1 %vm312_vm0, %v4199_v19  ;;  %5053 = vmatmul.mubr.msk.f32.gmra.mrb[2].mxu0 %vm312_vm0, %v5720_v23  ;;  %v5810_v36 = vld [vmem:[%s5704_s25 + $0x1a] sm:$0xff]  ;;  %v5827_v39 = vld [vmem:[%s5704_s25 + $0x22] sm:$0xff]  ;;  %v5835_v42 = vld [vmem:[%s5704_s25 + $0x32] sm:$0xff] }
  0x1b   : > { %4847 = vmatprep.mubr.msk.f32.mxu1 %vm312_vm0, %v5713_v20  ;;  %5055 = vmatprep.mubr.msk.f32.mxu0 %vm312_vm0, %v5726_v24  ;;  %v5830_v40 = vld [vmem:[%s5704_s25 + $0xd9] sm:$0xff]  ;;  %v5844_v43 = vld [vmem:[%s5704_s25 + $0xe1] sm:$0xff]  ;;  %v5852_v45 = vld [vmem:[%s5704_s25 + $0xf1] sm:$0xff] }
  0x1c   : > { %6863 = vst [vmem:[#allocation2_spill] sm:$0xff] %v5830_v40  ;;  %6864 = vst [vmem:[#allocation3_spill] sm:$0xff] %v5844_v43  ;;  %v5847_v44 = vld [vmem:[%s5704_s25 + $0x3a] sm:$0xff]  ;;  %v5855_v46 = vld [vmem:[%s5704_s25 + $0x4a] sm:$0xff] }
  0x1d   : > { %6865 = vst [vmem:[#allocation4_spill] sm:$0xff] %v5852_v45  ;;  %v5867_v47 = vld [vmem:[%s5704_s25 + $0xf9] sm:$0xff]  ;;  %v5873_v49 = vld [vmem:[%s5704_s25 + $0x109] sm:$0xff]  ;;  %v5887_v51 = vld [vmem:[%s5704_s25 + $0x111] sm:$0xff] }
  0x1e   : > { %4848 = vmatmul.mubr.msk.f32.gmra.mrb[4].mxu1 %vm312_vm0, %v5720_v23  ;;  %5056 = vmatmul.mubr.msk.f32.gmra.mrb[4].mxu0 %vm312_vm0, %v5737_v25  ;;  %6866 = vst [vmem:[#allocation5_spill] sm:$0xff] %v5867_v47  ;;  %v5870_v48 = vld [vmem:[%s5704_s25 + $0x52] sm:$0xff]  ;;  %6867 = vst [vmem:[#allocation6_spill] sm:$0xff] %v5873_v49  ;;  %v5876_v50 = vld [vmem:[%s5704_s25 + $0x62] sm:$0xff] }
  0x1f   : > { %4850 = vmatprep.mubr.msk.f32.mxu1 %vm312_vm0, %v5726_v24  ;;  %5058 = vmatprep.mubr.msk.f32.mxu0 %vm312_vm0, %v5740_v26  ;;  %6868 = vst [vmem:[#allocation7_spill] sm:$0xff] %v5887_v51  ;;  %v5890_v52 = vld [vmem:[%s5704_s25 + $0x6a] sm:$0xff]  ;;  %v5893_v53 = vld [vmem:[%s5704_s25 + $0x121] sm:$0xff]  ;;  %v5913_v57 = vld [vmem:[%s5704_s25 + $0x139] sm:$0xff] }
  0x20   : > { %6869 = vst [vmem:[#allocation8_spill] sm:$0xff] %v5893_v53  ;;  %v5896_v54 = vld [vmem:[%s5704_s25 + $0x7a] sm:$0xff]  ;;  %v5907_v55 = vld [vmem:[%s5704_s25 + $0x129] sm:$0xff]  ;;  %6871 = vst [vmem:[#allocation10_spill] sm:$0xff] %v5913_v57 }
  0x21   : > { %6870 = vst [vmem:[#allocation9_spill] sm:$0xff] %v5907_v55  ;;  %v5910_v56 = vld [vmem:[%s5704_s25 + $0x82] sm:$0xff]  ;;  %v5916_v58 = vld [vmem:[%s5704_s25 + $0x92] sm:$0xff]  ;;  %v5930_v60 = vld [vmem:[%s5704_s25 + $0x9a] sm:$0xff] }
  0x22   : > { %4851 = vmatmul.mubr.msk.f32.gmra.mrb[6].mxu1 %vm312_vm0, %v5737_v25  ;;  %5059 = vmatmul.mubr.msk.f32.gmra.mrb[6].mxu0 %vm312_vm0, %v5751_v27  ;;  %v5927_v59 = vld [vmem:[%s5704_s25 + $0x141] sm:$0xff]  ;;  %v5933_v61 = vld [vmem:[%s5704_s25 + $0x151] sm:$0xff]  ;;  %v5947_v63 = vld [vmem:[%s5704_s25 + $0x159] sm:$0xff] }
  0x23   : > { %4853 = vmatprep.mubr.msk.f32.mxu1 %vm312_vm0, %v5740_v26  ;;  %5061 = vmatprep.mubr.msk.f32.mxu0 %vm312_vm0, %v5754_v28  ;;  %6872 = vst [vmem:[#allocation11_spill] sm:$0xff] %v5927_v59  ;;  %6873 = vst [vmem:[#allocation12_spill] sm:$0xff] %v5933_v61  ;;  %v5936_v62 = vld [vmem:[%s5704_s25 + $0xaa] sm:$0xff]  ;;  %v5950_v0 = vld [vmem:[%s5704_s25 + $0xb2] sm:$0xff] }
  0x24   : > { %6874 = vst [vmem:[#allocation13_spill] sm:$0xff] %v5947_v63  ;;  %v5953_v1 = vld [vmem:[%s5704_s25 + $0x169] sm:$0xff]  ;;  %v5967_v3 = vld [vmem:[%s5704_s25 + $0x171] sm:$0xff]  ;;  %v243_v5 = vld [vmem:[%s5704_s25] sm:$0xff] }
  0x25   : > { %6875 = vst [vmem:[#allocation14_spill] sm:$0xff] %v5953_v1  ;;  %v5956_v2 = vld [vmem:[%s5704_s25 + $0xc2] sm:$0xff]  ;;  %6876 = vst [vmem:[#allocation15_spill] sm:$0xff] %v5967_v3  ;;  %v5970_v4 = vld [vmem:[%s5704_s25 + $0xca] sm:$0xff] }
  0x26   : > { %4854 = vmatmul.mubr.msk.f32.gmra.mrb[8].mxu1 %vm312_vm0, %v5751_v27  ;;  %5062 = vmatmul.mubr.msk.f32.gmra.mrb[8].mxu0 %vm312_vm0, %v5765_v29  ;;  %v5974_v6 = vld [vmem:[%s5704_s25 + $0xda] sm:$0xff]  ;;  %v4164_v8 = vld [vmem:[%s6811_s1 + $0x30] sm:$0xff]  ;;  %v244_v10 = vld [vmem:[%s5704_s25 + $0x8] sm:$0xff] }
  0x27   : > { %4856 = vmatprep.mubr.msk.f32.mxu1 %vm312_vm0, %v5754_v28  ;;  %5064 = vmatprep.mubr.msk.f32.mxu0 %vm312_vm0, %v5768_v30  ;;  %v5991_v11 = vld [vmem:[%s5704_s25 + $0xe2] sm:$0xff]  ;;  %v5994_v12 = vld [vmem:[%s5704_s25 + $0x18] sm:$0xff]  ;;  %v5996_v13 = vpack.c.bf16 %v4165_v9, %v4164_v8  ;;  %v6016_v17 = vld [vmem:[%s5704_s25 + $0x30] sm:$0xff] }
  0x28   : > { %6877 = vst [vmem:[#allocation16_spill] sm:$0xff] %v5994_v12  ;;  %v5999_v14 = vld [vmem:[%s5704_s25 + $0xf2] sm:$0xff]  ;;  %v6008_v15 = vld [vmem:[%s5704_s25 + $0x20] sm:$0xff]  ;;  %v6019_v18 = vld [vmem:[%s5704_s25 + $0x10a] sm:$0xff] }
  0x29   : > { %6878 = vst [vmem:[#allocation17_spill] sm:$0xff] %v6008_v15  ;;  %v6011_v16 = vld [vmem:[%s5704_s25 + $0xfa] sm:$0xff]  ;;  %v6040_v37 = vld [vmem:[%s5704_s25 + $0x122] sm:$0xff]  ;;  %v6051_v38 = vld [vmem:[%s5704_s25 + $0x50] sm:$0xff] }
  0x2a   : > { %4857 = vmatmul.mubr.msk.f32.gmra.mrb[10].mxu1 %vm312_vm0, %v5765_v29  ;;  %5065 = vmatmul.mubr.msk.f32.gmra.mrb[10].mxu0 %vm312_vm0, %v5779_v31  ;;  %v6031_v19 = vld [vmem:[%s5704_s25 + $0x38] sm:$0xff]  ;;  %6880 = vst [vmem:[#allocation19_spill] sm:$0xff] %v6051_v38  ;;  %v6057_v8 = vld [vmem:[%s5704_s25 + $0x60] sm:$0xff] }
  0x2b   : > { %4859 = vmatprep.mubr.msk.f32.mxu1 %vm312_vm0, %v5768_v30  ;;  %5067 = vmatprep.mubr.msk.f32.mxu0 %vm312_vm0, %v5782_v32  ;;  %6881 = vst [vmem:[#allocation20_spill] sm:$0xff] %v6057_v8  ;;  %v6060_v9 = vld [vmem:[%s5704_s25 + $0x13a] sm:$0xff] }
  0x2e   : > { %4860 = vmatmul.mubr.msk.f32.gmra.mrb[12].mxu1 %vm312_vm0, %v5779_v31  ;;  %5068 = vmatmul.mubr.msk.f32.gmra.mrb[12].mxu0 %vm312_vm0, %v5793_v33 }
  0x2f   : > { %4862 = vmatprep.mubr.msk.f32.mxu1 %vm312_vm0, %v5782_v32  ;;  %5070 = vmatprep.mubr.msk.f32.mxu0 %vm312_vm0, %v5796_v34 }
  0x32   : > { %4863 = vmatmul.mubr.msk.f32.gmra.mrb[14].mxu1 %vm312_vm0, %v5793_v33  ;;  %5071 = vmatmul.mubr.msk.f32.gmra.mrb[14].mxu0 %vm312_vm0, %v5807_v35 }
  0x33   : > { %4865 = vmatprep.mubr.msk.f32.mxu1 %vm312_vm0, %v5796_v34  ;;  %5101 = vmatprep.mubr.msk.f32.mxu0 %vm312_vm0, %v5810_v36 }
  0x36   : > { %4866 = vmatmul.mubr.msk.f32.gmra.mrb[16].mxu1 %vm312_vm0, %v5807_v35  ;;  %5102 = vmatmul.mubr.msk.f32.vlgmr.msra.gmra.mrb[0].mxu0 %vm312_vm0, %v5827_v39 }
  0x37   : > { %5332 = vmatpush3.bf16.msra.mxu0 %v5329_v21  ;;  %4868 = vmatprep.mubr.msk.f32.mxu1 %vm312_vm0, %v5830_v40  ;;  %v6034_v21 = vld [vmem:[%s5704_s25 + $0x112] sm:$0xff] }
  0x38   : > { %5104 = vmatprep.mubr.msk.f32.mxu0 %vm312_vm0, %v5835_v42  ;;  %5334 = vmatprep.subr.bf16.mxu0 %v5832_v41  ;;  %v6157_v40 = vld [vmem:[%s5704_s25 + $0xd8] sm:$0xff] }
  0x3a   : > { %4869 = vmatmul.mubr.msk.f32.gmra.mrb[18].mxu1 %vm312_vm0, %v5844_v43  ;;  %5105 = vmatmul.mubr.msk.f32.gmra.mrb[2].mxu0 %vm312_vm0, %v5847_v44  ;;  %v4494_v43 = vld [vmem:[%s6811_s1 + $0x80] sm:$0xff] }
  0x3b   : > { %4871 = vmatprep.mubr.msk.f32.mxu1 %vm312_vm0, %v5852_v45  ;;  %5107 = vmatprep.mubr.msk.f32.mxu0 %vm312_vm0, %v5855_v46  ;;  %v6134_v45 = vld [vmem:[%s5704_s25 + $0x18a] sm:$0xff] }
  0x3c   : > { %6892 = vst [vmem:[#allocation31_spill] sm:$0xff] %v6134_v45 }
  0x3e   : > { %4872 = vmatmul.mubr.msk.f32.gmra.mrb[20].mxu1 %vm312_vm0, %v5867_v47  ;;  %5108 = vmatmul.mubr.msk.f32.gmra.mrb[4].mxu0 %vm312_vm0, %v5870_v48  ;;  %v6120_v47 = vld [vmem:[%s5704_s25 + $0x182] sm:$0xff] }
  0x3f   : > { %4874 = vmatprep.mubr.msk.f32.mxu1 %vm312_vm0, %v5873_v49  ;;  %5110 = vmatprep.mubr.msk.f32.mxu0 %vm312_vm0, %v5876_v50  ;;  %v6117_v49 = vld [vmem:[%s5704_s25 + $0xa8] sm:$0xff]  ;;  %6890 = vst [vmem:[#allocation29_spill] sm:$0xff] %v6120_v47 }
  0x40   : > { %6889 = vst [vmem:[#allocation28_spill] sm:$0xff] %v6117_v49 }
  0x42   : > { %4875 = vmatmul.mubr.msk.f32.gmra.mrb[22].mxu1 %vm312_vm0, %v5887_v51  ;;  %5111 = vmatmul.mubr.msk.f32.gmra.mrb[6].mxu0 %vm312_vm0, %v5890_v52  ;;  %v6114_v51 = vld [vmem:[%s5704_s25 + $0x172] sm:$0xff] }
  0x43   : > { %4877 = vmatprep.mubr.msk.f32.mxu1 %vm312_vm0, %v5893_v53  ;;  %5113 = vmatprep.mubr.msk.f32.mxu0 %vm312_vm0, %v5896_v54  ;;  %v6111_v53 = vld [vmem:[%s5704_s25 + $0x98] sm:$0xff]  ;;  %6888 = vst [vmem:[#allocation27_spill] sm:$0xff] %v6114_v51 }
  0x44   : > { %6887 = vst [vmem:[#allocation26_spill] sm:$0xff] %v6111_v53 }
  0x46   : > { %4878 = vmatmul.mubr.msk.f32.gmra.mrb[24].mxu1 %vm312_vm0, %v5907_v55  ;;  %5114 = vmatmul.mubr.msk.f32.gmra.mrb[8].mxu0 %vm312_vm0, %v5910_v56  ;;  %v6100_v55 = vld [vmem:[%s5704_s25 + $0x16a] sm:$0xff] }
  0x47   : > { %4880 = vmatprep.mubr.msk.f32.mxu1 %vm312_vm0, %v5913_v57  ;;  %5116 = vmatprep.mubr.msk.f32.mxu0 %vm312_vm0, %v5916_v58  ;;  %v6097_v57 = vld [vmem:[%s5704_s25 + $0x90] sm:$0xff]  ;;  %6886 = vst [vmem:[#allocation25_spill] sm:$0xff] %v6100_v55 }
  0x48   : > { %6885 = vst [vmem:[#allocation24_spill] sm:$0xff] %v6097_v57 }
  0x4a   : > { %4881 = vmatmul.mubr.msk.f32.gmra.mrb[26].mxu1 %vm312_vm0, %v5927_v59  ;;  %5117 = vmatmul.mubr.msk.f32.gmra.mrb[10].mxu0 %vm312_vm0, %v5930_v60  ;;  %v6094_v59 = vld [vmem:[%s5704_s25 + $0x15a] sm:$0xff] }
  0x4b   : > { %4883 = vmatprep.mubr.msk.f32.mxu1 %vm312_vm0, %v5933_v61  ;;  %5119 = vmatprep.mubr.msk.f32.mxu0 %vm312_vm0, %v5936_v62  ;;  %v6091_v61 = vld [vmem:[%s5704_s25 + $0x80] sm:$0xff] }
  0x4c   : > { %6884 = vst [vmem:[#allocation23_spill] sm:$0xff] %v6091_v61 }
  0x4e   : > { %4884 = vmatmul.mubr.msk.f32.gmra.mrb[28].mxu1 %vm312_vm0, %v5947_v63  ;;  %5120 = vmatmul.mubr.msk.f32.gmra.mrb[12].mxu0 %vm312_vm0, %v5950_v0  ;;  %v6080_v63 = vld [vmem:[%s5704_s25 + $0x152] sm:$0xff] }
  0x4f   : > { %4886 = vmatprep.mubr.msk.f32.mxu1 %vm312_vm0, %v5953_v1  ;;  %5122 = vmatprep.mubr.msk.f32.mxu0 %vm312_vm0, %v5956_v2  ;;  %v6077_v1 = vld [vmem:[%s5704_s25 + $0x78] sm:$0xff] }
  0x50   : > { %6883 = vst [vmem:[#allocation22_spill] sm:$0xff] %v6077_v1 }
  0x52   : > { %4887 = vmatmul.mubr.msk.f32.gmra.mrb[30].mxu1 %vm312_vm0, %v5967_v3  ;;  %5123 = vmatmul.mubr.msk.f32.gmra.mrb[14].mxu0 %vm312_vm0, %v5970_v4  ;;  %v6074_v3 = vld [vmem:[%s5704_s25 + $0x142] sm:$0xff] }
  0x53   : > { %4893 = vmatprep.mubr.msk.f32.mxu1 %vm312_vm0, %v243_v5  ;;  %5125 = vmatprep.mubr.msk.f32.mxu0 %vm312_vm0, %v5974_v6  ;;  %v6054_v5 = vld [vmem:[%s5704_s25 + $0x12a] sm:$0xff] }
  0x56   : > { %4894 = vmatmul.mubr.msk.f32.vlgmr.msra.gmra.mrb[0].mxu1 %vm312_vm0, %v244_v10  ;;  %5126 = vmatmul.mubr.msk.f32.gmra.mrb[16].mxu0 %vm312_vm0, %v5991_v11  ;;  %v6071_v10 = vld [vmem:[%s5704_s25 + $0x68] sm:$0xff] }
  0x57   : > { %5316 = vmatpush3.bf16.msra.mxu1 %v5715_v22  ;;  %4896 = vmatprep.mubr.msk.f32.mxu1 %vm312_vm0, %v5994_v12  ;;  %v6037_v22 = vld [vmem:[%s5704_s25 + $0x48] sm:$0xff]  ;;  %6882 = vst [vmem:[#allocation21_spill] sm:$0xff] %v6071_v10  ;;  %v6137_v12 = vld [vmem:[%s5704_s25 + $0xc0] sm:$0xff] }
  0x58   : > { %5128 = vmatprep.mubr.msk.f32.mxu0 %vm312_vm0, %v5999_v14  ;;  %5318 = vmatprep.subr.bf16.mxu1 %v5996_v13  ;;  %6879 = vst [vmem:[#allocation18_spill] sm:$0xff] %v6037_v22 }
  0x5a   : > { %4897 = vmatmul.mubr.msk.f32.gmra.mrb[2].mxu1 %vm312_vm0, %v6008_v15  ;;  %5129 = vmatmul.mubr.msk.f32.gmra.mrb[18].mxu0 %vm312_vm0, %v6011_v16  ;;  %v6131_v15 = vld [vmem:[%s5704_s25 + $0xb0] sm:$0xff] }
  0x5b   : > { %4899 = vmatprep.mubr.msk.f32.mxu1 %vm312_vm0, %v6016_v17  ;;  %5131 = vmatprep.mubr.msk.f32.mxu0 %vm312_vm0, %v6019_v18  ;;  %6891 = vst [vmem:[#allocation30_spill] sm:$0xff] %v6131_v15 }
  0x5e   : > { %4900 = vmatmul.mubr.msk.f32.gmra.mrb[4].mxu1 %vm312_vm0, %v6031_v19  ;;  %5132 = vmatmul.mubr.msk.f32.gmra.mrb[20].mxu0 %vm312_vm0, %v6034_v21 }
  0x5f   : > { %4902 = vmatprep.mubr.msk.f32.mxu1 %vm312_vm0, %v6037_v22  ;;  %5134 = vmatprep.mubr.msk.f32.mxu0 %vm312_vm0, %v6040_v37 }
  0x62   : > { %4903 = vmatmul.mubr.msk.f32.gmra.mrb[6].mxu1 %vm312_vm0, %v6051_v38  ;;  %5135 = vmatmul.mubr.msk.f32.gmra.mrb[22].mxu0 %vm312_vm0, %v6054_v5 }
  0x63   : > { %4905 = vmatprep.mubr.msk.f32.mxu1 %vm312_vm0, %v6057_v8  ;;  %5137 = vmatprep.mubr.msk.f32.mxu0 %vm312_vm0, %v6060_v9 }
  0x66   : > { %4906 = vmatmul.mubr.msk.f32.gmra.mrb[8].mxu1 %vm312_vm0, %v6071_v10  ;;  %5138 = vmatmul.mubr.msk.f32.gmra.mrb[24].mxu0 %vm312_vm0, %v6074_v3 }
  0x67   : > { %4908 = vmatprep.mubr.msk.f32.mxu1 %vm312_vm0, %v6077_v1  ;;  %5140 = vmatprep.mubr.msk.f32.mxu0 %vm312_vm0, %v6080_v63 }
  0x6a   : > { %4909 = vmatmul.mubr.msk.f32.gmra.mrb[10].mxu1 %vm312_vm0, %v6091_v61  ;;  %5141 = vmatmul.mubr.msk.f32.gmra.mrb[26].mxu0 %vm312_vm0, %v6094_v59 }
  0x6b   : > { %4911 = vmatprep.mubr.msk.f32.mxu1 %vm312_vm0, %v6097_v57  ;;  %5143 = vmatprep.mubr.msk.f32.mxu0 %vm312_vm0, %v6100_v55 }
  0x6e   : > { %4912 = vmatmul.mubr.msk.f32.gmra.mrb[12].mxu1 %vm312_vm0, %v6111_v53  ;;  %5144 = vmatmul.mubr.msk.f32.gmra.mrb[28].mxu0 %vm312_vm0, %v6114_v51  ;;  %v4495_v51 = vld [vmem:[%s6811_s1 + $0x88] sm:$0xff] }
  0x6f   : > { %4914 = vmatprep.mubr.msk.f32.mxu1 %vm312_vm0, %v6117_v49  ;;  %5146 = vmatprep.mubr.msk.f32.mxu0 %vm312_vm0, %v6120_v47  ;;  %v6154_v47 = vld [vmem:[%s5704_s25 + $0xc8] sm:$0xff]  ;;  %v6159_v55 = vpack.c.bf16 %v4495_v51, %v4494_v43  ;;  %v6174_v43 = vld [vmem:[%s5704_s25 + $0xf0] sm:$0xff] }
  0x70   : > { %6893 = vst [vmem:[#allocation32_spill] sm:$0xff] %v6154_v47  ;;  %v6189_v51 = vld [vmem:[%s5704_s25 + $0x108] sm:$0xff] }
  0x72   : > { %4915 = vmatmul.mubr.msk.f32.gmra.mrb[14].mxu1 %vm312_vm0, %v6131_v15  ;;  %5147 = vmatmul.mubr.msk.f32.gmra.mrb[30].mxu0 %vm312_vm0, %v6134_v45  ;;  %v6169_v45 = vld [vmem:[%s5704_s25 + $0xe0] sm:$0xff] }
  0x73   : > { %4917 = vmatprep.mubr.msk.f32.mxu1 %vm312_vm0, %v6137_v12  ;;  %5153 = vmatprep.mubr.msk.f32.mxu0 %vm312_vm0, %v6016_v17 }
  0x76   : > { %4918 = vmatmul.mubr.msk.f32.gmra.mrb[16].mxu1 %vm312_vm0, %v6154_v47  ;;  %5154 = vmatmul.mubr.msk.f32.vlgmr.msra.gmra.mrb[0].mxu0 %vm312_vm0, %v6031_v19 }
  0x77   : > { %5336 = vmatpush3.bf16.msra.mxu0 %v5832_v41  ;;  %4920 = vmatprep.mubr.msk.f32.mxu1 %vm312_vm0, %v6157_v40  ;;  %v6186_v41 = vld [vmem:[%s5704_s25 + $0xf8] sm:$0xff] }
  0x78   : > { %5156 = vmatprep.mubr.msk.f32.mxu0 %vm312_vm0, %v6037_v22  ;;  %5338 = vmatprep.subr.bf16.mxu0 %v6159_v55  ;;  %v955_v22 = vld [vmem:[%s5704_s25 + $0x2] sm:$0xff] }
  0x7a   : > { %4921 = vmatmul.mubr.msk.f32.gmra.mrb[18].mxu1 %vm312_vm0, %v6169_v45  ;;  %5157 = vmatmul.mubr.msk.f32.gmra.mrb[2].mxu0 %vm312_vm0, %v6051_v38  ;;  %v6200_v38 = vld [vmem:[%s5704_s25 + $0x110] sm:$0xff] }
  0x7b   : > { %4923 = vmatprep.mubr.msk.f32.mxu1 %vm312_vm0, %v6174_v43  ;;  %5159 = vmatprep.mubr.msk.f32.mxu0 %vm312_vm0, %v6057_v8  ;;  %v6203_v8 = vld [vmem:[%s5704_s25 + $0x120] sm:$0xff] }
  0x7e   : > { %4924 = vmatmul.mubr.msk.f32.gmra.mrb[20].mxu1 %vm312_vm0, %v6186_v41  ;;  %5160 = vmatmul.mubr.msk.f32.gmra.mrb[4].mxu0 %vm312_vm0, %v6071_v10  ;;  %v6214_v10 = vld [vmem:[%s5704_s25 + $0x128] sm:$0xff] }
  0x7f   : > { %4926 = vmatprep.mubr.msk.f32.mxu1 %vm312_vm0, %v6189_v51  ;;  %5162 = vmatprep.mubr.msk.f32.mxu0 %vm312_vm0, %v6077_v1  ;;  %v6217_v1 = vld [vmem:[%s5704_s25 + $0x138] sm:$0xff] }
  0x82   : > { %4927 = vmatmul.mubr.msk.f32.gmra.mrb[22].mxu1 %vm312_vm0, %v6200_v38  ;;  %5163 = vmatmul.mubr.msk.f32.gmra.mrb[6].mxu0 %vm312_vm0, %v6091_v61  ;;  %v6228_v61 = vld [vmem:[%s5704_s25 + $0x140] sm:$0xff] }
  0x83   : > { %4929 = vmatprep.mubr.msk.f32.mxu1 %vm312_vm0, %v6203_v8  ;;  %5165 = vmatprep.mubr.msk.f32.mxu0 %vm312_vm0, %v6097_v57  ;;  %v6231_v57 = vld [vmem:[%s5704_s25 + $0x150] sm:$0xff] }
  0x86   : > { %4930 = vmatmul.mubr.msk.f32.gmra.mrb[24].mxu1 %vm312_vm0, %v6214_v10  ;;  %5166 = vmatmul.mubr.msk.f32.gmra.mrb[8].mxu0 %vm312_vm0, %v6111_v53  ;;  %v6242_v53 = vld [vmem:[%s5704_s25 + $0x158] sm:$0xff] }
  0x87   : > { %4932 = vmatprep.mubr.msk.f32.mxu1 %vm312_vm0, %v6217_v1  ;;  %5168 = vmatprep.mubr.msk.f32.mxu0 %vm312_vm0, %v6117_v49  ;;  %v6245_v49 = vld [vmem:[%s5704_s25 + $0x168] sm:$0xff] }
  0x8a   : > { %4933 = vmatmul.mubr.msk.f32.gmra.mrb[26].mxu1 %vm312_vm0, %v6228_v61  ;;  %5169 = vmatmul.mubr.msk.f32.gmra.mrb[10].mxu0 %vm312_vm0, %v6131_v15  ;;  %v6256_v15 = vld [vmem:[%s5704_s25 + $0x170] sm:$0xff] }
  0x8b   : > { %4935 = vmatprep.mubr.msk.f32.mxu1 %vm312_vm0, %v6231_v57  ;;  %5171 = vmatprep.mubr.msk.f32.mxu0 %vm312_vm0, %v6137_v12 }
  0x8e   : > { %4936 = vmatmul.mubr.msk.f32.gmra.mrb[28].mxu1 %vm312_vm0, %v6242_v53  ;;  %5172 = vmatmul.mubr.msk.f32.gmra.mrb[12].mxu0 %vm312_vm0, %v6154_v47  ;;  %v956_v47 = vld [vmem:[%s5704_s25 + $0xa] sm:$0xff] }
  0x8f   : > { %4938 = vmatprep.mubr.msk.f32.mxu1 %vm312_vm0, %v6245_v49  ;;  %5174 = vmatprep.mubr.msk.f32.mxu0 %vm312_vm0, %v6157_v40 }
  0x92   : > { %4939 = vmatmul.mubr.msk.f32.gmra.mrb[30].mxu1 %vm312_vm0, %v6256_v15  ;;  %5175 = vmatmul.mubr.msk.f32.gmra.mrb[14].mxu0 %vm312_vm0, %v6169_v45 }
  0x93   : > { %4945 = vmatprep.mubr.msk.f32.mxu1 %vm312_vm0, %v955_v22  ;;  %5177 = vmatprep.mubr.msk.f32.mxu0 %vm312_vm0, %v6174_v43  ;;  %v6912_v22 = vld [vmem:[#allocation22_spill] sm:$0xff] }
  0x96   : > { %4946 = vmatmul.mubr.msk.f32.vlgmr.msra.gmra.mrb[0].mxu1 %vm312_vm0, %v956_v47  ;;  %5178 = vmatmul.mubr.msk.f32.gmra.mrb[16].mxu0 %vm312_vm0, %v6186_v41  ;;  %v4360_v47 = vld [vmem:[%s5704_s25 + $0x198] sm:$0xff] }
  0x97   : > { %5320 = vmatpush3.bf16.msra.mxu1 %v5996_v13  ;;  %4948 = vmatprep.mubr.msk.f32.mxu1 %vm312_vm0, %v5810_v36  ;;  %v6309_v36 = vld [vmem:[%s5704_s25 + $0x180] sm:$0xff] }
  0x98   : > { %5180 = vmatprep.mubr.msk.f32.mxu0 %vm312_vm0, %v6189_v51  ;;  %5341 = vmatprep.subr.bf16.mxu1 %v5675_v7  ;;  %v4361_v13 = vld [vmem:[%s5704_s25 + $0x1a0] sm:$0xff] }
  0x9a   : > { %4949 = vmatmul.mubr.msk.f32.gmra.mrb[2].mxu1 %vm312_vm0, %v5827_v39  ;;  %5181 = vmatmul.mubr.msk.f32.gmra.mrb[18].mxu0 %vm312_vm0, %v6200_v38  ;;  %v6320_v39 = vld [vmem:[%s5704_s25 + $0x188] sm:$0xff] }
  0x9b   : > { %4951 = vmatprep.mubr.msk.f32.mxu1 %vm312_vm0, %v5835_v42  ;;  %5183 = vmatprep.mubr.msk.f32.mxu0 %vm312_vm0, %v6203_v8 }
  0x9e   : > { %4952 = vmatmul.mubr.msk.f32.gmra.mrb[4].mxu1 %vm312_vm0, %v5847_v44  ;;  %5184 = vmatmul.mubr.msk.f32.gmra.mrb[20].mxu0 %vm312_vm0, %v6214_v10 }
  0x9f   : > { %4954 = vmatprep.mubr.msk.f32.mxu1 %vm312_vm0, %v5855_v46  ;;  %5186 = vmatprep.mubr.msk.f32.mxu0 %vm312_vm0, %v6217_v1 }
  0xa2   : > { %4955 = vmatmul.mubr.msk.f32.gmra.mrb[6].mxu1 %vm312_vm0, %v5870_v48  ;;  %5187 = vmatmul.mubr.msk.f32.gmra.mrb[22].mxu0 %vm312_vm0, %v6228_v61 }
  0xa3   : > { %4957 = vmatprep.mubr.msk.f32.mxu1 %vm312_vm0, %v5876_v50  ;;  %5189 = vmatprep.mubr.msk.f32.mxu0 %vm312_vm0, %v6231_v57 }
  0xa6   : > { %4958 = vmatmul.mubr.msk.f32.gmra.mrb[8].mxu1 %vm312_vm0, %v5890_v52  ;;  %5190 = vmatmul.mubr.msk.f32.gmra.mrb[24].mxu0 %vm312_vm0, %v6242_v53 }
  0xa7   : > { %4960 = vmatprep.mubr.msk.f32.mxu1 %vm312_vm0, %v5896_v54  ;;  %5192 = vmatprep.mubr.msk.f32.mxu0 %vm312_vm0, %v6245_v49 }
  0xaa   : > { %4961 = vmatmul.mubr.msk.f32.gmra.mrb[10].mxu1 %vm312_vm0, %v5910_v56  ;;  %5193 = vmatmul.mubr.msk.f32.gmra.mrb[26].mxu0 %vm312_vm0, %v6256_v15 }
  0xab   : > { %4963 = vmatprep.mubr.msk.f32.mxu1 %vm312_vm0, %v5916_v58  ;;  %5195 = vmatprep.mubr.msk.f32.mxu0 %vm312_vm0, %v6309_v36 }
  0xae   : > { %4964 = vmatmul.mubr.msk.f32.gmra.mrb[12].mxu1 %vm312_vm0, %v5930_v60  ;;  %5196 = vmatmul.mubr.msk.f32.gmra.mrb[28].mxu0 %vm312_vm0, %v6320_v39 }
  0xaf   : > { %4966 = vmatprep.mubr.msk.f32.mxu1 %vm312_vm0, %v5936_v62  ;;  %5198 = vmatprep.mubr.msk.f32.mxu0 %vm312_vm0, %v4360_v47  ;;  %v6913_v47 = vld [vmem:[#allocation12_spill] sm:$0xff] }
  0xb2   : > { %4967 = vmatmul.mubr.msk.f32.gmra.mrb[14].mxu1 %vm312_vm0, %v5950_v0  ;;  %5199 = vmatmul.mubr.msk.f32.gmra.mrb[30].mxu0 %vm312_vm0, %v4361_v13  ;;  %v6914_v13 = vld [vmem:[#allocation23_spill] sm:$0xff] }
  0xb3   : > { %4969 = vmatprep.mubr.msk.f32.mxu1 %vm312_vm0, %v5956_v2  ;;  %5205 = vmatprep.mubr.msk.f32.mxu0 %vm312_vm0, %v5713_v20  ;;  %v6894_v20 = vld [vmem:[#allocation25_spill] sm:$0xff] }
  0xb6   : > { %4970 = vmatmul.mubr.msk.f32.gmra.mrb[16].mxu1 %vm312_vm0, %v5970_v4  ;;  %5206 = vmatmul.mubr.msk.f32.vlgmr.msra.gmra.mrb[0].mxu0 %vm312_vm0, %v5720_v23  ;;  %v6895_v23 = vld [vmem:[#allocation2_spill] sm:$0xff] }
  0xb7   : > { %5340 = vmatpush3.bf16.msra.mxu0 %v6159_v55  ;;  %4972 = vmatprep.mubr.msk.f32.mxu1 %vm312_vm0, %v5974_v6  ;;  %v6909_v55 = vld [vmem:[#allocation10_spill] sm:$0xff] }
  0xb8   : > { %5208 = vmatprep.mubr.msk.f32.mxu0 %vm312_vm0, %v5726_v24  ;;  %v6896_v24 = vld [vmem:[#allocation27_spill] sm:$0xff] }
  0xba   : > { %4973 = vmatmul.mubr.msk.f32.gmra.mrb[18].mxu1 %vm312_vm0, %v5991_v11  ;;  %5209 = vmatmul.mubr.msk.f32.gmra.mrb[2].mxu0 %vm312_vm0, %v5737_v25  ;;  %v6897_v25 = vld [vmem:[#allocation3_spill] sm:$0xff] }
  0xbb   : > { %4975 = vmatprep.mubr.msk.f32.mxu1 %vm312_vm0, %v5999_v14  ;;  %5211 = vmatprep.mubr.msk.f32.mxu0 %vm312_vm0, %v5740_v26  ;;  %v6898_v26 = vld [vmem:[#allocation16_spill] sm:$0xff] }
  0xbe   : > { %4976 = vmatmul.mubr.msk.f32.gmra.mrb[20].mxu1 %vm312_vm0, %v6011_v16  ;;  %5212 = vmatmul.mubr.msk.f32.gmra.mrb[4].mxu0 %vm312_vm0, %v5751_v27  ;;  %v6899_v27 = vld [vmem:[#allocation4_spill] sm:$0xff] }
  0xbf   : > { %4978 = vmatprep.mubr.msk.f32.mxu1 %vm312_vm0, %v6019_v18  ;;  %5214 = vmatprep.mubr.msk.f32.mxu0 %vm312_vm0, %v5754_v28  ;;  %v6900_v28 = vld [vmem:[#allocation17_spill] sm:$0xff] }
  0xc2   : > { %4979 = vmatmul.mubr.msk.f32.gmra.mrb[22].mxu1 %vm312_vm0, %v6034_v21  ;;  %5215 = vmatmul.mubr.msk.f32.gmra.mrb[6].mxu0 %vm312_vm0, %v5765_v29  ;;  %v6901_v29 = vld [vmem:[#allocation5_spill] sm:$0xff] }
  0xc3   : > { %4981 = vmatprep.mubr.msk.f32.mxu1 %vm312_vm0, %v6040_v37  ;;  %5217 = vmatprep.mubr.msk.f32.mxu0 %vm312_vm0, %v5768_v30  ;;  %v6902_v30 = vld [vmem:[#allocation6_spill] sm:$0xff] }
  0xc6   : > { %4982 = vmatmul.mubr.msk.f32.gmra.mrb[24].mxu1 %vm312_vm0, %v6054_v5  ;;  %5218 = vmatmul.mubr.msk.f32.gmra.mrb[8].mxu0 %vm312_vm0, %v5779_v31  ;;  %v6903_v31 = vld [vmem:[#allocation7_spill] sm:$0xff] }
  0xc7   : > { %4984 = vmatprep.mubr.msk.f32.mxu1 %vm312_vm0, %v6060_v9  ;;  %5220 = vmatprep.mubr.msk.f32.mxu0 %vm312_vm0, %v5782_v32  ;;  %v6904_v32 = vld [vmem:[#allocation18_spill] sm:$0xff] }
  0xca   : > { %4985 = vmatmul.mubr.msk.f32.gmra.mrb[26].mxu1 %vm312_vm0, %v6074_v3  ;;  %5221 = vmatmul.mubr.msk.f32.gmra.mrb[10].mxu0 %vm312_vm0, %v5793_v33  ;;  %v6905_v33 = vld [vmem:[#allocation8_spill] sm:$0xff] }
  0xcb   : > { %4987 = vmatprep.mubr.msk.f32.mxu1 %vm312_vm0, %v6080_v63  ;;  %5223 = vmatprep.mubr.msk.f32.mxu0 %vm312_vm0, %v5796_v34  ;;  %v6907_v34 = vld [vmem:[#allocation9_spill] sm:$0xff] }
  0xce   : > { %4988 = vmatmul.mubr.msk.f32.gmra.mrb[28].mxu1 %vm312_vm0, %v6094_v59  ;;  %5224 = vmatmul.mubr.msk.f32.gmra.mrb[12].mxu0 %vm312_vm0, %v5807_v35  ;;  %v6908_v35 = vld [vmem:[#allocation20_spill] sm:$0xff] }
  0xcf   : > { %4990 = vmatprep.mubr.msk.f32.mxu1 %vm312_vm0, %v6894_v20  ;;  %5226 = vmatprep.mubr.msk.f32.mxu0 %vm312_vm0, %v6895_v23 }
  0xd2   : > { %4991 = vmatmul.mubr.msk.f32.gmra.mrb[30].mxu1 %vm312_vm0, %v6896_v24  ;;  %5227 = vmatmul.mubr.msk.f32.gmra.mrb[14].mxu0 %vm312_vm0, %v6897_v25  ;;  %v6921_v24 = vld [vmem:[#allocation30_spill] sm:$0xff] }
  0xd3   : > { %4997 = vmatprep.mubr.msk.f32.mxu1 %vm312_vm0, %v6898_v26  ;;  %5229 = vmatprep.mubr.msk.f32.mxu0 %vm312_vm0, %v6899_v27  ;;  %v6915_v26 = vld [vmem:[#allocation13_spill] sm:$0xff] }
  0xd6   : > { %4998 = vmatmul.mubr.msk.f32.vlgmr.msra.gmra.mrb[0].mxu1 %vm312_vm0, %v6900_v28  ;;  %5230 = vmatmul.mubr.msk.f32.gmra.mrb[16].mxu0 %vm312_vm0, %v6901_v29  ;;  %v6916_v28 = vld [vmem:[#allocation24_spill] sm:$0xff] }
  0xd7   : > { %5342 = vmatpush3.bf16.msra.mxu1 %v5675_v7  ;;  %5000 = vmatprep.mubr.msk.f32.mxu1 %vm312_vm0, %v6016_v17  ;;  %v6906_v7 = vld [vmem:[#allocation19_spill] sm:$0xff]  ;;  %v6910_v17 = vld [vmem:[#allocation21_spill] sm:$0xff] }
  0xd8   : > { %5232 = vmatprep.mubr.msk.f32.mxu0 %vm312_vm0, %v6902_v30 }
  0xda   : > { %5001 = vmatmul.mubr.msk.f32.gmra.mrb[2].mxu1 %vm312_vm0, %v6031_v19  ;;  %5233 = vmatmul.mubr.msk.f32.gmra.mrb[18].mxu0 %vm312_vm0, %v6903_v31  ;;  %v6911_v19 = vld [vmem:[#allocation11_spill] sm:$0xff] }
  0xdb   : > { %5003 = vmatprep.mubr.msk.f32.mxu1 %vm312_vm0, %v6904_v32  ;;  %5235 = vmatprep.mubr.msk.f32.mxu0 %vm312_vm0, %v6905_v33  ;;  %v6917_v32 = vld [vmem:[#allocation14_spill] sm:$0xff] }
  0xde   : > { %5004 = vmatmul.mubr.msk.f32.gmra.mrb[4].mxu1 %vm312_vm0, %v6906_v7  ;;  %5236 = vmatmul.mubr.msk.f32.gmra.mrb[20].mxu0 %vm312_vm0, %v6907_v34  ;;  %v6445_v7 = vld [vmem:[%s5704_s25 + $0x181] sm:$0xff] }
  0xdf   : > { %5006 = vmatprep.mubr.msk.f32.mxu1 %vm312_vm0, %v6908_v35  ;;  %5238 = vmatprep.mubr.msk.f32.mxu0 %vm312_vm0, %v6909_v55  ;;  %v6918_v35 = vld [vmem:[#allocation26_spill] sm:$0xff] }
  0xe2   : > { %5007 = vmatmul.mubr.msk.f32.gmra.mrb[6].mxu1 %vm312_vm0, %v6910_v17  ;;  %5239 = vmatmul.mubr.msk.f32.gmra.mrb[22].mxu0 %vm312_vm0, %v6911_v19  ;;  %v6919_v17 = vld [vmem:[#allocation15_spill] sm:$0xff] }
  0xe3   : > { %5009 = vmatprep.mubr.msk.f32.mxu1 %vm312_vm0, %v6912_v22  ;;  %5241 = vmatprep.mubr.msk.f32.mxu0 %vm312_vm0, %v6913_v47  ;;  %v6920_v22 = vld [vmem:[#allocation28_spill] sm:$0xff] }
  0xe6   : > { %5010 = vmatmul.mubr.msk.f32.gmra.mrb[8].mxu1 %vm312_vm0, %v6914_v13  ;;  %5242 = vmatmul.mubr.msk.f32.gmra.mrb[24].mxu0 %vm312_vm0, %v6915_v26  ;;  %v6456_v13 = vld [vmem:[%s5704_s25 + $0x189] sm:$0xff] }
  0xe7   : > { %5012 = vmatprep.mubr.msk.f32.mxu1 %vm312_vm0, %v6916_v28  ;;  %5244 = vmatprep.mubr.msk.f32.mxu0 %vm312_vm0, %v6917_v32  ;;  %v4426_v28 = vld [vmem:[%s5704_s25 + $0x199] sm:$0xff] }
  0xea   : > { %5013 = vmatmul.mubr.msk.f32.gmra.mrb[10].mxu1 %vm312_vm0, %v6918_v35  ;;  %5245 = vmatmul.mubr.msk.f32.gmra.mrb[26].mxu0 %vm312_vm0, %v6919_v17  ;;  %v4427_v35 = vld [vmem:[%s5704_s25 + $0x1a1] sm:$0xff]  ;;  %v6922_v17 = vld [vmem:[#allocation32_spill] sm:$0xff] }
  0xeb   : > { %5015 = vmatprep.mubr.msk.f32.mxu1 %vm312_vm0, %v6920_v22  ;;  %5247 = vmatprep.mubr.msk.f32.mxu0 %vm312_vm0, %v6445_v7 }
  0xee   : > { %5016 = vmatmul.mubr.msk.f32.gmra.mrb[12].mxu1 %vm312_vm0, %v6921_v24  ;;  %5248 = vmatmul.mubr.msk.f32.gmra.mrb[28].mxu0 %vm312_vm0, %v6456_v13 }
  0xef   : > { %5018 = vmatprep.mubr.msk.f32.mxu1 %vm312_vm0, %v6137_v12  ;;  %5250 = vmatprep.mubr.msk.f32.mxu0 %vm312_vm0, %v4426_v28 }
  0xf2   : > { %5019 = vmatmul.mubr.msk.f32.gmra.mrb[14].mxu1 %vm312_vm0, %v6922_v17  ;;  %5251 = vmatmul.mubr.msk.f32.gmra.mrb[30].mxu0 %vm312_vm0, %v4427_v35 }
  0xf3   : > { %5021 = vmatprep.mubr.msk.f32.mxu1 %vm312_vm0, %v6157_v40  ;;  %5257 = vmatprep.mubr.msk.f32.mxu0 %vm312_vm0, %v5835_v42  ;;  %v6923_v40 = vld [vmem:[#allocation27_spill] sm:$0xff]  ;;  %v6924_v42 = vld [vmem:[#allocation29_spill] sm:$0xff] }
  0xf6   : > { %5022 = vmatmul.mubr.msk.f32.gmra.mrb[16].mxu1 %vm312_vm0, %v6169_v45  ;;  %5258 = vmatmul.mubr.msk.f32.vlgmr.msra.gmra.mrb[0].mxu0 %vm312_vm0, %v5847_v44  ;;  %v4492_v44 = vld [vmem:[%s5704_s25 + $0x19a] sm:$0xff]  ;;  %v6925_v45 = vld [vmem:[#allocation15_spill] sm:$0xff] }
  0xf7   : > { %5024 = vmatprep.mubr.msk.f32.mxu1 %vm312_vm0, %v6174_v43  ;;  %5260 = vmatprep.mubr.msk.f32.mxu0 %vm312_vm0, %v5855_v46  ;;  %v6926_v46 = vld [vmem:[#allocation31_spill] sm:$0xff] }
  0xfa   : > { %5025 = vmatmul.mubr.msk.f32.gmra.mrb[18].mxu1 %vm312_vm0, %v6186_v41  ;;  %5261 = vmatmul.mubr.msk.f32.gmra.mrb[2].mxu0 %vm312_vm0, %v5870_v48  ;;  %v4493_v48 = vld [vmem:[%s5704_s25 + $0x1a2] sm:$0xff] }
  0xfb   : > { %5027 = vmatprep.mubr.msk.f32.mxu1 %vm312_vm0, %v6189_v51  ;;  %5263 = vmatprep.mubr.msk.f32.mxu0 %vm312_vm0, %v5876_v50 }
  0xfe   : > { %5028 = vmatmul.mubr.msk.f32.gmra.mrb[20].mxu1 %vm312_vm0, %v6200_v38  ;;  %5264 = vmatmul.mubr.msk.f32.gmra.mrb[4].mxu0 %vm312_vm0, %v5890_v52 }
  0xff   : > { %5030 = vmatprep.mubr.msk.f32.mxu1 %vm312_vm0, %v6203_v8  ;;  %5266 = vmatprep.mubr.msk.f32.mxu0 %vm312_vm0, %v5896_v54 }
 0x102   : > { %5031 = vmatmul.mubr.msk.f32.gmra.mrb[22].mxu1 %vm312_vm0, %v6214_v10  ;;  %5267 = vmatmul.mubr.msk.f32.gmra.mrb[6].mxu0 %vm312_vm0, %v5910_v56 }
 0x103   : > { %5033 = vmatprep.mubr.msk.f32.mxu1 %vm312_vm0, %v6217_v1  ;;  %5269 = vmatprep.mubr.msk.f32.mxu0 %vm312_vm0, %v5916_v58 }
 0x106   : > { %5034 = vmatmul.mubr.msk.f32.gmra.mrb[24].mxu1 %vm312_vm0, %v6228_v61  ;;  %5270 = vmatmul.mubr.msk.f32.gmra.mrb[8].mxu0 %vm312_vm0, %v5930_v60 }
 0x107   : > { %5036 = vmatprep.mubr.msk.f32.mxu1 %vm312_vm0, %v6231_v57  ;;  %5272 = vmatprep.mubr.msk.f32.mxu0 %vm312_vm0, %v5936_v62 }
 0x10a   : > { %5037 = vmatmul.mubr.msk.f32.gmra.mrb[26].mxu1 %vm312_vm0, %v6242_v53  ;;  %5273 = vmatmul.mubr.msk.f32.gmra.mrb[10].mxu0 %vm312_vm0, %v5950_v0 }
 0x10b   : > { %5039 = vmatprep.mubr.msk.f32.mxu1 %vm312_vm0, %v6245_v49  ;;  %5275 = vmatprep.mubr.msk.f32.mxu0 %vm312_vm0, %v5956_v2 }
 0x10e   : > { %5040 = vmatmul.mubr.msk.f32.gmra.mrb[28].mxu1 %vm312_vm0, %v6256_v15  ;;  %5276 = vmatmul.mubr.msk.f32.gmra.mrb[12].mxu0 %vm312_vm0, %v5970_v4  ;;  %v6622_v4 = vld [vmem:[%s6812_s2] ss:$0 sm:$0xff] }
 0x10f   : > { %5042 = vmatprep.mubr.msk.f32.mxu1 %vm312_vm0, %v6309_v36  ;;  %5278 = vmatprep.mubr.msk.f32.mxu0 %vm312_vm0, %v5974_v6 }
 0x112   : > { %5043 = vmatmul.mubr.msk.f32.gmra.mrb[30].mxu1 %vm312_vm0, %v6320_v39  ;;  %5279 = vmatmul.mubr.msk.f32.gmra.mrb[14].mxu0 %vm312_vm0, %v5991_v11 }
 0x113   : > { %5073 = vmatprep.mubr.msk.f32.mxu1 %vm312_vm0, %v6895_v23  ;;  %5281 = vmatprep.mubr.msk.f32.mxu0 %vm312_vm0, %v5999_v14 }
 0x116   : > { %5074 = vmatmul.mubr.msk.f32.vlgmr.msra.gmra.mrb[16].mxu1 %vm312_vm0, %v6897_v25  ;;  %5282 = vmatmul.mubr.msk.f32.gmra.mrb[16].mxu0 %vm312_vm0, %v6011_v16 }
 0x117   : > { %5076 = vmatprep.mubr.msk.f32.mxu1 %vm312_vm0, %v6899_v27  ;;  %5284 = vmatprep.mubr.msk.f32.mxu0 %vm312_vm0, %v6019_v18 }
 0x11a   : > { %5077 = vmatmul.mubr.msk.f32.gmra.mrb[18].mxu1 %vm312_vm0, %v6901_v29  ;;  %5285 = vmatmul.mubr.msk.f32.gmra.mrb[18].mxu0 %vm312_vm0, %v6034_v21 }
 0x11b   : > { %5079 = vmatprep.mubr.msk.f32.mxu1 %vm312_vm0, %v6902_v30  ;;  %5287 = vmatprep.mubr.msk.f32.mxu0 %vm312_vm0, %v6040_v37 }
 0x11e   : > { %5080 = vmatmul.mubr.msk.f32.gmra.mrb[20].mxu1 %vm312_vm0, %v6903_v31  ;;  %5288 = vmatmul.mubr.msk.f32.gmra.mrb[20].mxu0 %vm312_vm0, %v6054_v5 }
 0x11f   : > { %5082 = vmatprep.mubr.msk.f32.mxu1 %vm312_vm0, %v6905_v33  ;;  %5290 = vmatprep.mubr.msk.f32.mxu0 %vm312_vm0, %v6060_v9 }
 0x122   : > { %5083 = vmatmul.mubr.msk.f32.gmra.mrb[22].mxu1 %vm312_vm0, %v6907_v34  ;;  %5291 = vmatmul.mubr.msk.f32.gmra.mrb[22].mxu0 %vm312_vm0, %v6074_v3 }
 0x123   : > { %5085 = vmatprep.mubr.msk.f32.mxu1 %vm312_vm0, %v6909_v55  ;;  %5293 = vmatprep.mubr.msk.f32.mxu0 %vm312_vm0, %v6080_v63 }
 0x126   : > { %5086 = vmatmul.mubr.msk.f32.gmra.mrb[24].mxu1 %vm312_vm0, %v6911_v19  ;;  %5294 = vmatmul.mubr.msk.f32.gmra.mrb[24].mxu0 %vm312_vm0, %v6094_v59 }
 0x127   : > { %5088 = vmatprep.mubr.msk.f32.mxu1 %vm312_vm0, %v6913_v47  ;;  %5296 = vmatprep.mubr.msk.f32.mxu0 %vm312_vm0, %v6894_v20 }
 0x12a   : > { %5089 = vmatmul.mubr.msk.f32.gmra.mrb[26].mxu1 %vm312_vm0, %v6915_v26  ;;  %5297 = vmatmul.mubr.msk.f32.gmra.mrb[26].mxu0 %vm312_vm0, %v6923_v40 }
 0x12b   : > { %5091 = vmatprep.mubr.msk.f32.mxu1 %vm312_vm0, %v6917_v32  ;;  %5299 = vmatprep.mubr.msk.f32.mxu0 %vm312_vm0, %v6924_v42 }
 0x12e   : > { %5092 = vmatmul.mubr.msk.f32.gmra.mrb[28].mxu1 %vm312_vm0, %v6925_v45  ;;  %5300 = vmatmul.mubr.msk.f32.gmra.mrb[28].mxu0 %vm312_vm0, %v6926_v46 }
 0x12f   : > { %5094 = vmatprep.mubr.msk.f32.mxu1 %vm312_vm0, %v6445_v7  ;;  %5302 = vmatprep.mubr.msk.f32.mxu0 %vm312_vm0, %v4492_v44 }
 0x132   : > { %5095 = vmatmul.mubr.msk.f32.gmra.mrb[30].mxu1 %vm312_vm0, %v6456_v13  ;;  %5303 = vmatmul.mubr.msk.f32.gmra.mrb[30].mxu0 %vm312_vm0, %v4493_v48 }
 0x1a9   : > { %v4999_v49 = vpop.f32.mrb[0].mxu1 }
 0x1aa   : > { %v1541_v50 = vpop.f32.mrb[1].mxu1 }
 0x1ad   : > { %v5002_v52 = vpop.f32.mrb[2].mxu1 }
 0x1ae   : > { %v1551_v53 = vpop.f32.mrb[3].mxu1 }
 0x1b1   : > { %v5005_v54 = vpop.f32.mrb[4].mxu1 }
 0x1b2   : > { %v1561_v56 = vpop.f32.mrb[5].mxu1 }
 0x1b5   : > { %v6598_v57 = vpop.f32.mrb[6].mxu1 }
 0x1b6   : > { %v6600_v58 = vpop.f32.mrb[7].mxu1 }
 0x1b9   : > { %v6602_v59 = vpop.f32.mrb[8].mxu1 }
 0x1ba   : > { %v6604_v60 = vpop.f32.mrb[9].mxu1 }
 0x1bd   : > { %v6606_v61 = vpop.f32.mrb[10].mxu1 }
 0x1be   : > { %v6609_v62 = vpop.f32.mrb[11].mxu1 }
 0x1c1   : > { %v6611_v63 = vpop.f32.mrb[12].mxu1 }
 0x1c2   : > { %v6613_v0 = vpop.f32.mrb[13].mxu1 }
 0x1c5   : > { %v6615_v1 = vpop.f32.mrb[14].mxu1 }
 0x1c6   : > { %v6617_v2 = vpop.f32.mrb[15].mxu1 }
 0x1c9   : > { %v5259_v3 = vpop.f32.mrb[0].mxu0 }
 0x1ca   : > { %v5343_v6 = vadd.f32 %v5259_v3, %v4999_v49  ;;  %v3482_v11 = vpop.f32.mrb[1].mxu0 }
 0x1cb   : > { %v5344_v12 = vadd.f32 %v3482_v11, %v1541_v50 }
 0x1cc   : > { %v3681_v14 = vadd.f32 %v5343_v6, %v6622_v4 }
 0x1cd   : > { %v3680_v15 = vadd.f32 %v5344_v12, %v6622_v4  ;;  %v5262_v16 = vpop.f32.mrb[2].mxu0 }
 0x1ce   : > { %3714 = vst.msk [vmem:[%s6627_s21 + $0x8] sm:$0xff] %vm3712_vm1, %v3681_v14  ;;  %v3746_v18 = vsel %vm3712_vm1, %v3681_v14, 0.0  ;;  %v3817_v21 = vmul.f32 %v3681_v14, %v3681_v14  ;;  %v5345_v37 = vadd.f32 %v5262_v16, %v5002_v52  ;;  %v3492_v38 = vpop.f32.mrb[3].mxu0 }
 0x1cf   : > { %3713 = vst.msk [vmem:[%s6627_s21] sm:$0xff] %vm3712_vm1, %v3680_v15  ;;  %v3745_v5 = vsel %vm3712_vm1, %v3680_v15, 0.0  ;;  %v3816_v8 = vmul.f32 %v3680_v15, %v3680_v15  ;;  %v5346_v9 = vadd.f32 %v3492_v38, %v1551_v53 }
 0x1d0   : > { %v3849_v10 = vsel %vm3712_vm1, %v3817_v21, 0.0  ;;  %v3747_v43 = vadd.f32 %v3746_v18, %v3745_v5  ;;  %v3683_v41 = vadd.f32 %v5345_v37, %v6622_v4 }
 0x1d1   : > { %v3848_v51 = vsel %vm3712_vm1, %v3816_v8, 0.0  ;;  %v3682_v36 = vadd.f32 %v5346_v9, %v6622_v4  ;;  %v5265_v39 = vpop.f32.mrb[4].mxu0 }
 0x1d2   : > { %v3850_v20 = vadd.f32 %v3849_v10, %v3848_v51  ;;  %3716 = vst.msk [vmem:[%s6627_s21 + $0x18] sm:$0xff] %vm3712_vm1, %v3683_v41  ;;  %v3819_v23 = vmul.f32 %v3683_v41, %v3683_v41  ;;  %v5347_v24 = vadd.f32 %v5265_v39, %v5005_v54  ;;  %v3502_v25 = vpop.f32.mrb[5].mxu0  ;;  %v3750_v34 = vsel %vm3712_vm1, %v3683_v41, 0.0 }
 0x1d3   : > { %3715 = vst.msk [vmem:[%s6627_s21 + $0x10] sm:$0xff] %vm3712_vm1, %v3682_v36  ;;  %v3748_v27 = vsel %vm3712_vm1, %v3682_v36, 0.0  ;;  %v3818_v29 = vmul.f32 %v3682_v36, %v3682_v36  ;;  %v5348_v30 = vadd.f32 %v3502_v25, %v1561_v56 }
 0x1d4   : > { %v3749_v31 = vadd.f32 %v3748_v27, %v3747_v43  ;;  %v3685_v33 = vadd.f32 %v5347_v24, %v6622_v4  ;;  %v3853_v26 = vsel %vm3712_vm1, %v3819_v23, 0.0 }
 0x1d5   : > { %v3851_v55 = vsel %vm3712_vm1, %v3818_v29, 0.0  ;;  %v3684_v19 = vadd.f32 %v5348_v30, %v6622_v4  ;;  %v5268_v47 = vpop.f32.mrb[6].mxu0 }
 0x1d6   : > { %v3852_v32 = vadd.f32 %v3851_v55, %v3850_v20  ;;  %3718 = vst.msk [vmem:[%s6627_s21 + $0x28] sm:$0xff] %vm3712_vm1, %v3685_v33  ;;  %v3821_v7 = vmul.f32 %v3685_v33, %v3685_v33  ;;  %v3751_v17 = vadd.f32 %v3750_v34, %v3749_v31  ;;  %v3512_v22 = vpop.f32.mrb[7].mxu0  ;;  %v5349_v35 = vadd.f32 %v5268_v47, %v6598_v57 }
 0x1d7   : > { %3717 = vst.msk [vmem:[%s6627_s21 + $0x20] sm:$0xff] %vm3712_vm1, %v3684_v19  ;;  %v3752_v13 = vsel %vm3712_vm1, %v3684_v19, 0.0  ;;  %v3820_v28 = vmul.f32 %v3684_v19, %v3684_v19  ;;  %v5350_v40 = vadd.f32 %v3512_v22, %v6600_v58  ;;  %v3754_v45 = vsel %vm3712_vm1, %v3685_v33, 0.0 }
 0x1d8   : > { %v3753_v42 = vadd.f32 %v3752_v13, %v3751_v17  ;;  %v3854_v44 = vadd.f32 %v3853_v26, %v3852_v32  ;;  %v3687_v48 = vadd.f32 %v5349_v35, %v6622_v4  ;;  %v3857_v57 = vsel %vm3712_vm1, %v3821_v7, 0.0 }
 0x1d9   : > { %v3855_v46 = vsel %vm3712_vm1, %v3820_v28, 0.0  ;;  %v3686_v49 = vadd.f32 %v5350_v40, %v6622_v4  ;;  %v5271_v50 = vpop.f32.mrb[8].mxu0 }
 0x1da   : > { %v3856_v52 = vadd.f32 %v3855_v46, %v3854_v44  ;;  %v3755_v53 = vadd.f32 %v3754_v45, %v3753_v42  ;;  %v5351_v54 = vadd.f32 %v5271_v50, %v6602_v59  ;;  %v3522_v56 = vpop.f32.mrb[9].mxu0  ;;  %3720 = vst.msk [vmem:[%s6627_s21 + $0x38] sm:$0xff] %vm3712_vm1, %v3687_v48  ;;  %v3823_v58 = vmul.f32 %v3687_v48, %v3687_v48 }
 0x1db   : > { %3719 = vst.msk [vmem:[%s6627_s21 + $0x30] sm:$0xff] %vm3712_vm1, %v3686_v49  ;;  %v3756_v3 = vsel %vm3712_vm1, %v3686_v49, 0.0  ;;  %v3822_v6 = vmul.f32 %v3686_v49, %v3686_v49  ;;  %v5352_v15 = vadd.f32 %v3522_v56, %v6604_v60  ;;  %v3758_v18 = vsel %vm3712_vm1, %v3687_v48, 0.0 }
 0x1dc   : > { %v3757_v11 = vadd.f32 %v3756_v3, %v3755_v53  ;;  %v3858_v12 = vadd.f32 %v3857_v57, %v3856_v52  ;;  %v3689_v14 = vadd.f32 %v5351_v54, %v6622_v4  ;;  %v3861_v21 = vsel %vm3712_vm1, %v3823_v58, 0.0 }
 0x1dd   : > { %v3859_v59 = vsel %vm3712_vm1, %v3822_v6, 0.0  ;;  %v5274_v16 = vpop.f32.mrb[10].mxu0  ;;  %v3688_v38 = vadd.f32 %v5352_v15, %v6622_v4 }
 0x1de   : > { %v3860_v37 = vadd.f32 %v3859_v59, %v3858_v12  ;;  %3722 = vst.msk [vmem:[%s6627_s21 + $0x48] sm:$0xff] %vm3712_vm1, %v3689_v14  ;;  %v3532_v5 = vpop.f32.mrb[11].mxu0  ;;  %v3825_v8 = vmul.f32 %v3689_v14, %v3689_v14  ;;  %v3759_v9 = vadd.f32 %v3758_v18, %v3757_v11  ;;  %v5353_v10 = vadd.f32 %v5274_v16, %v6606_v61 }
 0x1df   : > { %v5354_v60 = vadd.f32 %v3532_v5, %v6609_v62  ;;  %3721 = vst.msk [vmem:[%s6627_s21 + $0x40] sm:$0xff] %vm3712_vm1, %v3688_v38  ;;  %v3760_v43 = vsel %vm3712_vm1, %v3688_v38, 0.0  ;;  %v3824_v41 = vmul.f32 %v3688_v38, %v3688_v38  ;;  %v3762_v24 = vsel %vm3712_vm1, %v3689_v14, 0.0 }
 0x1e0   : > { %v3862_v51 = vadd.f32 %v3861_v21, %v3860_v37  ;;  %v3761_v36 = vadd.f32 %v3760_v43, %v3759_v9  ;;  %v3691_v39 = vadd.f32 %v5353_v10, %v6622_v4  ;;  %v3865_v27 = vsel %vm3712_vm1, %v3825_v8, 0.0 }
 0x1e1   : > { %v3690_v20 = vadd.f32 %v5354_v60, %v6622_v4  ;;  %v5277_v23 = vpop.f32.mrb[12].mxu0  ;;  %v3863_v61 = vsel %vm3712_vm1, %v3824_v41, 0.0 }
 0x1e2   : > { %v5355_v25 = vadd.f32 %v5277_v23, %v6611_v63  ;;  %v3542_v62 = vpop.f32.mrb[13].mxu0  ;;  %v3864_v29 = vadd.f32 %v3863_v61, %v3862_v51  ;;  %3724 = vst.msk [vmem:[%s6627_s21 + $0x58] sm:$0xff] %vm3712_vm1, %v3691_v39  ;;  %v3827_v30 = vmul.f32 %v3691_v39, %v3691_v39  ;;  %v3763_v31 = vadd.f32 %v3762_v24, %v3761_v36 }
 0x1e3   : > { %3723 = vst.msk [vmem:[%s6627_s21 + $0x50] sm:$0xff] %vm3712_vm1, %v3690_v20  ;;  %v3764_v33 = vsel %vm3712_vm1, %v3690_v20, 0.0  ;;  %v3826_v34 = vmul.f32 %v3690_v20, %v3690_v20  ;;  %v5356_v19 = vadd.f32 %v3542_v62, %v6613_v0  ;;  %v3766_v32 = vsel %vm3712_vm1, %v3691_v39, 0.0 }
 0x1e4   : > { %v3693_v55 = vadd.f32 %v5355_v25, %v6622_v4  ;;  %v3765_v63 = vadd.f32 %v3764_v33, %v3763_v31  ;;  %v3866_v47 = vadd.f32 %v3865_v27, %v3864_v29  ;;  %v3869_v0 = vsel %vm3712_vm1, %v3827_v30, 0.0 }
 0x1e5   : > { %v5280_v26 = vpop.f32.mrb[14].mxu0  ;;  %v3867_v7 = vsel %vm3712_vm1, %v3826_v34, 0.0  ;;  %v3692_v22 = vadd.f32 %v5356_v19, %v6622_v4 }
 0x1e6   : > { %3726 = vst.msk [vmem:[%s6627_s21 + $0x68] sm:$0xff] %vm3712_vm1, %v3693_v55  ;;  %v3829_v17 = vmul.f32 %v3693_v55, %v3693_v55  ;;  %v3552_v13 = vpop.f32.mrb[15].mxu0  ;;  %v3868_v28 = vadd.f32 %v3867_v7, %v3866_v47  ;;  %v3767_v35 = vadd.f32 %v3766_v32, %v3765_v63  ;;  %v5357_v40 = vadd.f32 %v5280_v26, %v6615_v1 }
 0x1e7   : > { %v5358_v42 = vadd.f32 %v3552_v13, %v6617_v2  ;;  %3725 = vst.msk [vmem:[%s6627_s21 + $0x60] sm:$0xff] %vm3712_vm1, %v3692_v22  ;;  %v3768_v44 = vsel %vm3712_vm1, %v3692_v22, 0.0  ;;  %v3828_v45 = vmul.f32 %v3692_v22, %v3692_v22  ;;  %v3770_v1 = vsel %vm3712_vm1, %v3693_v55, 0.0 }
 0x1e8   : > { %v3769_v46 = vadd.f32 %v3768_v44, %v3767_v35  ;;  %v3870_v48 = vadd.f32 %v3869_v0, %v3868_v28  ;;  %v3695_v49 = vadd.f32 %v5357_v40, %v6622_v4  ;;  %v3873_v58 = vsel %vm3712_vm1, %v3829_v17, 0.0 }
 0x1e9   : > { %v3694_v50 = vadd.f32 %v5358_v42, %v6622_v4  ;;  %v5075_v52 = vpop.f32.mrb[16].mxu1  ;;  %v5283_v53 = vpop.f32.mrb[16].mxu0  ;;  %v3871_v2 = vsel %vm3712_vm1, %v3828_v45, 0.0 }
 0x1ea   : > { %v5359_v54 = vadd.f32 %v5283_v53, %v5075_v52  ;;  %v2009_v56 = vpop.f32.mrb[17].mxu1  ;;  %v3562_v57 = vpop.f32.mrb[17].mxu0  ;;  %v3872_v3 = vadd.f32 %v3871_v2, %v3870_v48  ;;  %3728 = vst.msk [vmem:[%s6627_s21 + $0x78] sm:$0xff] %vm3712_vm1, %v3695_v49  ;;  %v3831_v6 = vmul.f32 %v3695_v49, %v3695_v49  ;;  %v3771_v11 = vadd.f32 %v3770_v1, %v3769_v46 }
 0x1eb   : > { %3727 = vst.msk [vmem:[%s6627_s21 + $0x70] sm:$0xff] %vm3712_vm1, %v3694_v50  ;;  %v3772_v12 = vsel %vm3712_vm1, %v3694_v50, 0.0  ;;  %v3830_v14 = vmul.f32 %v3694_v50, %v3694_v50  ;;  %v5360_v59 = vadd.f32 %v3562_v57, %v2009_v56  ;;  %v3774_v38 = vsel %vm3712_vm1, %v3695_v49, 0.0 }
 0x1ec   : > { %v3697_v15 = vadd.f32 %v5359_v54, %v6622_v4  ;;  %v3773_v16 = vadd.f32 %v3772_v12, %v3771_v11  ;;  %v3874_v18 = vadd.f32 %v3873_v58, %v3872_v3  ;;  %v3877_v39 = vsel %vm3712_vm1, %v3831_v6, 0.0 }
 0x1ed   : > { %v5078_v21 = vpop.f32.mrb[18].mxu1  ;;  %v5286_v37 = vpop.f32.mrb[18].mxu0  ;;  %v3875_v5 = vsel %vm3712_vm1, %v3830_v14, 0.0  ;;  %v3696_v9 = vadd.f32 %v5360_v59, %v6622_v4 }
 0x1ee   : > { %3730 = vst.msk [vmem:[%s6627_s21 + $0x88] sm:$0xff] %vm3712_vm1, %v3697_v15  ;;  %v3833_v8 = vmul.f32 %v3697_v15, %v3697_v15  ;;  %v2019_v10 = vpop.f32.mrb[19].mxu1  ;;  %v3572_v60 = vpop.f32.mrb[19].mxu0  ;;  %v3876_v43 = vadd.f32 %v3875_v5, %v3874_v18  ;;  %v3775_v41 = vadd.f32 %v3774_v38, %v3773_v16  ;;  %v5361_v51 = vadd.f32 %v5286_v37, %v5078_v21 }
 0x1ef   : > { %v5362_v36 = vadd.f32 %v3572_v60, %v2019_v10  ;;  %3729 = vst.msk [vmem:[%s6627_s21 + $0x80] sm:$0xff] %vm3712_vm1, %v3696_v9  ;;  %v3776_v20 = vsel %vm3712_vm1, %v3696_v9, 0.0  ;;  %v3832_v23 = vmul.f32 %v3696_v9, %v3696_v9  ;;  %v3778_v30 = vsel %vm3712_vm1, %v3697_v15, 0.0 }
 0x1f0   : > { %v3777_v24 = vadd.f32 %v3776_v20, %v3775_v41  ;;  %v3878_v61 = vadd.f32 %v3877_v39, %v3876_v43  ;;  %v3699_v25 = vadd.f32 %v5361_v51, %v6622_v4  ;;  %v3881_v19 = vsel %vm3712_vm1, %v3833_v8, 0.0 }
 0x1f1   : > { %v3698_v62 = vadd.f32 %v5362_v36, %v6622_v4  ;;  %v5081_v27 = vpop.f32.mrb[20].mxu1  ;;  %v5289_v29 = vpop.f32.mrb[20].mxu0  ;;  %v3879_v31 = vsel %vm3712_vm1, %v3832_v23, 0.0 }
 0x1f2   : > { %v5363_v33 = vadd.f32 %v5289_v29, %v5081_v27  ;;  %v2029_v34 = vpop.f32.mrb[21].mxu1  ;;  %v3582_v55 = vpop.f32.mrb[21].mxu0  ;;  %v3880_v63 = vadd.f32 %v3879_v31, %v3878_v61  ;;  %3732 = vst.msk [vmem:[%s6627_s21 + $0x98] sm:$0xff] %vm3712_vm1, %v3699_v25  ;;  %v3835_v47 = vmul.f32 %v3699_v25, %v3699_v25  ;;  %v3779_v26 = vadd.f32 %v3778_v30, %v3777_v24 }
 0x1f3   : > { %3731 = vst.msk [vmem:[%s6627_s21 + $0x90] sm:$0xff] %vm3712_vm1, %v3698_v62  ;;  %v3780_v32 = vsel %vm3712_vm1, %v3698_v62, 0.0  ;;  %v3834_v7 = vmul.f32 %v3698_v62, %v3698_v62  ;;  %v5364_v22 = vadd.f32 %v3582_v55, %v2029_v34  ;;  %v3782_v42 = vsel %vm3712_vm1, %v3699_v25, 0.0 }
 0x1f4   : > { %v3701_v17 = vadd.f32 %v5363_v33, %v6622_v4  ;;  %v3781_v13 = vadd.f32 %v3780_v32, %v3779_v26  ;;  %v3882_v28 = vadd.f32 %v3881_v19, %v3880_v63  ;;  %v3885_v1 = vsel %vm3712_vm1, %v3835_v47, 0.0 }
 0x1f5   : > { %v5084_v35 = vpop.f32.mrb[22].mxu1  ;;  %v5292_v40 = vpop.f32.mrb[22].mxu0  ;;  %v3883_v0 = vsel %vm3712_vm1, %v3834_v7, 0.0  ;;  %v3700_v45 = vadd.f32 %v5364_v22, %v6622_v4 }
 0x1f6   : > { %3734 = vst.msk [vmem:[%s6627_s21 + $0xa8] sm:$0xff] %vm3712_vm1, %v3701_v17  ;;  %v3837_v44 = vmul.f32 %v3701_v17, %v3701_v17  ;;  %v2039_v46 = vpop.f32.mrb[23].mxu1  ;;  %v3592_v48 = vpop.f32.mrb[23].mxu0  ;;  %v3884_v49 = vadd.f32 %v3883_v0, %v3882_v28  ;;  %v3783_v50 = vadd.f32 %v3782_v42, %v3781_v13  ;;  %v5365_v52 = vadd.f32 %v5292_v40, %v5084_v35 }
 0x1f7   : > { %v5366_v53 = vadd.f32 %v3592_v48, %v2039_v46  ;;  %3733 = vst.msk [vmem:[%s6627_s21 + $0xa0] sm:$0xff] %vm3712_vm1, %v3700_v45  ;;  %v3784_v2 = vsel %vm3712_vm1, %v3700_v45, 0.0  ;;  %v3836_v54 = vmul.f32 %v3700_v45, %v3700_v45  ;;  %v3786_v12 = vsel %vm3712_vm1, %v3701_v17, 0.0 }
 0x1f8   : > { %v3785_v56 = vadd.f32 %v3784_v2, %v3783_v50  ;;  %v3886_v57 = vadd.f32 %v3885_v1, %v3884_v49  ;;  %v3703_v58 = vadd.f32 %v5365_v52, %v6622_v4  ;;  %v3889_v18 = vsel %vm3712_vm1, %v3837_v44, 0.0 }
 0x1f9   : > { %v3702_v3 = vadd.f32 %v5366_v53, %v6622_v4  ;;  %v5087_v6 = vpop.f32.mrb[24].mxu1  ;;  %v5295_v11 = vpop.f32.mrb[24].mxu0  ;;  %v3887_v14 = vsel %vm3712_vm1, %v3836_v54, 0.0 }
 0x1fa   : > { %v5367_v15 = vadd.f32 %v5295_v11, %v5087_v6  ;;  %v2049_v59 = vpop.f32.mrb[25].mxu1  ;;  %v3602_v16 = vpop.f32.mrb[25].mxu0  ;;  %v3888_v21 = vadd.f32 %v3887_v14, %v3886_v57  ;;  %3736 = vst.msk [vmem:[%s6627_s21 + $0xb8] sm:$0xff] %vm3712_vm1, %v3703_v58  ;;  %v3839_v37 = vmul.f32 %v3703_v58, %v3703_v58  ;;  %v3787_v38 = vadd.f32 %v3786_v12, %v3785_v56 }
 0x1fb   : > { %3735 = vst.msk [vmem:[%s6627_s21 + $0xb0] sm:$0xff] %vm3712_vm1, %v3702_v3  ;;  %v3788_v5 = vsel %vm3712_vm1, %v3702_v3, 0.0  ;;  %v3838_v8 = vmul.f32 %v3702_v3, %v3702_v3  ;;  %v5368_v10 = vadd.f32 %v3602_v16, %v2049_v59  ;;  %v3790_v36 = vsel %vm3712_vm1, %v3703_v58, 0.0 }
 0x1fc   : > { %v3705_v9 = vadd.f32 %v5367_v15, %v6622_v4  ;;  %v3789_v60 = vadd.f32 %v3788_v5, %v3787_v38  ;;  %v3890_v43 = vadd.f32 %v3889_v18, %v3888_v21  ;;  %v3893_v30 = vsel %vm3712_vm1, %v3839_v37, 0.0 }
 0x1fd   : > { %v5090_v41 = vpop.f32.mrb[26].mxu1  ;;  %v5298_v51 = vpop.f32.mrb[26].mxu0  ;;  %v3891_v39 = vsel %vm3712_vm1, %v3838_v8, 0.0  ;;  %v3704_v23 = vadd.f32 %v5368_v10, %v6622_v4 }
 0x1fe   : > { %3738 = vst.msk [vmem:[%s6627_s21 + $0xc8] sm:$0xff] %vm3712_vm1, %v3705_v9  ;;  %v3841_v20 = vmul.f32 %v3705_v9, %v3705_v9  ;;  %v2059_v24 = vpop.f32.mrb[27].mxu1  ;;  %v3612_v61 = vpop.f32.mrb[27].mxu0  ;;  %v3892_v25 = vadd.f32 %v3891_v39, %v3890_v43  ;;  %v3791_v62 = vadd.f32 %v3790_v36, %v3789_v60  ;;  %v5369_v27 = vadd.f32 %v5298_v51, %v5090_v41 }
 0x1ff   : > { %v5370_v29 = vadd.f32 %v3612_v61, %v2059_v24  ;;  %3737 = vst.msk [vmem:[%s6627_s21 + $0xc0] sm:$0xff] %vm3712_vm1, %v3704_v23  ;;  %v3792_v31 = vsel %vm3712_vm1, %v3704_v23, 0.0  ;;  %v3840_v33 = vmul.f32 %v3704_v23, %v3704_v23  ;;  %v3794_v32 = vsel %vm3712_vm1, %v3705_v9, 0.0 }
 0x200   : > { %v3793_v34 = vadd.f32 %v3792_v31, %v3791_v62  ;;  %v3894_v55 = vadd.f32 %v3893_v30, %v3892_v25  ;;  %v3707_v19 = vadd.f32 %v5369_v27, %v6622_v4  ;;  %v3897_v28 = vsel %vm3712_vm1, %v3841_v20, 0.0 }
 0x201   : > { %v3706_v63 = vadd.f32 %v5370_v29, %v6622_v4  ;;  %v5093_v47 = vpop.f32.mrb[28].mxu1  ;;  %v5301_v26 = vpop.f32.mrb[28].mxu0  ;;  %v3895_v7 = vsel %vm3712_vm1, %v3840_v33, 0.0 }
 0x202   : > { %v5371_v17 = vadd.f32 %v5301_v26, %v5093_v47  ;;  %v2069_v22 = vpop.f32.mrb[29].mxu1  ;;  %v3622_v13 = vpop.f32.mrb[29].mxu0  ;;  %v3896_v35 = vadd.f32 %v3895_v7, %v3894_v55  ;;  %3740 = vst.msk [vmem:[%s6627_s21 + $0xd8] sm:$0xff] %vm3712_vm1, %v3707_v19  ;;  %v3843_v40 = vmul.f32 %v3707_v19, %v3707_v19  ;;  %v3795_v42 = vadd.f32 %v3794_v32, %v3793_v34 }
 0x203   : > { %3739 = vst.msk [vmem:[%s6627_s21 + $0xd0] sm:$0xff] %vm3712_vm1, %v3706_v63  ;;  %v3796_v0 = vsel %vm3712_vm1, %v3706_v63, 0.0  ;;  %v3842_v44 = vmul.f32 %v3706_v63, %v3706_v63  ;;  %v5372_v46 = vadd.f32 %v3622_v13, %v2069_v22  ;;  %v3798_v53 = vsel %vm3712_vm1, %v3707_v19, 0.0 }
 0x204   : > { %v3709_v45 = vadd.f32 %v5371_v17, %v6622_v4  ;;  %v3797_v48 = vadd.f32 %v3796_v0, %v3795_v42  ;;  %v3898_v49 = vadd.f32 %v3897_v28, %v3896_v35  ;;  %v3901_v11 = vsel %vm3712_vm1, %v3843_v40, 0.0 }
 0x205   : > { %v5096_v50 = vpop.f32.mrb[30].mxu1  ;;  %v5304_v52 = vpop.f32.mrb[30].mxu0  ;;  %v3899_v1 = vsel %vm3712_vm1, %v3842_v44, 0.0  ;;  %v3708_v2 = vadd.f32 %v5372_v46, %v6622_v4 }
 0x206   : > { %3742 = vst.msk [vmem:[%s6627_s21 + $0xe8] sm:$0xff] %vm3712_vm1, %v3709_v45  ;;  %v2079_v54 = vpop.f32.mrb[31].mxu1  ;;  %v3632_v56 = vpop.f32.mrb[31].mxu0  ;;  %v3900_v57 = vadd.f32 %v3899_v1, %v3898_v49  ;;  %v3799_v58 = vadd.f32 %v3798_v53, %v3797_v48  ;;  %v5373_v3 = vadd.f32 %v5304_v52, %v5096_v50  ;;  %v3845_v12 = vmul.f32 %v3709_v45, %v3709_v45 }
 0x207   : > { %v5374_v6 = vadd.f32 %v3632_v56, %v2079_v54  ;;  %3741 = vst.msk [vmem:[%s6627_s21 + $0xe0] sm:$0xff] %vm3712_vm1, %v3708_v2  ;;  %v3800_v14 = vsel %vm3712_vm1, %v3708_v2, 0.0  ;;  %v3844_v15 = vmul.f32 %v3708_v2, %v3708_v2  ;;  %v3802_v37 = vsel %vm3712_vm1, %v3709_v45, 0.0 }
 0x208   : > { %v3801_v59 = vadd.f32 %v3800_v14, %v3799_v58  ;;  %v3902_v16 = vadd.f32 %v3901_v11, %v3900_v57  ;;  %v3711_v18 = vadd.f32 %v5373_v3, %v6622_v4  ;;  %v3905_v60 = vsel %vm3712_vm1, %v3845_v12, 0.0 }
 0x209   : > { %v3710_v21 = vadd.f32 %v5374_v6, %v6622_v4  ;;  %v3903_v38 = vsel %vm3712_vm1, %v3844_v15, 0.0 }
 0x20a   : > { %v3904_v5 = vadd.f32 %v3903_v38, %v3902_v16  ;;  %3744 = vst.msk [vmem:[%s6627_s21 + $0xf8] sm:$0xff] %vm3712_vm1, %v3711_v18  ;;  %v3806_v8 = vsel %vm3712_vm1, %v3711_v18, 0.0  ;;  %v3847_v9 = vmul.f32 %v3711_v18, %v3711_v18  ;;  %v3803_v10 = vadd.f32 %v3802_v37, %v3801_v59 }
 0x20b   : > { %3743 = vst.msk [vmem:[%s6627_s21 + $0xf0] sm:$0xff] %vm3712_vm1, %v3710_v21  ;;  %v3804_v43 = vsel %vm3712_vm1, %v3710_v21, 0.0  ;;  %v3846_v41 = vmul.f32 %v3710_v21, %v3710_v21 }
 0x20c   : > { %v3909_v4 = vsel %vm3712_vm1, %v3847_v9, 0.0  ;;  %v3805_v51 = vadd.f32 %v3804_v43, %v3803_v10  ;;  %v3906_v36 = vadd.f32 %v3905_v60, %v3904_v5 }
 0x20d   : > { %v3907_v39 = vsel %vm3712_vm1, %v3846_v41, 0.0 }
 0x20e   : > { %v3807_v20 = vadd.f32 %v3806_v8, %v3805_v51  ;;  %v3908_v23 = vadd.f32 %v3907_v39, %v3906_v36 }
 0x210   : > { %v3808_v24 = vrot.slane %v3807_v20, 4  ;;  %v3910_v61 = vadd.f32 %v3909_v4, %v3908_v23 }
 0x212   : > { %v3809_v25 = vadd.f32 %v3808_v24, %v3807_v20  ;;  %v3911_v62 = vrot.slane %v3910_v61, 4 }
 0x214   : > { %v3810_v27 = vrot.slane %v3809_v25, 2  ;;  %v3912_v29 = vadd.f32 %v3911_v62, %v3910_v61 }
 0x216   : > { %v3811_v30 = vadd.f32 %v3810_v27, %v3809_v25  ;;  %v3913_v31 = vrot.slane %v3912_v29, 2 }
 0x218   : > { %v3812_v33 = vrot.slane %v3811_v30, 1  ;;  %v3914_v34 = vadd.f32 %v3913_v31, %v3912_v29 }
 0x21a   : > { %v3813_v55 = vadd.f32 %v3812_v33, %v3811_v30  ;;  %v3915_v19 = vrot.slane %v3914_v34, 1 }
 0x21c   : > { %3815 = vst.msk [vmem:[%s239_s24] sm:$0x1] %vm3814_vm2, %v3813_v55  ;;  %v3916_v63 = vadd.f32 %v3915_v19, %v3914_v34 }
 0x21e   : > { %3917 = vst.msk [vmem:[%s242_s27] sm:$0x1] %vm3814_vm2, %v3916_v63 }
 0x21f PF: > { %s16_s18 = sadd.s32 1, %s5614_s18  }
 0x220   : > { %p13_p5 = scmp.ge.s32.totalorder %s16_s18, 4  }
 0x222   :  { %15 = sbr.rel (!%p13_p5) target bundleno = 1 (0x1), region = 96 }

// kernel: up_forward.6
= control target key start
LH: loop header
LB: loop body
LE: loop exit
PB: predicated region body
PF: predicated region fallthrough
CT: control target
= control target key end

     0   :  { %s5565_s18 = smov 0   ;;  %s6696_s0 = inlined_call_operand.vmem [shape: f32[2,18,18,8], index: 0, kind: input, shape index: {}]   ;;  %s6697_s1 = inlined_call_operand.vmem [shape: f32[3,3,8,8], index: 1, kind: input, shape index: {}]   ;;  %s6698_s2 = inlined_call_operand.vmem [shape: f32[1,8], index: 2, kind: input, shape index: {}]   ;;  %s6699_s3 = inlined_call_operand.vmem [shape: f32[512,8], index: 3, kind: output, shape index: {0}]   ;;  %s6700_s4 = inlined_call_operand.vmem [shape: f32[2,1,8], index: 4, kind: output, shape index: {1}]   ;;  %s6701_s5 = inlined_call_operand.vmem [shape: f32[2,1,8], index: 5, kind: output, shape index: {2}]  }
   0x1 LB: > { %s5571_s19 = sadd.s32 4294967295, %s5533_s18   ;;  %p4018_p0 = scmp.ge.s32.totalorder %s5533_s18, 1  ;;  %s5533_s18 = sphi %s5565_s18, %s16_s18  }
   0x2   : > { %p192_p1 = scmp.lt.s32.totalorder %s5533_s18, 3 }
   0x4   : > { %p193_p2 = pnand %p4018_p0, %p192_p1 }
   0x6   : > { %196 = sbr.rel (%p193_p2) target bundleno = 543 (0x21f), region = 32 }
   0xd   : > { %v4022_v0 = vld [vmem:[%s6697_s1 + $0x8] sm:$0xff]  ;;  %v5581_v1 = vld [vmem:[%s6697_s1 + $0x20] sm:$0xff]  ;;  %p226_p3 = scmp.lt.s32.totalorder %s5571_s19, 1  ;;  %vm310_vm0 = vcmask 64512   ;;  %v4347_v9 = vld [vmem:[%s6697_s1 + $0x30] sm:$0xff]  ;;  %s4020_s20 = sshll.u32 %s5571_s19, 5 }
   0xe   : > { %v275_v2 = vld [vmem:[%s6697_s1] sm:$0xff]  ;;  %4810 = vmatprep.subr.mxu1 %v4022_v0  ;;  %5010 = vmatprep.subr.mxu0 %v5581_v1  ;;  %v4282_v3 = vld [vmem:[%s6697_s1 + $0x28] sm:$0xff]  ;;  %v5618_v10 = vld [vmem:[%s6697_s1 + $0x10] sm:$0xff]  ;;  %p232_p4 = scmp.lt.s32.totalorder %s4020_s20, 63  ;;  %vm3804_vm1 = vcmask 57344  }
   0xf   : > { %4811 = vmatpush3.msra.mxu1 %v4022_v0  ;;  %5011 = vmatpush3.msra.mxu0 %v5581_v1  ;;  %s5593_s28 = scalar_select %p226_p3, %s5571_s19, 1  ;;  %v5733_v28 = vld [vmem:[%s6697_s1 + $0x38] sm:$0xff] }
  0x10   : > { %4860 = vmatprep.subr.mxu1 %v275_v2  ;;  %5060 = vmatprep.subr.mxu0 %v4282_v3  ;;  %v5894_v61 = vld [vmem:[%s6697_s1 + $0x18] sm:$0xff]  ;;  %s6812_s20 = smov (!%p232_p4, %s4020_s20), 63 }
  0x11   : > { %s5518_s29 = smul.u32 432, %s5593_s28  ;;  %s4021_s21 = sshll.u32 %s6812_s20, 3 }
  0x12   : > { %s6515_s25 = scalar_lea.vmem %s6699_s3, %s4021_s21 }
  0x13   : > { %s5599_s7 = scalar_lea.vmem %s6696_s0, %s5518_s29  ;;  %s239_s29 = scalar_lea.vmem %s6700_s4, %s5593_s28 }
  0x14   : > { %v276_v4 = vld [vmem:[%s5599_s7 + $0x1] sm:$0xff]  ;;  %v4185_v5 = vld [vmem:[%s5599_s7 + $0x19] sm:$0xff]  ;;  %v277_v6 = vld [vmem:[%s5599_s7 + $0x9] sm:$0xff] }
  0x15   : > { %4812 = vmatprep.mubr.msk.f32.mxu1 %vm310_vm0, %v276_v4  ;;  %5012 = vmatprep.mubr.msk.f32.mxu0 %vm310_vm0, %v4185_v5  ;;  %v4186_v7 = vld [vmem:[%s5599_s7 + $0x21] sm:$0xff]  ;;  %v5608_v8 = vld [vmem:[%s5599_s7 + $0x31] sm:$0xff]  ;;  %v5621_v11 = vld [vmem:[%s5599_s7 + $0x39] sm:$0xff] }
  0x16   : > { %4813 = vmatmul.mubr.msk.f32.vlgmr.msra.gmra.mrb[0].mxu1 %vm310_vm0, %v277_v6  ;;  %5013 = vmatmul.mubr.msk.f32.vlgmr.msra.gmra.mrb[0].mxu0 %vm310_vm0, %v4186_v7  ;;  %v5627_v12 = vld [vmem:[%s5599_s7 + $0x49] sm:$0xff]  ;;  %v5638_v13 = vld [vmem:[%s5599_s7 + $0x51] sm:$0xff]  ;;  %v5641_v14 = vld [vmem:[%s5599_s7 + $0x61] sm:$0xff] }
  0x17   : > { %4861 = vmatpush3.msra.mxu1 %v275_v2  ;;  %5061 = vmatpush3.msra.mxu0 %v4282_v3  ;;  %v5652_v15 = vld [vmem:[%s5599_s7 + $0x69] sm:$0xff]  ;;  %v5655_v16 = vld [vmem:[%s5599_s7 + $0x79] sm:$0xff]  ;;  %v5666_v17 = vld [vmem:[%s5599_s7 + $0x81] sm:$0xff] }
  0x18   : > { %4815 = vmatprep.mubr.msk.f32.mxu1 %vm310_vm0, %v4185_v5  ;;  %5015 = vmatprep.mubr.msk.f32.mxu0 %vm310_vm0, %v5608_v8  ;;  %v5669_v18 = vld [vmem:[%s5599_s7 + $0x91] sm:$0xff]  ;;  %v5680_v19 = vld [vmem:[%s5599_s7 + $0x99] sm:$0xff]  ;;  %v5683_v20 = vld [vmem:[%s5599_s7 + $0xa9] sm:$0xff] }
  0x19   : > { %5110 = vmatprep.subr.mxu0 %v4347_v9  ;;  %4910 = vmatprep.subr.mxu1 %v5618_v10  ;;  %v5694_v21 = vld [vmem:[%s5599_s7 + $0xb1] sm:$0xff]  ;;  %v5697_v22 = vld [vmem:[%s5599_s7 + $0xc1] sm:$0xff]  ;;  %v5708_v23 = vld [vmem:[%s5599_s7 + $0xc9] sm:$0xff] }
  0x1a   : > { %4816 = vmatmul.mubr.msk.f32.gmra.mrb[2].mxu1 %vm310_vm0, %v4186_v7  ;;  %5016 = vmatmul.mubr.msk.f32.gmra.mrb[2].mxu0 %vm310_vm0, %v5621_v11  ;;  %v5711_v24 = vld [vmem:[%s5599_s7 + $0x1a] sm:$0xff]  ;;  %v5722_v25 = vld [vmem:[%s5599_s7 + $0x22] sm:$0xff]  ;;  %v5728_v27 = vld [vmem:[%s5599_s7 + $0x32] sm:$0xff] }
  0x1b   : > { %4818 = vmatprep.mubr.msk.f32.mxu1 %vm310_vm0, %v5608_v8  ;;  %5018 = vmatprep.mubr.msk.f32.mxu0 %vm310_vm0, %v5627_v12  ;;  %v5725_v26 = vld [vmem:[%s5599_s7 + $0xd9] sm:$0xff]  ;;  %v5742_v29 = vld [vmem:[%s5599_s7 + $0xe1] sm:$0xff]  ;;  %v5750_v31 = vld [vmem:[%s5599_s7 + $0xf1] sm:$0xff] }
  0x1c   : > { %6747 = vst [vmem:[#allocation2_spill] sm:$0xff] %v5742_v29  ;;  %v5745_v30 = vld [vmem:[%s5599_s7 + $0x3a] sm:$0xff]  ;;  %6748 = vst [vmem:[#allocation3_spill] sm:$0xff] %v5750_v31  ;;  %v5753_v32 = vld [vmem:[%s5599_s7 + $0x4a] sm:$0xff] }
  0x1d   : > { %v5765_v33 = vld [vmem:[%s5599_s7 + $0xf9] sm:$0xff]  ;;  %v5771_v35 = vld [vmem:[%s5599_s7 + $0x109] sm:$0xff]  ;;  %v5785_v37 = vld [vmem:[%s5599_s7 + $0x111] sm:$0xff] }
  0x1e   : > { %4819 = vmatmul.mubr.msk.f32.gmra.mrb[4].mxu1 %vm310_vm0, %v5621_v11  ;;  %5019 = vmatmul.mubr.msk.f32.gmra.mrb[4].mxu0 %vm310_vm0, %v5638_v13  ;;  %6749 = vst [vmem:[#allocation4_spill] sm:$0xff] %v5765_v33  ;;  %v5768_v34 = vld [vmem:[%s5599_s7 + $0x52] sm:$0xff]  ;;  %6750 = vst [vmem:[#allocation5_spill] sm:$0xff] %v5771_v35  ;;  %v5774_v36 = vld [vmem:[%s5599_s7 + $0x62] sm:$0xff] }
  0x1f   : > { %4821 = vmatprep.mubr.msk.f32.mxu1 %vm310_vm0, %v5627_v12  ;;  %5021 = vmatprep.mubr.msk.f32.mxu0 %vm310_vm0, %v5641_v14  ;;  %6751 = vst [vmem:[#allocation6_spill] sm:$0xff] %v5785_v37  ;;  %v5788_v38 = vld [vmem:[%s5599_s7 + $0x6a] sm:$0xff]  ;;  %v5791_v39 = vld [vmem:[%s5599_s7 + $0x121] sm:$0xff]  ;;  %v5811_v43 = vld [vmem:[%s5599_s7 + $0x139] sm:$0xff] }
  0x20   : > { %6752 = vst [vmem:[#allocation7_spill] sm:$0xff] %v5791_v39  ;;  %v5794_v40 = vld [vmem:[%s5599_s7 + $0x7a] sm:$0xff]  ;;  %v5805_v41 = vld [vmem:[%s5599_s7 + $0x129] sm:$0xff]  ;;  %6754 = vst [vmem:[#allocation9_spill] sm:$0xff] %v5811_v43 }
  0x21   : > { %6753 = vst [vmem:[#allocation8_spill] sm:$0xff] %v5805_v41  ;;  %v5808_v42 = vld [vmem:[%s5599_s7 + $0x82] sm:$0xff]  ;;  %v5814_v44 = vld [vmem:[%s5599_s7 + $0x92] sm:$0xff]  ;;  %v5828_v46 = vld [vmem:[%s5599_s7 + $0x9a] sm:$0xff] }
  0x22   : > { %4822 = vmatmul.mubr.msk.f32.gmra.mrb[6].mxu1 %vm310_vm0, %v5638_v13  ;;  %5022 = vmatmul.mubr.msk.f32.gmra.mrb[6].mxu0 %vm310_vm0, %v5652_v15  ;;  %v5825_v45 = vld [vmem:[%s5599_s7 + $0x141] sm:$0xff]  ;;  %v5831_v47 = vld [vmem:[%s5599_s7 + $0x151] sm:$0xff]  ;;  %v5845_v49 = vld [vmem:[%s5599_s7 + $0x159] sm:$0xff] }
  0x23   : > { %4824 = vmatprep.mubr.msk.f32.mxu1 %vm310_vm0, %v5641_v14  ;;  %5024 = vmatprep.mubr.msk.f32.mxu0 %vm310_vm0, %v5655_v16  ;;  %6755 = vst [vmem:[#allocation10_spill] sm:$0xff] %v5825_v45  ;;  %6756 = vst [vmem:[#allocation11_spill] sm:$0xff] %v5831_v47  ;;  %v5834_v48 = vld [vmem:[%s5599_s7 + $0xaa] sm:$0xff]  ;;  %v5848_v50 = vld [vmem:[%s5599_s7 + $0xb2] sm:$0xff] }
  0x24   : > { %6757 = vst [vmem:[#allocation12_spill] sm:$0xff] %v5845_v49  ;;  %v5851_v51 = vld [vmem:[%s5599_s7 + $0x169] sm:$0xff]  ;;  %v5865_v53 = vld [vmem:[%s5599_s7 + $0x171] sm:$0xff]  ;;  %v243_v55 = vld [vmem:[%s5599_s7] sm:$0xff] }
  0x25   : > { %6758 = vst [vmem:[#allocation13_spill] sm:$0xff] %v5851_v51  ;;  %v5854_v52 = vld [vmem:[%s5599_s7 + $0xc2] sm:$0xff]  ;;  %6759 = vst [vmem:[#allocation14_spill] sm:$0xff] %v5865_v53  ;;  %v5868_v54 = vld [vmem:[%s5599_s7 + $0xca] sm:$0xff] }
  0x26   : > { %4825 = vmatmul.mubr.msk.f32.gmra.mrb[8].mxu1 %vm310_vm0, %v5652_v15  ;;  %5025 = vmatmul.mubr.msk.f32.gmra.mrb[8].mxu0 %vm310_vm0, %v5666_v17  ;;  %v5872_v56 = vld [vmem:[%s5599_s7 + $0xda] sm:$0xff]  ;;  %v244_v57 = vld [vmem:[%s5599_s7 + $0x8] sm:$0xff]  ;;  %v5889_v60 = vld [vmem:[%s5599_s7 + $0xf2] sm:$0xff] }
  0x27   : > { %4827 = vmatprep.mubr.msk.f32.mxu1 %vm310_vm0, %v5655_v16  ;;  %5027 = vmatprep.mubr.msk.f32.mxu0 %vm310_vm0, %v5669_v18  ;;  %v5883_v58 = vld [vmem:[%s5599_s7 + $0xe2] sm:$0xff]  ;;  %v5886_v59 = vld [vmem:[%s5599_s7 + $0x18] sm:$0xff]  ;;  %v5911_v0 = vld [vmem:[%s5599_s7 + $0x30] sm:$0xff] }
  0x28   : > { %6760 = vst [vmem:[#allocation15_spill] sm:$0xff] %v5886_v59  ;;  %v5903_v62 = vld [vmem:[%s5599_s7 + $0x20] sm:$0xff]  ;;  %6762 = vst [vmem:[#allocation17_spill] sm:$0xff] %v5911_v0  ;;  %v5914_v2 = vld [vmem:[%s5599_s7 + $0x10a] sm:$0xff] }
  0x29   : > { %6761 = vst [vmem:[#allocation16_spill] sm:$0xff] %v5903_v62  ;;  %v5906_v63 = vld [vmem:[%s5599_s7 + $0xfa] sm:$0xff]  ;;  %v5929_v4 = vld [vmem:[%s5599_s7 + $0x112] sm:$0xff]  ;;  %v5932_v5 = vld [vmem:[%s5599_s7 + $0x48] sm:$0xff] }
  0x2a   : > { %4828 = vmatmul.mubr.msk.f32.gmra.mrb[10].mxu1 %vm310_vm0, %v5666_v17  ;;  %5028 = vmatmul.mubr.msk.f32.gmra.mrb[10].mxu0 %vm310_vm0, %v5680_v19  ;;  %v5926_v3 = vld [vmem:[%s5599_s7 + $0x38] sm:$0xff]  ;;  %6764 = vst [vmem:[#allocation19_spill] sm:$0xff] %v5932_v5  ;;  %v5935_v6 = vld [vmem:[%s5599_s7 + $0x122] sm:$0xff]  ;;  %v5946_v7 = vld [vmem:[%s5599_s7 + $0x50] sm:$0xff] }
  0x2b   : > { %4830 = vmatprep.mubr.msk.f32.mxu1 %vm310_vm0, %v5669_v18  ;;  %5030 = vmatprep.mubr.msk.f32.mxu0 %vm310_vm0, %v5683_v20  ;;  %6763 = vst [vmem:[#allocation18_spill] sm:$0xff] %v5926_v3  ;;  %6765 = vst [vmem:[#allocation20_spill] sm:$0xff] %v5946_v7 }
  0x2e   : > { %4831 = vmatmul.mubr.msk.f32.gmra.mrb[12].mxu1 %vm310_vm0, %v5680_v19  ;;  %5031 = vmatmul.mubr.msk.f32.gmra.mrb[12].mxu0 %vm310_vm0, %v5694_v21 }
  0x2f   : > { %4833 = vmatprep.mubr.msk.f32.mxu1 %vm310_vm0, %v5683_v20  ;;  %5033 = vmatprep.mubr.msk.f32.mxu0 %vm310_vm0, %v5697_v22 }
  0x32   : > { %4834 = vmatmul.mubr.msk.f32.gmra.mrb[14].mxu1 %vm310_vm0, %v5694_v21  ;;  %5034 = vmatmul.mubr.msk.f32.gmra.mrb[14].mxu0 %vm310_vm0, %v5708_v23 }
  0x33   : > { %4836 = vmatprep.mubr.msk.f32.mxu1 %vm310_vm0, %v5697_v22  ;;  %5062 = vmatprep.mubr.msk.f32.mxu0 %vm310_vm0, %v5711_v24 }
  0x36   : > { %4837 = vmatmul.mubr.msk.f32.gmra.mrb[16].mxu1 %vm310_vm0, %v5708_v23  ;;  %5063 = vmatmul.mubr.msk.f32.vlgmr.msra.gmra.mrb[0].mxu0 %vm310_vm0, %v5722_v25 }
  0x37   : > { %5111 = vmatpush3.msra.mxu0 %v4347_v9  ;;  %4839 = vmatprep.mubr.msk.f32.mxu1 %vm310_vm0, %v5725_v26  ;;  %v5949_v9 = vld [vmem:[%s5599_s7 + $0x12a] sm:$0xff] }
  0x38   : > { %5065 = vmatprep.mubr.msk.f32.mxu0 %vm310_vm0, %v5728_v27  ;;  %5160 = vmatprep.subr.mxu0 %v5733_v28 }
  0x3a   : > { %4840 = vmatmul.mubr.msk.f32.gmra.mrb[18].mxu1 %vm310_vm0, %v5742_v29  ;;  %5066 = vmatmul.mubr.msk.f32.gmra.mrb[2].mxu0 %vm310_vm0, %v5745_v30  ;;  %v6046_v29 = vld [vmem:[%s5599_s7 + $0xd8] sm:$0xff] }
  0x3b   : > { %4842 = vmatprep.mubr.msk.f32.mxu1 %vm310_vm0, %v5750_v31  ;;  %5068 = vmatprep.mubr.msk.f32.mxu0 %vm310_vm0, %v5753_v32  ;;  %v6029_v31 = vld [vmem:[%s5599_s7 + $0x18a] sm:$0xff] }
  0x3c   : > { %6776 = vst [vmem:[#allocation31_spill] sm:$0xff] %v6029_v31 }
  0x3e   : > { %4843 = vmatmul.mubr.msk.f32.gmra.mrb[20].mxu1 %vm310_vm0, %v5765_v33  ;;  %5069 = vmatmul.mubr.msk.f32.gmra.mrb[4].mxu0 %vm310_vm0, %v5768_v34  ;;  %v6015_v33 = vld [vmem:[%s5599_s7 + $0x182] sm:$0xff] }
  0x3f   : > { %4845 = vmatprep.mubr.msk.f32.mxu1 %vm310_vm0, %v5771_v35  ;;  %5071 = vmatprep.mubr.msk.f32.mxu0 %vm310_vm0, %v5774_v36  ;;  %v6012_v35 = vld [vmem:[%s5599_s7 + $0xa8] sm:$0xff]  ;;  %6774 = vst [vmem:[#allocation29_spill] sm:$0xff] %v6015_v33 }
  0x40   : > { %6773 = vst [vmem:[#allocation28_spill] sm:$0xff] %v6012_v35 }
  0x42   : > { %4846 = vmatmul.mubr.msk.f32.gmra.mrb[22].mxu1 %vm310_vm0, %v5785_v37  ;;  %5072 = vmatmul.mubr.msk.f32.gmra.mrb[6].mxu0 %vm310_vm0, %v5788_v38  ;;  %v6009_v37 = vld [vmem:[%s5599_s7 + $0x172] sm:$0xff] }
  0x43   : > { %4848 = vmatprep.mubr.msk.f32.mxu1 %vm310_vm0, %v5791_v39  ;;  %5074 = vmatprep.mubr.msk.f32.mxu0 %vm310_vm0, %v5794_v40  ;;  %v6006_v39 = vld [vmem:[%s5599_s7 + $0x98] sm:$0xff]  ;;  %6772 = vst [vmem:[#allocation27_spill] sm:$0xff] %v6009_v37 }
  0x44   : > { %6771 = vst [vmem:[#allocation26_spill] sm:$0xff] %v6006_v39 }
  0x46   : > { %4849 = vmatmul.mubr.msk.f32.gmra.mrb[24].mxu1 %vm310_vm0, %v5805_v41  ;;  %5075 = vmatmul.mubr.msk.f32.gmra.mrb[8].mxu0 %vm310_vm0, %v5808_v42  ;;  %v5995_v41 = vld [vmem:[%s5599_s7 + $0x16a] sm:$0xff] }
  0x47   : > { %4851 = vmatprep.mubr.msk.f32.mxu1 %vm310_vm0, %v5811_v43  ;;  %5077 = vmatprep.mubr.msk.f32.mxu0 %vm310_vm0, %v5814_v44  ;;  %v5992_v43 = vld [vmem:[%s5599_s7 + $0x90] sm:$0xff] }
  0x48   : > { %6770 = vst [vmem:[#allocation25_spill] sm:$0xff] %v5992_v43 }
  0x4a   : > { %4852 = vmatmul.mubr.msk.f32.gmra.mrb[26].mxu1 %vm310_vm0, %v5825_v45  ;;  %5078 = vmatmul.mubr.msk.f32.gmra.mrb[10].mxu0 %vm310_vm0, %v5828_v46  ;;  %v5989_v45 = vld [vmem:[%s5599_s7 + $0x15a] sm:$0xff] }
  0x4b   : > { %4854 = vmatprep.mubr.msk.f32.mxu1 %vm310_vm0, %v5831_v47  ;;  %5080 = vmatprep.mubr.msk.f32.mxu0 %vm310_vm0, %v5834_v48  ;;  %v5986_v47 = vld [vmem:[%s5599_s7 + $0x80] sm:$0xff] }
  0x4c   : > { %6769 = vst [vmem:[#allocation24_spill] sm:$0xff] %v5986_v47 }
  0x4e   : > { %4855 = vmatmul.mubr.msk.f32.gmra.mrb[28].mxu1 %vm310_vm0, %v5845_v49  ;;  %5081 = vmatmul.mubr.msk.f32.gmra.mrb[12].mxu0 %vm310_vm0, %v5848_v50  ;;  %v5975_v49 = vld [vmem:[%s5599_s7 + $0x152] sm:$0xff] }
  0x4f   : > { %4857 = vmatprep.mubr.msk.f32.mxu1 %vm310_vm0, %v5851_v51  ;;  %5083 = vmatprep.mubr.msk.f32.mxu0 %vm310_vm0, %v5854_v52  ;;  %v5972_v51 = vld [vmem:[%s5599_s7 + $0x78] sm:$0xff] }
  0x50   : > { %6768 = vst [vmem:[#allocation23_spill] sm:$0xff] %v5972_v51 }
  0x52   : > { %4858 = vmatmul.mubr.msk.f32.gmra.mrb[30].mxu1 %vm310_vm0, %v5865_v53  ;;  %5084 = vmatmul.mubr.msk.f32.gmra.mrb[14].mxu0 %vm310_vm0, %v5868_v54  ;;  %v5969_v53 = vld [vmem:[%s5599_s7 + $0x142] sm:$0xff] }
  0x53   : > { %4862 = vmatprep.mubr.msk.f32.mxu1 %vm310_vm0, %v243_v55  ;;  %5086 = vmatprep.mubr.msk.f32.mxu0 %vm310_vm0, %v5872_v56  ;;  %v5955_v55 = vld [vmem:[%s5599_s7 + $0x13a] sm:$0xff] }
  0x56   : > { %4863 = vmatmul.mubr.msk.f32.vlgmr.msra.gmra.mrb[0].mxu1 %vm310_vm0, %v244_v57  ;;  %5087 = vmatmul.mubr.msk.f32.gmra.mrb[16].mxu0 %vm310_vm0, %v5883_v58  ;;  %v5966_v57 = vld [vmem:[%s5599_s7 + $0x68] sm:$0xff] }
  0x57   : > { %4911 = vmatpush3.msra.mxu1 %v5618_v10  ;;  %4865 = vmatprep.mubr.msk.f32.mxu1 %vm310_vm0, %v5886_v59  ;;  %v5952_v10 = vld [vmem:[%s5599_s7 + $0x60] sm:$0xff]  ;;  %6767 = vst [vmem:[#allocation22_spill] sm:$0xff] %v5966_v57 }
  0x58   : > { %5089 = vmatprep.mubr.msk.f32.mxu0 %vm310_vm0, %v5889_v60  ;;  %4960 = vmatprep.subr.mxu1 %v5894_v61  ;;  %6766 = vst [vmem:[#allocation21_spill] sm:$0xff] %v5952_v10  ;;  %v6032_v59 = vld [vmem:[%s5599_s7 + $0xc0] sm:$0xff] }
  0x5a   : > { %4866 = vmatmul.mubr.msk.f32.gmra.mrb[2].mxu1 %vm310_vm0, %v5903_v62  ;;  %5090 = vmatmul.mubr.msk.f32.gmra.mrb[18].mxu0 %vm310_vm0, %v5906_v63  ;;  %v6026_v62 = vld [vmem:[%s5599_s7 + $0xb0] sm:$0xff] }
  0x5b   : > { %4868 = vmatprep.mubr.msk.f32.mxu1 %vm310_vm0, %v5911_v0  ;;  %5092 = vmatprep.mubr.msk.f32.mxu0 %vm310_vm0, %v5914_v2  ;;  %6775 = vst [vmem:[#allocation30_spill] sm:$0xff] %v6026_v62 }
  0x5e   : > { %4869 = vmatmul.mubr.msk.f32.gmra.mrb[4].mxu1 %vm310_vm0, %v5926_v3  ;;  %5093 = vmatmul.mubr.msk.f32.gmra.mrb[20].mxu0 %vm310_vm0, %v5929_v4 }
  0x5f   : > { %4871 = vmatprep.mubr.msk.f32.mxu1 %vm310_vm0, %v5932_v5  ;;  %5095 = vmatprep.mubr.msk.f32.mxu0 %vm310_vm0, %v5935_v6 }
  0x62   : > { %4872 = vmatmul.mubr.msk.f32.gmra.mrb[6].mxu1 %vm310_vm0, %v5946_v7  ;;  %5096 = vmatmul.mubr.msk.f32.gmra.mrb[22].mxu0 %vm310_vm0, %v5949_v9 }
  0x63   : > { %4874 = vmatprep.mubr.msk.f32.mxu1 %vm310_vm0, %v5952_v10  ;;  %5098 = vmatprep.mubr.msk.f32.mxu0 %vm310_vm0, %v5955_v55 }
  0x66   : > { %4875 = vmatmul.mubr.msk.f32.gmra.mrb[8].mxu1 %vm310_vm0, %v5966_v57  ;;  %5099 = vmatmul.mubr.msk.f32.gmra.mrb[24].mxu0 %vm310_vm0, %v5969_v53 }
  0x67   : > { %4877 = vmatprep.mubr.msk.f32.mxu1 %vm310_vm0, %v5972_v51  ;;  %5101 = vmatprep.mubr.msk.f32.mxu0 %vm310_vm0, %v5975_v49 }
  0x6a   : > { %4878 = vmatmul.mubr.msk.f32.gmra.mrb[10].mxu1 %vm310_vm0, %v5986_v47  ;;  %5102 = vmatmul.mubr.msk.f32.gmra.mrb[26].mxu0 %vm310_vm0, %v5989_v45 }
  0x6b   : > { %4880 = vmatprep.mubr.msk.f32.mxu1 %vm310_vm0, %v5992_v43  ;;  %5104 = vmatprep.mubr.msk.f32.mxu0 %vm310_vm0, %v5995_v41 }
  0x6e   : > { %4881 = vmatmul.mubr.msk.f32.gmra.mrb[12].mxu1 %vm310_vm0, %v6006_v39  ;;  %5105 = vmatmul.mubr.msk.f32.gmra.mrb[28].mxu0 %vm310_vm0, %v6009_v37  ;;  %v6051_v37 = vld [vmem:[%s6697_s1 + $0x40] sm:$0xff] }
  0x6f   : > { %4883 = vmatprep.mubr.msk.f32.mxu1 %vm310_vm0, %v6012_v35  ;;  %5107 = vmatprep.mubr.msk.f32.mxu0 %vm310_vm0, %v6015_v33  ;;  %v6043_v33 = vld [vmem:[%s5599_s7 + $0xc8] sm:$0xff] }
  0x70   : > { %6777 = vst [vmem:[#allocation32_spill] sm:$0xff] %v6043_v33 }
  0x72   : > { %4884 = vmatmul.mubr.msk.f32.gmra.mrb[14].mxu1 %vm310_vm0, %v6026_v62  ;;  %5108 = vmatmul.mubr.msk.f32.gmra.mrb[30].mxu0 %vm310_vm0, %v6029_v31  ;;  %v6061_v31 = vld [vmem:[%s5599_s7 + $0xe0] sm:$0xff] }
  0x73   : > { %4886 = vmatprep.mubr.msk.f32.mxu1 %vm310_vm0, %v6032_v59  ;;  %5112 = vmatprep.mubr.msk.f32.mxu0 %vm310_vm0, %v5911_v0  ;;  %v6066_v0 = vld [vmem:[%s5599_s7 + $0xf0] sm:$0xff] }
  0x76   : > { %4887 = vmatmul.mubr.msk.f32.gmra.mrb[16].mxu1 %vm310_vm0, %v6043_v33  ;;  %5113 = vmatmul.mubr.msk.f32.vlgmr.msra.gmra.mrb[0].mxu0 %vm310_vm0, %v5926_v3  ;;  %v953_v3 = vld [vmem:[%s5599_s7 + $0x2] sm:$0xff] }
  0x77   : > { %5161 = vmatpush3.msra.mxu0 %v5733_v28  ;;  %4889 = vmatprep.mubr.msk.f32.mxu1 %vm310_vm0, %v6046_v29  ;;  %v6078_v28 = vld [vmem:[%s5599_s7 + $0xf8] sm:$0xff] }
  0x78   : > { %5115 = vmatprep.mubr.msk.f32.mxu0 %vm310_vm0, %v5932_v5  ;;  %5210 = vmatprep.subr.mxu0 %v6051_v37  ;;  %v6081_v5 = vld [vmem:[%s5599_s7 + $0x108] sm:$0xff] }
  0x7a   : > { %4890 = vmatmul.mubr.msk.f32.gmra.mrb[18].mxu1 %vm310_vm0, %v6061_v31  ;;  %5116 = vmatmul.mubr.msk.f32.gmra.mrb[2].mxu0 %vm310_vm0, %v5946_v7  ;;  %v6092_v7 = vld [vmem:[%s5599_s7 + $0x110] sm:$0xff] }
  0x7b   : > { %4892 = vmatprep.mubr.msk.f32.mxu1 %vm310_vm0, %v6066_v0  ;;  %5118 = vmatprep.mubr.msk.f32.mxu0 %vm310_vm0, %v5952_v10  ;;  %v6095_v10 = vld [vmem:[%s5599_s7 + $0x120] sm:$0xff] }
  0x7e   : > { %4893 = vmatmul.mubr.msk.f32.gmra.mrb[20].mxu1 %vm310_vm0, %v6078_v28  ;;  %5119 = vmatmul.mubr.msk.f32.gmra.mrb[4].mxu0 %vm310_vm0, %v5966_v57  ;;  %v6106_v57 = vld [vmem:[%s5599_s7 + $0x128] sm:$0xff] }
  0x7f   : > { %4895 = vmatprep.mubr.msk.f32.mxu1 %vm310_vm0, %v6081_v5  ;;  %5121 = vmatprep.mubr.msk.f32.mxu0 %vm310_vm0, %v5972_v51  ;;  %v6109_v51 = vld [vmem:[%s5599_s7 + $0x138] sm:$0xff] }
  0x82   : > { %4896 = vmatmul.mubr.msk.f32.gmra.mrb[22].mxu1 %vm310_vm0, %v6092_v7  ;;  %5122 = vmatmul.mubr.msk.f32.gmra.mrb[6].mxu0 %vm310_vm0, %v5986_v47  ;;  %v6120_v47 = vld [vmem:[%s5599_s7 + $0x140] sm:$0xff] }
  0x83   : > { %4898 = vmatprep.mubr.msk.f32.mxu1 %vm310_vm0, %v6095_v10  ;;  %5124 = vmatprep.mubr.msk.f32.mxu0 %vm310_vm0, %v5992_v43  ;;  %v6123_v43 = vld [vmem:[%s5599_s7 + $0x150] sm:$0xff] }
  0x86   : > { %4899 = vmatmul.mubr.msk.f32.gmra.mrb[24].mxu1 %vm310_vm0, %v6106_v57  ;;  %5125 = vmatmul.mubr.msk.f32.gmra.mrb[8].mxu0 %vm310_vm0, %v6006_v39  ;;  %v6134_v39 = vld [vmem:[%s5599_s7 + $0x158] sm:$0xff] }
  0x87   : > { %4901 = vmatprep.mubr.msk.f32.mxu1 %vm310_vm0, %v6109_v51  ;;  %5127 = vmatprep.mubr.msk.f32.mxu0 %vm310_vm0, %v6012_v35  ;;  %v6137_v35 = vld [vmem:[%s5599_s7 + $0x168] sm:$0xff] }
  0x8a   : > { %4902 = vmatmul.mubr.msk.f32.gmra.mrb[26].mxu1 %vm310_vm0, %v6120_v47  ;;  %5128 = vmatmul.mubr.msk.f32.gmra.mrb[10].mxu0 %vm310_vm0, %v6026_v62  ;;  %v6148_v62 = vld [vmem:[%s5599_s7 + $0x170] sm:$0xff] }
  0x8b   : > { %4904 = vmatprep.mubr.msk.f32.mxu1 %vm310_vm0, %v6123_v43  ;;  %5130 = vmatprep.mubr.msk.f32.mxu0 %vm310_vm0, %v6032_v59 }
  0x8e   : > { %4905 = vmatmul.mubr.msk.f32.gmra.mrb[28].mxu1 %vm310_vm0, %v6134_v39  ;;  %5131 = vmatmul.mubr.msk.f32.gmra.mrb[12].mxu0 %vm310_vm0, %v6043_v33  ;;  %v954_v33 = vld [vmem:[%s5599_s7 + $0xa] sm:$0xff] }
  0x8f   : > { %4907 = vmatprep.mubr.msk.f32.mxu1 %vm310_vm0, %v6137_v35  ;;  %5133 = vmatprep.mubr.msk.f32.mxu0 %vm310_vm0, %v6046_v29 }
  0x92   : > { %4908 = vmatmul.mubr.msk.f32.gmra.mrb[30].mxu1 %vm310_vm0, %v6148_v62  ;;  %5134 = vmatmul.mubr.msk.f32.gmra.mrb[14].mxu0 %vm310_vm0, %v6061_v31 }
  0x93   : > { %4912 = vmatprep.mubr.msk.f32.mxu1 %vm310_vm0, %v953_v3  ;;  %5136 = vmatprep.mubr.msk.f32.mxu0 %vm310_vm0, %v6066_v0  ;;  %v6794_v3 = vld [vmem:[#allocation22_spill] sm:$0xff] }
  0x96   : > { %4913 = vmatmul.mubr.msk.f32.vlgmr.msra.gmra.mrb[0].mxu1 %vm310_vm0, %v954_v33  ;;  %5137 = vmatmul.mubr.msk.f32.gmra.mrb[16].mxu0 %vm310_vm0, %v6078_v28  ;;  %v4345_v33 = vld [vmem:[%s5599_s7 + $0x198] sm:$0xff] }
  0x97   : > { %4961 = vmatpush3.msra.mxu1 %v5894_v61  ;;  %4915 = vmatprep.mubr.msk.f32.mxu1 %vm310_vm0, %v5711_v24  ;;  %v6201_v24 = vld [vmem:[%s5599_s7 + $0x180] sm:$0xff] }
  0x98   : > { %5139 = vmatprep.mubr.msk.f32.mxu0 %vm310_vm0, %v6081_v5  ;;  %5260 = vmatprep.subr.mxu1 %v5581_v1  ;;  %v4346_v61 = vld [vmem:[%s5599_s7 + $0x1a0] sm:$0xff] }
  0x9a   : > { %4916 = vmatmul.mubr.msk.f32.gmra.mrb[2].mxu1 %vm310_vm0, %v5722_v25  ;;  %5140 = vmatmul.mubr.msk.f32.gmra.mrb[18].mxu0 %vm310_vm0, %v6092_v7  ;;  %v6212_v25 = vld [vmem:[%s5599_s7 + $0x188] sm:$0xff] }
  0x9b   : > { %4918 = vmatprep.mubr.msk.f32.mxu1 %vm310_vm0, %v5728_v27  ;;  %5142 = vmatprep.mubr.msk.f32.mxu0 %vm310_vm0, %v6095_v10 }
  0x9e   : > { %4919 = vmatmul.mubr.msk.f32.gmra.mrb[4].mxu1 %vm310_vm0, %v5745_v30  ;;  %5143 = vmatmul.mubr.msk.f32.gmra.mrb[20].mxu0 %vm310_vm0, %v6106_v57 }
  0x9f   : > { %4921 = vmatprep.mubr.msk.f32.mxu1 %vm310_vm0, %v5753_v32  ;;  %5145 = vmatprep.mubr.msk.f32.mxu0 %vm310_vm0, %v6109_v51 }
  0xa2   : > { %4922 = vmatmul.mubr.msk.f32.gmra.mrb[6].mxu1 %vm310_vm0, %v5768_v34  ;;  %5146 = vmatmul.mubr.msk.f32.gmra.mrb[22].mxu0 %vm310_vm0, %v6120_v47 }
  0xa3   : > { %4924 = vmatprep.mubr.msk.f32.mxu1 %vm310_vm0, %v5774_v36  ;;  %5148 = vmatprep.mubr.msk.f32.mxu0 %vm310_vm0, %v6123_v43 }
  0xa6   : > { %4925 = vmatmul.mubr.msk.f32.gmra.mrb[8].mxu1 %vm310_vm0, %v5788_v38  ;;  %5149 = vmatmul.mubr.msk.f32.gmra.mrb[24].mxu0 %vm310_vm0, %v6134_v39 }
  0xa7   : > { %4927 = vmatprep.mubr.msk.f32.mxu1 %vm310_vm0, %v5794_v40  ;;  %5151 = vmatprep.mubr.msk.f32.mxu0 %vm310_vm0, %v6137_v35 }
  0xaa   : > { %4928 = vmatmul.mubr.msk.f32.gmra.mrb[10].mxu1 %vm310_vm0, %v5808_v42  ;;  %5152 = vmatmul.mubr.msk.f32.gmra.mrb[26].mxu0 %vm310_vm0, %v6148_v62 }
  0xab   : > { %4930 = vmatprep.mubr.msk.f32.mxu1 %vm310_vm0, %v5814_v44  ;;  %5154 = vmatprep.mubr.msk.f32.mxu0 %vm310_vm0, %v6201_v24 }
  0xae   : > { %4931 = vmatmul.mubr.msk.f32.gmra.mrb[12].mxu1 %vm310_vm0, %v5828_v46  ;;  %5155 = vmatmul.mubr.msk.f32.gmra.mrb[28].mxu0 %vm310_vm0, %v6212_v25 }
  0xaf   : > { %4933 = vmatprep.mubr.msk.f32.mxu1 %vm310_vm0, %v5834_v48  ;;  %5157 = vmatprep.mubr.msk.f32.mxu0 %vm310_vm0, %v4345_v33  ;;  %v6795_v33 = vld [vmem:[#allocation10_spill] sm:$0xff] }
  0xb2   : > { %4934 = vmatmul.mubr.msk.f32.gmra.mrb[14].mxu1 %vm310_vm0, %v5848_v50  ;;  %5158 = vmatmul.mubr.msk.f32.gmra.mrb[30].mxu0 %vm310_vm0, %v4346_v61  ;;  %v6796_v61 = vld [vmem:[#allocation23_spill] sm:$0xff] }
  0xb3   : > { %4936 = vmatprep.mubr.msk.f32.mxu1 %vm310_vm0, %v5854_v52  ;;  %5162 = vmatprep.mubr.msk.f32.mxu0 %vm310_vm0, %v5608_v8  ;;  %v6778_v8 = vld [vmem:[#allocation27_spill] sm:$0xff] }
  0xb6   : > { %4937 = vmatmul.mubr.msk.f32.gmra.mrb[16].mxu1 %vm310_vm0, %v5868_v54  ;;  %5163 = vmatmul.mubr.msk.f32.vlgmr.msra.gmra.mrb[0].mxu0 %vm310_vm0, %v5621_v11  ;;  %v6779_v11 = vld [vmem:[#allocation2_spill] sm:$0xff] }
  0xb7   : > { %5211 = vmatpush3.msra.mxu0 %v6051_v37  ;;  %4939 = vmatprep.mubr.msk.f32.mxu1 %vm310_vm0, %v5872_v56  ;;  %v6793_v37 = vld [vmem:[#allocation9_spill] sm:$0xff] }
  0xb8   : > { %5165 = vmatprep.mubr.msk.f32.mxu0 %vm310_vm0, %v5627_v12  ;;  %v6780_v12 = vld [vmem:[#allocation15_spill] sm:$0xff] }
  0xba   : > { %4940 = vmatmul.mubr.msk.f32.gmra.mrb[18].mxu1 %vm310_vm0, %v5883_v58  ;;  %5166 = vmatmul.mubr.msk.f32.gmra.mrb[2].mxu0 %vm310_vm0, %v5638_v13  ;;  %v6781_v13 = vld [vmem:[#allocation3_spill] sm:$0xff] }
  0xbb   : > { %4942 = vmatprep.mubr.msk.f32.mxu1 %vm310_vm0, %v5889_v60  ;;  %5168 = vmatprep.mubr.msk.f32.mxu0 %vm310_vm0, %v5641_v14  ;;  %v6782_v14 = vld [vmem:[#allocation16_spill] sm:$0xff] }
  0xbe   : > { %4943 = vmatmul.mubr.msk.f32.gmra.mrb[20].mxu1 %vm310_vm0, %v5906_v63  ;;  %5169 = vmatmul.mubr.msk.f32.gmra.mrb[4].mxu0 %vm310_vm0, %v5652_v15  ;;  %v6783_v15 = vld [vmem:[#allocation4_spill] sm:$0xff] }
  0xbf   : > { %4945 = vmatprep.mubr.msk.f32.mxu1 %vm310_vm0, %v5914_v2  ;;  %5171 = vmatprep.mubr.msk.f32.mxu0 %vm310_vm0, %v5655_v16  ;;  %v6784_v16 = vld [vmem:[#allocation17_spill] sm:$0xff] }
  0xc2   : > { %4946 = vmatmul.mubr.msk.f32.gmra.mrb[22].mxu1 %vm310_vm0, %v5929_v4  ;;  %5172 = vmatmul.mubr.msk.f32.gmra.mrb[6].mxu0 %vm310_vm0, %v5666_v17  ;;  %v6785_v17 = vld [vmem:[#allocation5_spill] sm:$0xff] }
  0xc3   : > { %4948 = vmatprep.mubr.msk.f32.mxu1 %vm310_vm0, %v5935_v6  ;;  %5174 = vmatprep.mubr.msk.f32.mxu0 %vm310_vm0, %v5669_v18  ;;  %v6786_v18 = vld [vmem:[#allocation18_spill] sm:$0xff] }
  0xc6   : > { %4949 = vmatmul.mubr.msk.f32.gmra.mrb[24].mxu1 %vm310_vm0, %v5949_v9  ;;  %5175 = vmatmul.mubr.msk.f32.gmra.mrb[8].mxu0 %vm310_vm0, %v5680_v19  ;;  %v6787_v19 = vld [vmem:[#allocation6_spill] sm:$0xff] }
  0xc7   : > { %4951 = vmatprep.mubr.msk.f32.mxu1 %vm310_vm0, %v5955_v55  ;;  %5177 = vmatprep.mubr.msk.f32.mxu0 %vm310_vm0, %v5683_v20  ;;  %v6788_v20 = vld [vmem:[#allocation19_spill] sm:$0xff] }
  0xca   : > { %4952 = vmatmul.mubr.msk.f32.gmra.mrb[26].mxu1 %vm310_vm0, %v5969_v53  ;;  %5178 = vmatmul.mubr.msk.f32.gmra.mrb[10].mxu0 %vm310_vm0, %v5694_v21  ;;  %v6789_v21 = vld [vmem:[#allocation7_spill] sm:$0xff] }
  0xcb   : > { %4954 = vmatprep.mubr.msk.f32.mxu1 %vm310_vm0, %v5975_v49  ;;  %5180 = vmatprep.mubr.msk.f32.mxu0 %vm310_vm0, %v5697_v22  ;;  %v6791_v22 = vld [vmem:[#allocation8_spill] sm:$0xff] }
  0xce   : > { %4955 = vmatmul.mubr.msk.f32.gmra.mrb[28].mxu1 %vm310_vm0, %v5989_v45  ;;  %5181 = vmatmul.mubr.msk.f32.gmra.mrb[12].mxu0 %vm310_vm0, %v5708_v23  ;;  %v6792_v23 = vld [vmem:[#allocation21_spill] sm:$0xff] }
  0xcf   : > { %4957 = vmatprep.mubr.msk.f32.mxu1 %vm310_vm0, %v5995_v41  ;;  %5183 = vmatprep.mubr.msk.f32.mxu0 %vm310_vm0, %v5725_v26 }
  0xd2   : > { %4958 = vmatmul.mubr.msk.f32.gmra.mrb[30].mxu1 %vm310_vm0, %v6778_v8  ;;  %5184 = vmatmul.mubr.msk.f32.gmra.mrb[14].mxu0 %vm310_vm0, %v6779_v11  ;;  %v6805_v8 = vld [vmem:[#allocation30_spill] sm:$0xff] }
  0xd3   : > { %4962 = vmatprep.mubr.msk.f32.mxu1 %vm310_vm0, %v6780_v12  ;;  %5186 = vmatprep.mubr.msk.f32.mxu0 %vm310_vm0, %v6781_v13  ;;  %v6797_v12 = vld [vmem:[#allocation11_spill] sm:$0xff] }
  0xd6   : > { %4963 = vmatmul.mubr.msk.f32.vlgmr.msra.gmra.mrb[0].mxu1 %vm310_vm0, %v6782_v14  ;;  %5187 = vmatmul.mubr.msk.f32.gmra.mrb[16].mxu0 %vm310_vm0, %v6783_v15  ;;  %v6798_v14 = vld [vmem:[#allocation24_spill] sm:$0xff] }
  0xd7   : > { %5261 = vmatpush3.msra.mxu1 %v5581_v1  ;;  %4965 = vmatprep.mubr.msk.f32.mxu1 %vm310_vm0, %v6784_v16  ;;  %v6790_v1 = vld [vmem:[#allocation20_spill] sm:$0xff] }
  0xd8   : > { %5189 = vmatprep.mubr.msk.f32.mxu0 %vm310_vm0, %v6785_v17  ;;  %v6799_v16 = vld [vmem:[#allocation12_spill] sm:$0xff] }
  0xda   : > { %4966 = vmatmul.mubr.msk.f32.gmra.mrb[2].mxu1 %vm310_vm0, %v6786_v18  ;;  %5190 = vmatmul.mubr.msk.f32.gmra.mrb[18].mxu0 %vm310_vm0, %v6787_v19  ;;  %v6800_v18 = vld [vmem:[#allocation25_spill] sm:$0xff] }
  0xdb   : > { %4968 = vmatprep.mubr.msk.f32.mxu1 %vm310_vm0, %v6788_v20  ;;  %5192 = vmatprep.mubr.msk.f32.mxu0 %vm310_vm0, %v6789_v21  ;;  %v6801_v20 = vld [vmem:[#allocation13_spill] sm:$0xff] }
  0xde   : > { %4969 = vmatmul.mubr.msk.f32.gmra.mrb[4].mxu1 %vm310_vm0, %v6790_v1  ;;  %5193 = vmatmul.mubr.msk.f32.gmra.mrb[20].mxu0 %vm310_vm0, %v6791_v22  ;;  %v6337_v1 = vld [vmem:[%s5599_s7 + $0x181] sm:$0xff] }
  0xdf   : > { %4971 = vmatprep.mubr.msk.f32.mxu1 %vm310_vm0, %v6792_v23  ;;  %5195 = vmatprep.mubr.msk.f32.mxu0 %vm310_vm0, %v6793_v37  ;;  %v6802_v23 = vld [vmem:[#allocation26_spill] sm:$0xff] }
  0xe2   : > { %4972 = vmatmul.mubr.msk.f32.gmra.mrb[6].mxu1 %vm310_vm0, %v6794_v3  ;;  %5196 = vmatmul.mubr.msk.f32.gmra.mrb[22].mxu0 %vm310_vm0, %v6795_v33  ;;  %v6803_v3 = vld [vmem:[#allocation14_spill] sm:$0xff] }
  0xe3   : > { %4974 = vmatprep.mubr.msk.f32.mxu1 %vm310_vm0, %v6796_v61  ;;  %5198 = vmatprep.mubr.msk.f32.mxu0 %vm310_vm0, %v6797_v12  ;;  %v6804_v61 = vld [vmem:[#allocation28_spill] sm:$0xff] }
  0xe6   : > { %4975 = vmatmul.mubr.msk.f32.gmra.mrb[8].mxu1 %vm310_vm0, %v6798_v14  ;;  %5199 = vmatmul.mubr.msk.f32.gmra.mrb[24].mxu0 %vm310_vm0, %v6799_v16  ;;  %v6348_v14 = vld [vmem:[%s5599_s7 + $0x189] sm:$0xff] }
  0xe7   : > { %4977 = vmatprep.mubr.msk.f32.mxu1 %vm310_vm0, %v6800_v18  ;;  %5201 = vmatprep.mubr.msk.f32.mxu0 %vm310_vm0, %v6801_v20  ;;  %v4410_v18 = vld [vmem:[%s5599_s7 + $0x199] sm:$0xff] }
  0xea   : > { %4978 = vmatmul.mubr.msk.f32.gmra.mrb[10].mxu1 %vm310_vm0, %v6802_v23  ;;  %5202 = vmatmul.mubr.msk.f32.gmra.mrb[26].mxu0 %vm310_vm0, %v6803_v3  ;;  %v4411_v23 = vld [vmem:[%s5599_s7 + $0x1a1] sm:$0xff]  ;;  %v6806_v3 = vld [vmem:[#allocation32_spill] sm:$0xff] }
  0xeb   : > { %4980 = vmatprep.mubr.msk.f32.mxu1 %vm310_vm0, %v6804_v61  ;;  %5204 = vmatprep.mubr.msk.f32.mxu0 %vm310_vm0, %v6337_v1 }
  0xee   : > { %4981 = vmatmul.mubr.msk.f32.gmra.mrb[12].mxu1 %vm310_vm0, %v6805_v8  ;;  %5205 = vmatmul.mubr.msk.f32.gmra.mrb[28].mxu0 %vm310_vm0, %v6348_v14 }
  0xef   : > { %4983 = vmatprep.mubr.msk.f32.mxu1 %vm310_vm0, %v6032_v59  ;;  %5207 = vmatprep.mubr.msk.f32.mxu0 %vm310_vm0, %v4410_v18 }
  0xf2   : > { %4984 = vmatmul.mubr.msk.f32.gmra.mrb[14].mxu1 %vm310_vm0, %v6806_v3  ;;  %5208 = vmatmul.mubr.msk.f32.gmra.mrb[30].mxu0 %vm310_vm0, %v4411_v23 }
  0xf3   : > { %4986 = vmatprep.mubr.msk.f32.mxu1 %vm310_vm0, %v6046_v29  ;;  %5212 = vmatprep.mubr.msk.f32.mxu0 %vm310_vm0, %v5728_v27  ;;  %v6808_v27 = vld [vmem:[#allocation29_spill] sm:$0xff] }
  0xf4   : > { %v4475_v29 = vld [vmem:[%s5599_s7 + $0x19a] sm:$0xff] }
  0xf6   : > { %4987 = vmatmul.mubr.msk.f32.gmra.mrb[16].mxu1 %vm310_vm0, %v6061_v31  ;;  %5213 = vmatmul.mubr.msk.f32.vlgmr.msra.gmra.mrb[0].mxu0 %vm310_vm0, %v5745_v30  ;;  %v6809_v30 = vld [vmem:[#allocation14_spill] sm:$0xff]  ;;  %v6810_v31 = vld [vmem:[#allocation31_spill] sm:$0xff] }
  0xf7   : > { %4989 = vmatprep.mubr.msk.f32.mxu1 %vm310_vm0, %v6066_v0  ;;  %5215 = vmatprep.mubr.msk.f32.mxu0 %vm310_vm0, %v5753_v32  ;;  %v4476_v32 = vld [vmem:[%s5599_s7 + $0x1a2] sm:$0xff]  ;;  %s242_s7 = scalar_lea.vmem %s6701_s5, %s5593_s28 }
  0xfa   : > { %4990 = vmatmul.mubr.msk.f32.gmra.mrb[18].mxu1 %vm310_vm0, %v6078_v28  ;;  %5216 = vmatmul.mubr.msk.f32.gmra.mrb[2].mxu0 %vm310_vm0, %v5768_v34 }
  0xfb   : > { %4992 = vmatprep.mubr.msk.f32.mxu1 %vm310_vm0, %v6081_v5  ;;  %5218 = vmatprep.mubr.msk.f32.mxu0 %vm310_vm0, %v5774_v36 }
  0xfe   : > { %4993 = vmatmul.mubr.msk.f32.gmra.mrb[20].mxu1 %vm310_vm0, %v6092_v7  ;;  %5219 = vmatmul.mubr.msk.f32.gmra.mrb[4].mxu0 %vm310_vm0, %v5788_v38 }
  0xff   : > { %4995 = vmatprep.mubr.msk.f32.mxu1 %vm310_vm0, %v6095_v10  ;;  %5221 = vmatprep.mubr.msk.f32.mxu0 %vm310_vm0, %v5794_v40 }
 0x102   : > { %4996 = vmatmul.mubr.msk.f32.gmra.mrb[22].mxu1 %vm310_vm0, %v6106_v57  ;;  %5222 = vmatmul.mubr.msk.f32.gmra.mrb[6].mxu0 %vm310_vm0, %v5808_v42 }
 0x103   : > { %4998 = vmatprep.mubr.msk.f32.mxu1 %vm310_vm0, %v6109_v51  ;;  %5224 = vmatprep.mubr.msk.f32.mxu0 %vm310_vm0, %v5814_v44 }
 0x106   : > { %4999 = vmatmul.mubr.msk.f32.gmra.mrb[24].mxu1 %vm310_vm0, %v6120_v47  ;;  %5225 = vmatmul.mubr.msk.f32.gmra.mrb[8].mxu0 %vm310_vm0, %v5828_v46 }
 0x107   : > { %5001 = vmatprep.mubr.msk.f32.mxu1 %vm310_vm0, %v6123_v43  ;;  %5227 = vmatprep.mubr.msk.f32.mxu0 %vm310_vm0, %v5834_v48 }
 0x10a   : > { %5002 = vmatmul.mubr.msk.f32.gmra.mrb[26].mxu1 %vm310_vm0, %v6134_v39  ;;  %5228 = vmatmul.mubr.msk.f32.gmra.mrb[10].mxu0 %vm310_vm0, %v5848_v50 }
 0x10b   : > { %5004 = vmatprep.mubr.msk.f32.mxu1 %vm310_vm0, %v6137_v35  ;;  %5230 = vmatprep.mubr.msk.f32.mxu0 %vm310_vm0, %v5854_v52  ;;  %v6510_v52 = vld [vmem:[%s6698_s2] ss:$0 sm:$0xff] }
 0x10e   : > { %5005 = vmatmul.mubr.msk.f32.gmra.mrb[28].mxu1 %vm310_vm0, %v6148_v62  ;;  %5231 = vmatmul.mubr.msk.f32.gmra.mrb[12].mxu0 %vm310_vm0, %v5868_v54 }
 0x10f   : > { %5007 = vmatprep.mubr.msk.f32.mxu1 %vm310_vm0, %v6201_v24  ;;  %5233 = vmatprep.mubr.msk.f32.mxu0 %vm310_vm0, %v5872_v56 }
 0x112   : > { %5008 = vmatmul.mubr.msk.f32.gmra.mrb[30].mxu1 %vm310_vm0, %v6212_v25  ;;  %5234 = vmatmul.mubr.msk.f32.gmra.mrb[14].mxu0 %vm310_vm0, %v5883_v58 }
 0x113   : > { %5036 = vmatprep.mubr.msk.f32.mxu1 %vm310_vm0, %v5725_v26  ;;  %5236 = vmatprep.mubr.msk.f32.mxu0 %vm310_vm0, %v5889_v60  ;;  %v6807_v26 = vld [vmem:[#allocation27_spill] sm:$0xff] }
 0x116   : > { %5037 = vmatmul.mubr.msk.f32.vlgmr.msra.gmra.mrb[16].mxu1 %vm310_vm0, %v6779_v11  ;;  %5237 = vmatmul.mubr.msk.f32.gmra.mrb[16].mxu0 %vm310_vm0, %v5906_v63 }
 0x117   : > { %5039 = vmatprep.mubr.msk.f32.mxu1 %vm310_vm0, %v6781_v13  ;;  %5239 = vmatprep.mubr.msk.f32.mxu0 %vm310_vm0, %v5914_v2 }
 0x11a   : > { %5040 = vmatmul.mubr.msk.f32.gmra.mrb[18].mxu1 %vm310_vm0, %v6783_v15  ;;  %5240 = vmatmul.mubr.msk.f32.gmra.mrb[18].mxu0 %vm310_vm0, %v5929_v4 }
 0x11b   : > { %5042 = vmatprep.mubr.msk.f32.mxu1 %vm310_vm0, %v6785_v17  ;;  %5242 = vmatprep.mubr.msk.f32.mxu0 %vm310_vm0, %v5935_v6 }
 0x11e   : > { %5043 = vmatmul.mubr.msk.f32.gmra.mrb[20].mxu1 %vm310_vm0, %v6787_v19  ;;  %5243 = vmatmul.mubr.msk.f32.gmra.mrb[20].mxu0 %vm310_vm0, %v5949_v9 }
 0x11f   : > { %5045 = vmatprep.mubr.msk.f32.mxu1 %vm310_vm0, %v6789_v21  ;;  %5245 = vmatprep.mubr.msk.f32.mxu0 %vm310_vm0, %v5955_v55 }
 0x122   : > { %5046 = vmatmul.mubr.msk.f32.gmra.mrb[22].mxu1 %vm310_vm0, %v6791_v22  ;;  %5246 = vmatmul.mubr.msk.f32.gmra.mrb[22].mxu0 %vm310_vm0, %v5969_v53 }
 0x123   : > { %5048 = vmatprep.mubr.msk.f32.mxu1 %vm310_vm0, %v6793_v37  ;;  %5248 = vmatprep.mubr.msk.f32.mxu0 %vm310_vm0, %v5975_v49 }
 0x126   : > { %5049 = vmatmul.mubr.msk.f32.gmra.mrb[24].mxu1 %vm310_vm0, %v6795_v33  ;;  %5249 = vmatmul.mubr.msk.f32.gmra.mrb[24].mxu0 %vm310_vm0, %v5989_v45 }
 0x127   : > { %5051 = vmatprep.mubr.msk.f32.mxu1 %vm310_vm0, %v6797_v12  ;;  %5251 = vmatprep.mubr.msk.f32.mxu0 %vm310_vm0, %v5995_v41 }
 0x12a   : > { %5052 = vmatmul.mubr.msk.f32.gmra.mrb[26].mxu1 %vm310_vm0, %v6799_v16  ;;  %5252 = vmatmul.mubr.msk.f32.gmra.mrb[26].mxu0 %vm310_vm0, %v6807_v26 }
 0x12b   : > { %5054 = vmatprep.mubr.msk.f32.mxu1 %vm310_vm0, %v6801_v20  ;;  %5254 = vmatprep.mubr.msk.f32.mxu0 %vm310_vm0, %v6808_v27 }
 0x12e   : > { %5055 = vmatmul.mubr.msk.f32.gmra.mrb[28].mxu1 %vm310_vm0, %v6809_v30  ;;  %5255 = vmatmul.mubr.msk.f32.gmra.mrb[28].mxu0 %vm310_vm0, %v6810_v31 }
 0x12f   : > { %5057 = vmatprep.mubr.msk.f32.mxu1 %vm310_vm0, %v6337_v1  ;;  %5257 = vmatprep.mubr.msk.f32.mxu0 %vm310_vm0, %v4475_v29 }
 0x132   : > { %5058 = vmatmul.mubr.msk.f32.gmra.mrb[30].mxu1 %vm310_vm0, %v6348_v14  ;;  %5258 = vmatmul.mubr.msk.f32.gmra.mrb[30].mxu0 %vm310_vm0, %v4476_v32 }
 0x1a9   : > { %v4964_v34 = vpop.f32.mrb[0].mxu1 }
 0x1aa   : > { %v1537_v35 = vpop.f32.mrb[1].mxu1 }
 0x1ad   : > { %v4967_v36 = vpop.f32.mrb[2].mxu1 }
 0x1ae   : > { %v1547_v38 = vpop.f32.mrb[3].mxu1 }
 0x1b1   : > { %v4970_v39 = vpop.f32.mrb[4].mxu1 }
 0x1b2   : > { %v1557_v40 = vpop.f32.mrb[5].mxu1 }
 0x1b5   : > { %v4973_v41 = vpop.f32.mrb[6].mxu1 }
 0x1b6   : > { %v1567_v42 = vpop.f32.mrb[7].mxu1 }
 0x1b9   : > { %v6490_v43 = vpop.f32.mrb[8].mxu1 }
 0x1ba   : > { %v6492_v44 = vpop.f32.mrb[9].mxu1 }
 0x1bd   : > { %v6494_v45 = vpop.f32.mrb[10].mxu1 }
 0x1be   : > { %v6497_v46 = vpop.f32.mrb[11].mxu1 }
 0x1c1   : > { %v6499_v47 = vpop.f32.mrb[12].mxu1 }
 0x1c2   : > { %v6501_v48 = vpop.f32.mrb[13].mxu1 }
 0x1c5   : > { %v6503_v49 = vpop.f32.mrb[14].mxu1 }
 0x1c6   : > { %v6505_v50 = vpop.f32.mrb[15].mxu1 }
 0x1c9   : > { %v5214_v51 = vpop.f32.mrb[0].mxu0 }
 0x1ca   : > { %v5262_v53 = vadd.f32 %v5214_v51, %v4964_v34  ;;  %v3473_v54 = vpop.f32.mrb[1].mxu0 }
 0x1cb   : > { %v5263_v56 = vadd.f32 %v3473_v54, %v1537_v35 }
 0x1cc   : > { %v3672_v58 = vadd.f32 %v5262_v53, %v6510_v52 }
 0x1cd   : > { %v3671_v59 = vadd.f32 %v5263_v56, %v6510_v52  ;;  %v5217_v60 = vpop.f32.mrb[2].mxu0 }
 0x1ce   : > { %3704 = vst.msk [vmem:[%s6515_s25 + $0x8] sm:$0xff] %vm310_vm0, %v3672_v58  ;;  %v3736_v62 = vsel %vm310_vm0, %v3672_v58, 0.0  ;;  %v3807_v63 = vmul.f32 %v3672_v58, %v3672_v58  ;;  %v5264_v0 = vadd.f32 %v5217_v60, %v4967_v36  ;;  %v3483_v2 = vpop.f32.mrb[3].mxu0 }
 0x1cf   : > { %3703 = vst.msk [vmem:[%s6515_s25] sm:$0xff] %vm310_vm0, %v3671_v59  ;;  %v3735_v4 = vsel %vm310_vm0, %v3671_v59, 0.0  ;;  %v3806_v5 = vmul.f32 %v3671_v59, %v3671_v59  ;;  %v5265_v6 = vadd.f32 %v3483_v2, %v1547_v38 }
 0x1d0   : > { %v3839_v7 = vsel %vm310_vm0, %v3807_v63, 0.0  ;;  %v3737_v9 = vadd.f32 %v3736_v62, %v3735_v4  ;;  %v3674_v10 = vadd.f32 %v5264_v0, %v6510_v52 }
 0x1d1   : > { %v3838_v55 = vsel %vm310_vm0, %v3806_v5, 0.0  ;;  %v3673_v57 = vadd.f32 %v5265_v6, %v6510_v52  ;;  %v5220_v28 = vpop.f32.mrb[4].mxu0 }
 0x1d2   : > { %v3840_v24 = vadd.f32 %v3839_v7, %v3838_v55  ;;  %3706 = vst.msk [vmem:[%s6515_s25 + $0x18] sm:$0xff] %vm310_vm0, %v3674_v10  ;;  %v3809_v25 = vmul.f32 %v3674_v10, %v3674_v10  ;;  %v5266_v8 = vadd.f32 %v5220_v28, %v4970_v39  ;;  %v3493_v11 = vpop.f32.mrb[5].mxu0  ;;  %v3740_v22 = vsel %vm310_vm0, %v3674_v10, 0.0 }
 0x1d3   : > { %3705 = vst.msk [vmem:[%s6515_s25 + $0x10] sm:$0xff] %vm310_vm0, %v3673_v57  ;;  %v3738_v13 = vsel %vm310_vm0, %v3673_v57, 0.0  ;;  %v3808_v15 = vmul.f32 %v3673_v57, %v3673_v57  ;;  %v5267_v17 = vadd.f32 %v3493_v11, %v1557_v40 }
 0x1d4   : > { %v3739_v19 = vadd.f32 %v3738_v13, %v3737_v9  ;;  %v3676_v21 = vadd.f32 %v5266_v8, %v6510_v52  ;;  %v3843_v16 = vsel %vm310_vm0, %v3809_v25, 0.0 }
 0x1d5   : > { %v3841_v37 = vsel %vm310_vm0, %v3808_v15, 0.0  ;;  %v3675_v33 = vadd.f32 %v5267_v17, %v6510_v52  ;;  %v5223_v12 = vpop.f32.mrb[6].mxu0 }
 0x1d6   : > { %v3842_v20 = vadd.f32 %v3841_v37, %v3840_v24  ;;  %3708 = vst.msk [vmem:[%s6515_s25 + $0x28] sm:$0xff] %vm310_vm0, %v3676_v21  ;;  %v3811_v1 = vmul.f32 %v3676_v21, %v3676_v21  ;;  %v3741_v3 = vadd.f32 %v3740_v22, %v3739_v19  ;;  %v3503_v61 = vpop.f32.mrb[7].mxu0  ;;  %v5268_v23 = vadd.f32 %v5223_v12, %v4973_v41 }
 0x1d7   : > { %3707 = vst.msk [vmem:[%s6515_s25 + $0x20] sm:$0xff] %vm310_vm0, %v3675_v33  ;;  %v3742_v14 = vsel %vm310_vm0, %v3675_v33, 0.0  ;;  %v3810_v18 = vmul.f32 %v3675_v33, %v3675_v33  ;;  %v5269_v26 = vadd.f32 %v3503_v61, %v1567_v42  ;;  %v3744_v30 = vsel %vm310_vm0, %v3676_v21, 0.0 }
 0x1d8   : > { %v3743_v27 = vadd.f32 %v3742_v14, %v3741_v3  ;;  %v3844_v29 = vadd.f32 %v3843_v16, %v3842_v20  ;;  %v3678_v32 = vadd.f32 %v5268_v23, %v6510_v52  ;;  %v3847_v41 = vsel %vm310_vm0, %v3811_v1, 0.0 }
 0x1d9   : > { %v3845_v31 = vsel %vm310_vm0, %v3810_v18, 0.0  ;;  %v3677_v34 = vadd.f32 %v5269_v26, %v6510_v52  ;;  %v5226_v35 = vpop.f32.mrb[8].mxu0 }
 0x1da   : > { %v3846_v36 = vadd.f32 %v3845_v31, %v3844_v29  ;;  %v3745_v38 = vadd.f32 %v3744_v30, %v3743_v27  ;;  %v5270_v39 = vadd.f32 %v5226_v35, %v6490_v43  ;;  %v3513_v40 = vpop.f32.mrb[9].mxu0  ;;  %3710 = vst.msk [vmem:[%s6515_s25 + $0x38] sm:$0xff] %vm310_vm0, %v3678_v32  ;;  %v3813_v42 = vmul.f32 %v3678_v32, %v3678_v32 }
 0x1db   : > { %3709 = vst.msk [vmem:[%s6515_s25 + $0x30] sm:$0xff] %vm310_vm0, %v3677_v34  ;;  %v3746_v51 = vsel %vm310_vm0, %v3677_v34, 0.0  ;;  %v3812_v53 = vmul.f32 %v3677_v34, %v3677_v34  ;;  %v5271_v59 = vadd.f32 %v3513_v40, %v6492_v44  ;;  %v3748_v62 = vsel %vm310_vm0, %v3678_v32, 0.0 }
 0x1dc   : > { %v3747_v54 = vadd.f32 %v3746_v51, %v3745_v38  ;;  %v3848_v56 = vadd.f32 %v3847_v41, %v3846_v36  ;;  %v3680_v58 = vadd.f32 %v5270_v39, %v6510_v52  ;;  %v3851_v63 = vsel %vm310_vm0, %v3813_v42, 0.0 }
 0x1dd   : > { %v3849_v43 = vsel %vm310_vm0, %v3812_v53, 0.0  ;;  %v5229_v60 = vpop.f32.mrb[10].mxu0  ;;  %v3679_v2 = vadd.f32 %v5271_v59, %v6510_v52 }
 0x1de   : > { %v3850_v0 = vadd.f32 %v3849_v43, %v3848_v56  ;;  %3712 = vst.msk [vmem:[%s6515_s25 + $0x48] sm:$0xff] %vm310_vm0, %v3680_v58  ;;  %v3523_v4 = vpop.f32.mrb[11].mxu0  ;;  %v3815_v5 = vmul.f32 %v3680_v58, %v3680_v58  ;;  %v3749_v6 = vadd.f32 %v3748_v62, %v3747_v54  ;;  %v5272_v7 = vadd.f32 %v5229_v60, %v6494_v45 }
 0x1df   : > { %v5273_v44 = vadd.f32 %v3523_v4, %v6497_v46  ;;  %3711 = vst.msk [vmem:[%s6515_s25 + $0x40] sm:$0xff] %vm310_vm0, %v3679_v2  ;;  %v3750_v9 = vsel %vm310_vm0, %v3679_v2, 0.0  ;;  %v3814_v10 = vmul.f32 %v3679_v2, %v3679_v2  ;;  %v3752_v8 = vsel %vm310_vm0, %v3680_v58, 0.0 }
 0x1e0   : > { %v3852_v55 = vadd.f32 %v3851_v63, %v3850_v0  ;;  %v3751_v57 = vadd.f32 %v3750_v9, %v3749_v6  ;;  %v3682_v28 = vadd.f32 %v5272_v7, %v6510_v52  ;;  %v3855_v13 = vsel %vm310_vm0, %v3815_v5, 0.0 }
 0x1e1   : > { %v3681_v24 = vadd.f32 %v5273_v44, %v6510_v52  ;;  %v5232_v25 = vpop.f32.mrb[12].mxu0  ;;  %v3853_v45 = vsel %vm310_vm0, %v3814_v10, 0.0 }
 0x1e2   : > { %v5274_v11 = vadd.f32 %v5232_v25, %v6499_v47  ;;  %v3533_v46 = vpop.f32.mrb[13].mxu0  ;;  %v3854_v15 = vadd.f32 %v3853_v45, %v3852_v55  ;;  %3714 = vst.msk [vmem:[%s6515_s25 + $0x58] sm:$0xff] %vm310_vm0, %v3682_v28  ;;  %v3817_v17 = vmul.f32 %v3682_v28, %v3682_v28  ;;  %v3753_v19 = vadd.f32 %v3752_v8, %v3751_v57 }
 0x1e3   : > { %3713 = vst.msk [vmem:[%s6515_s25 + $0x50] sm:$0xff] %vm310_vm0, %v3681_v24  ;;  %v3754_v21 = vsel %vm310_vm0, %v3681_v24, 0.0  ;;  %v3816_v22 = vmul.f32 %v3681_v24, %v3681_v24  ;;  %v5275_v33 = vadd.f32 %v3533_v46, %v6501_v48  ;;  %v3756_v20 = vsel %vm310_vm0, %v3682_v28, 0.0 }
 0x1e4   : > { %v3684_v37 = vadd.f32 %v5274_v11, %v6510_v52  ;;  %v3755_v47 = vadd.f32 %v3754_v21, %v3753_v19  ;;  %v3856_v12 = vadd.f32 %v3855_v13, %v3854_v15  ;;  %v3859_v48 = vsel %vm310_vm0, %v3817_v17, 0.0 }
 0x1e5   : > { %v5235_v16 = vpop.f32.mrb[14].mxu0  ;;  %v3857_v1 = vsel %vm310_vm0, %v3816_v22, 0.0  ;;  %v3683_v61 = vadd.f32 %v5275_v33, %v6510_v52 }
 0x1e6   : > { %3716 = vst.msk [vmem:[%s6515_s25 + $0x68] sm:$0xff] %vm310_vm0, %v3684_v37  ;;  %v3819_v3 = vmul.f32 %v3684_v37, %v3684_v37  ;;  %v3543_v14 = vpop.f32.mrb[15].mxu0  ;;  %v3858_v18 = vadd.f32 %v3857_v1, %v3856_v12  ;;  %v3757_v23 = vadd.f32 %v3756_v20, %v3755_v47  ;;  %v5276_v26 = vadd.f32 %v5235_v16, %v6503_v49 }
 0x1e7   : > { %v5277_v27 = vadd.f32 %v3543_v14, %v6505_v50  ;;  %3715 = vst.msk [vmem:[%s6515_s25 + $0x60] sm:$0xff] %vm310_vm0, %v3683_v61  ;;  %v3758_v29 = vsel %vm310_vm0, %v3683_v61, 0.0  ;;  %v3818_v30 = vmul.f32 %v3683_v61, %v3683_v61  ;;  %v3760_v49 = vsel %vm310_vm0, %v3684_v37, 0.0 }
 0x1e8   : > { %v3759_v31 = vadd.f32 %v3758_v29, %v3757_v23  ;;  %v3860_v32 = vadd.f32 %v3859_v48, %v3858_v18  ;;  %v3686_v34 = vadd.f32 %v5276_v26, %v6510_v52  ;;  %v3863_v42 = vsel %vm310_vm0, %v3819_v3, 0.0 }
 0x1e9   : > { %v3685_v35 = vadd.f32 %v5277_v27, %v6510_v52  ;;  %v5038_v36 = vpop.f32.mrb[16].mxu1  ;;  %v5238_v38 = vpop.f32.mrb[16].mxu0  ;;  %v3861_v50 = vsel %vm310_vm0, %v3818_v30, 0.0 }
 0x1ea   : > { %v5278_v39 = vadd.f32 %v5238_v38, %v5038_v36  ;;  %v2004_v40 = vpop.f32.mrb[17].mxu1  ;;  %v3553_v41 = vpop.f32.mrb[17].mxu0  ;;  %v3862_v51 = vadd.f32 %v3861_v50, %v3860_v32  ;;  %3718 = vst.msk [vmem:[%s6515_s25 + $0x78] sm:$0xff] %vm310_vm0, %v3686_v34  ;;  %v3821_v53 = vmul.f32 %v3686_v34, %v3686_v34  ;;  %v3761_v54 = vadd.f32 %v3760_v49, %v3759_v31 }
 0x1eb   : > { %3717 = vst.msk [vmem:[%s6515_s25 + $0x70] sm:$0xff] %vm310_vm0, %v3685_v35  ;;  %v3762_v56 = vsel %vm310_vm0, %v3685_v35, 0.0  ;;  %v3820_v58 = vmul.f32 %v3685_v35, %v3685_v35  ;;  %v5279_v43 = vadd.f32 %v3553_v41, %v2004_v40  ;;  %v3764_v2 = vsel %vm310_vm0, %v3686_v34, 0.0 }
 0x1ec   : > { %v3688_v59 = vadd.f32 %v5278_v39, %v6510_v52  ;;  %v3763_v60 = vadd.f32 %v3762_v56, %v3761_v54  ;;  %v3864_v62 = vadd.f32 %v3863_v42, %v3862_v51  ;;  %v3867_v28 = vsel %vm310_vm0, %v3821_v53, 0.0 }
 0x1ed   : > { %v5041_v63 = vpop.f32.mrb[18].mxu1  ;;  %v5241_v0 = vpop.f32.mrb[18].mxu0  ;;  %v3865_v4 = vsel %vm310_vm0, %v3820_v58, 0.0  ;;  %v3687_v6 = vadd.f32 %v5279_v43, %v6510_v52 }
 0x1ee   : > { %3720 = vst.msk [vmem:[%s6515_s25 + $0x88] sm:$0xff] %vm310_vm0, %v3688_v59  ;;  %v3823_v5 = vmul.f32 %v3688_v59, %v3688_v59  ;;  %v2014_v7 = vpop.f32.mrb[19].mxu1  ;;  %v3563_v44 = vpop.f32.mrb[19].mxu0  ;;  %v3866_v9 = vadd.f32 %v3865_v4, %v3864_v62  ;;  %v3765_v10 = vadd.f32 %v3764_v2, %v3763_v60  ;;  %v5280_v55 = vadd.f32 %v5241_v0, %v5041_v63 }
 0x1ef   : > { %v5281_v57 = vadd.f32 %v3563_v44, %v2014_v7  ;;  %3719 = vst.msk [vmem:[%s6515_s25 + $0x80] sm:$0xff] %vm310_vm0, %v3687_v6  ;;  %v3766_v24 = vsel %vm310_vm0, %v3687_v6, 0.0  ;;  %v3822_v25 = vmul.f32 %v3687_v6, %v3687_v6  ;;  %v3768_v17 = vsel %vm310_vm0, %v3688_v59, 0.0 }
 0x1f0   : > { %v3767_v8 = vadd.f32 %v3766_v24, %v3765_v10  ;;  %v3868_v45 = vadd.f32 %v3867_v28, %v3866_v9  ;;  %v3690_v11 = vadd.f32 %v5280_v55, %v6510_v52  ;;  %v3871_v33 = vsel %vm310_vm0, %v3823_v5, 0.0 }
 0x1f1   : > { %v3689_v46 = vadd.f32 %v5281_v57, %v6510_v52  ;;  %v5044_v13 = vpop.f32.mrb[20].mxu1  ;;  %v5244_v15 = vpop.f32.mrb[20].mxu0  ;;  %v3869_v19 = vsel %vm310_vm0, %v3822_v25, 0.0 }
 0x1f2   : > { %v5282_v21 = vadd.f32 %v5244_v15, %v5044_v13  ;;  %v2024_v22 = vpop.f32.mrb[21].mxu1  ;;  %v3573_v37 = vpop.f32.mrb[21].mxu0  ;;  %v3870_v47 = vadd.f32 %v3869_v19, %v3868_v45  ;;  %3722 = vst.msk [vmem:[%s6515_s25 + $0x98] sm:$0xff] %vm310_vm0, %v3690_v11  ;;  %v3825_v12 = vmul.f32 %v3690_v11, %v3690_v11  ;;  %v3769_v16 = vadd.f32 %v3768_v17, %v3767_v8 }
 0x1f3   : > { %3721 = vst.msk [vmem:[%s6515_s25 + $0x90] sm:$0xff] %vm310_vm0, %v3689_v46  ;;  %v3770_v20 = vsel %vm310_vm0, %v3689_v46, 0.0  ;;  %v3824_v1 = vmul.f32 %v3689_v46, %v3689_v46  ;;  %v5283_v61 = vadd.f32 %v3573_v37, %v2024_v22  ;;  %v3772_v27 = vsel %vm310_vm0, %v3690_v11, 0.0 }
 0x1f4   : > { %v3692_v3 = vadd.f32 %v5282_v21, %v6510_v52  ;;  %v3771_v14 = vadd.f32 %v3770_v20, %v3769_v16  ;;  %v3872_v18 = vadd.f32 %v3871_v33, %v3870_v47  ;;  %v3875_v49 = vsel %vm310_vm0, %v3825_v12, 0.0 }
 0x1f5   : > { %v5047_v23 = vpop.f32.mrb[22].mxu1  ;;  %v5247_v26 = vpop.f32.mrb[22].mxu0  ;;  %v3873_v48 = vsel %vm310_vm0, %v3824_v1, 0.0  ;;  %v3691_v30 = vadd.f32 %v5283_v61, %v6510_v52 }
 0x1f6   : > { %3724 = vst.msk [vmem:[%s6515_s25 + $0xa8] sm:$0xff] %vm310_vm0, %v3692_v3  ;;  %v3827_v29 = vmul.f32 %v3692_v3, %v3692_v3  ;;  %v2034_v31 = vpop.f32.mrb[23].mxu1  ;;  %v3583_v32 = vpop.f32.mrb[23].mxu0  ;;  %v3874_v34 = vadd.f32 %v3873_v48, %v3872_v18  ;;  %v3773_v35 = vadd.f32 %v3772_v27, %v3771_v14  ;;  %v5284_v36 = vadd.f32 %v5247_v26, %v5047_v23 }
 0x1f7   : > { %v5285_v38 = vadd.f32 %v3583_v32, %v2034_v31  ;;  %3723 = vst.msk [vmem:[%s6515_s25 + $0xa0] sm:$0xff] %vm310_vm0, %v3691_v30  ;;  %v3774_v50 = vsel %vm310_vm0, %v3691_v30, 0.0  ;;  %v3826_v39 = vmul.f32 %v3691_v30, %v3691_v30  ;;  %v3776_v56 = vsel %vm310_vm0, %v3692_v3, 0.0 }
 0x1f8   : > { %v3775_v40 = vadd.f32 %v3774_v50, %v3773_v35  ;;  %v3876_v41 = vadd.f32 %v3875_v49, %v3874_v34  ;;  %v3694_v42 = vadd.f32 %v5284_v36, %v6510_v52  ;;  %v3879_v62 = vsel %vm310_vm0, %v3827_v29, 0.0 }
 0x1f9   : > { %v3693_v51 = vadd.f32 %v5285_v38, %v6510_v52  ;;  %v5050_v53 = vpop.f32.mrb[24].mxu1  ;;  %v5250_v54 = vpop.f32.mrb[24].mxu0  ;;  %v3877_v58 = vsel %vm310_vm0, %v3826_v39, 0.0 }
 0x1fa   : > { %v5286_v59 = vadd.f32 %v5250_v54, %v5050_v53  ;;  %v2044_v43 = vpop.f32.mrb[25].mxu1  ;;  %v3593_v60 = vpop.f32.mrb[25].mxu0  ;;  %v3878_v63 = vadd.f32 %v3877_v58, %v3876_v41  ;;  %3726 = vst.msk [vmem:[%s6515_s25 + $0xb8] sm:$0xff] %vm310_vm0, %v3694_v42  ;;  %v3829_v0 = vmul.f32 %v3694_v42, %v3694_v42  ;;  %v3777_v2 = vadd.f32 %v3776_v56, %v3775_v40 }
 0x1fb   : > { %3725 = vst.msk [vmem:[%s6515_s25 + $0xb0] sm:$0xff] %vm310_vm0, %v3693_v51  ;;  %v3778_v4 = vsel %vm310_vm0, %v3693_v51, 0.0  ;;  %v3828_v5 = vmul.f32 %v3693_v51, %v3693_v51  ;;  %v5287_v7 = vadd.f32 %v3593_v60, %v2044_v43  ;;  %v3780_v57 = vsel %vm310_vm0, %v3694_v42, 0.0 }
 0x1fc   : > { %v3696_v6 = vadd.f32 %v5286_v59, %v6510_v52  ;;  %v3779_v44 = vadd.f32 %v3778_v4, %v3777_v2  ;;  %v3880_v9 = vadd.f32 %v3879_v62, %v3878_v63  ;;  %v3883_v17 = vsel %vm310_vm0, %v3829_v0, 0.0 }
 0x1fd   : > { %v5053_v10 = vpop.f32.mrb[26].mxu1  ;;  %v5253_v55 = vpop.f32.mrb[26].mxu0  ;;  %v3881_v28 = vsel %vm310_vm0, %v3828_v5, 0.0  ;;  %v3695_v25 = vadd.f32 %v5287_v7, %v6510_v52 }
 0x1fe   : > { %3728 = vst.msk [vmem:[%s6515_s25 + $0xc8] sm:$0xff] %vm310_vm0, %v3696_v6  ;;  %v3831_v24 = vmul.f32 %v3696_v6, %v3696_v6  ;;  %v2054_v8 = vpop.f32.mrb[27].mxu1  ;;  %v3603_v45 = vpop.f32.mrb[27].mxu0  ;;  %v3882_v11 = vadd.f32 %v3881_v28, %v3880_v9  ;;  %v3781_v46 = vadd.f32 %v3780_v57, %v3779_v44  ;;  %v5288_v13 = vadd.f32 %v5253_v55, %v5053_v10 }
 0x1ff   : > { %v5289_v15 = vadd.f32 %v3603_v45, %v2054_v8  ;;  %3727 = vst.msk [vmem:[%s6515_s25 + $0xc0] sm:$0xff] %vm310_vm0, %v3695_v25  ;;  %v3782_v19 = vsel %vm310_vm0, %v3695_v25, 0.0  ;;  %v3830_v21 = vmul.f32 %v3695_v25, %v3695_v25  ;;  %v3784_v20 = vsel %vm310_vm0, %v3696_v6, 0.0 }
 0x200   : > { %v3783_v22 = vadd.f32 %v3782_v19, %v3781_v46  ;;  %v3884_v37 = vadd.f32 %v3883_v17, %v3882_v11  ;;  %v3698_v33 = vadd.f32 %v5288_v13, %v6510_v52  ;;  %v3887_v18 = vsel %vm310_vm0, %v3831_v24, 0.0 }
 0x201   : > { %v3697_v47 = vadd.f32 %v5289_v15, %v6510_v52  ;;  %v5056_v12 = vpop.f32.mrb[28].mxu1  ;;  %v5256_v16 = vpop.f32.mrb[28].mxu0  ;;  %v3885_v1 = vsel %vm310_vm0, %v3830_v21, 0.0 }
 0x202   : > { %v5290_v3 = vadd.f32 %v5256_v16, %v5056_v12  ;;  %v2064_v61 = vpop.f32.mrb[29].mxu1  ;;  %v3613_v14 = vpop.f32.mrb[29].mxu0  ;;  %v3886_v23 = vadd.f32 %v3885_v1, %v3884_v37  ;;  %3730 = vst.msk [vmem:[%s6515_s25 + $0xd8] sm:$0xff] %vm310_vm0, %v3698_v33  ;;  %v3833_v26 = vmul.f32 %v3698_v33, %v3698_v33  ;;  %v3785_v27 = vadd.f32 %v3784_v20, %v3783_v22 }
 0x203   : > { %3729 = vst.msk [vmem:[%s6515_s25 + $0xd0] sm:$0xff] %vm310_vm0, %v3697_v47  ;;  %v3786_v48 = vsel %vm310_vm0, %v3697_v47, 0.0  ;;  %v3832_v29 = vmul.f32 %v3697_v47, %v3697_v47  ;;  %v5291_v31 = vadd.f32 %v3613_v14, %v2064_v61  ;;  %v3788_v38 = vsel %vm310_vm0, %v3698_v33, 0.0 }
 0x204   : > { %v3700_v30 = vadd.f32 %v5290_v3, %v6510_v52  ;;  %v3787_v32 = vadd.f32 %v3786_v48, %v3785_v27  ;;  %v3888_v34 = vadd.f32 %v3887_v18, %v3886_v23  ;;  %v3891_v54 = vsel %vm310_vm0, %v3833_v26, 0.0 }
 0x205   : > { %v5059_v35 = vpop.f32.mrb[30].mxu1  ;;  %v5259_v36 = vpop.f32.mrb[30].mxu0  ;;  %v3889_v49 = vsel %vm310_vm0, %v3832_v29, 0.0  ;;  %v3699_v50 = vadd.f32 %v5291_v31, %v6510_v52 }
 0x206   : > { %3732 = vst.msk [vmem:[%s6515_s25 + $0xe8] sm:$0xff] %vm310_vm0, %v3700_v30  ;;  %v2074_v39 = vpop.f32.mrb[31].mxu1  ;;  %v3623_v40 = vpop.f32.mrb[31].mxu0  ;;  %v3890_v41 = vadd.f32 %v3889_v49, %v3888_v34  ;;  %v3789_v42 = vadd.f32 %v3788_v38, %v3787_v32  ;;  %v5292_v51 = vadd.f32 %v5259_v36, %v5059_v35  ;;  %v3835_v56 = vmul.f32 %v3700_v30, %v3700_v30 }
 0x207   : > { %v5293_v53 = vadd.f32 %v3623_v40, %v2074_v39  ;;  %3731 = vst.msk [vmem:[%s6515_s25 + $0xe0] sm:$0xff] %vm310_vm0, %v3699_v50  ;;  %v3790_v58 = vsel %vm310_vm0, %v3699_v50, 0.0  ;;  %v3834_v59 = vmul.f32 %v3699_v50, %v3699_v50  ;;  %v3792_v0 = vsel %vm310_vm0, %v3700_v30, 0.0 }
 0x208   : > { %v3791_v43 = vadd.f32 %v3790_v58, %v3789_v42  ;;  %v3892_v60 = vadd.f32 %v3891_v54, %v3890_v41  ;;  %v3702_v62 = vadd.f32 %v5292_v51, %v6510_v52  ;;  %v3895_v6 = vsel %vm310_vm0, %v3835_v56, 0.0 }
 0x209   : > { %v3701_v63 = vadd.f32 %v5293_v53, %v6510_v52  ;;  %v3893_v2 = vsel %vm310_vm0, %v3834_v59, 0.0 }
 0x20a   : > { %v3894_v4 = vadd.f32 %v3893_v2, %v3892_v60  ;;  %3734 = vst.msk [vmem:[%s6515_s25 + $0xf8] sm:$0xff] %vm310_vm0, %v3702_v62  ;;  %v3793_v5 = vadd.f32 %v3792_v0, %v3791_v43  ;;  %v3837_v7 = vmul.f32 %v3702_v62, %v3702_v62  ;;  %v3796_v52 = vsel %vm310_vm0, %v3702_v62, 0.0 }
 0x20b   : > { %3733 = vst.msk [vmem:[%s6515_s25 + $0xf0] sm:$0xff] %vm310_vm0, %v3701_v63  ;;  %v3794_v44 = vsel %vm310_vm0, %v3701_v63, 0.0  ;;  %v3836_v9 = vmul.f32 %v3701_v63, %v3701_v63 }
 0x20c   : > { %v3795_v10 = vadd.f32 %v3794_v44, %v3793_v5  ;;  %v3896_v55 = vadd.f32 %v3895_v6, %v3894_v4  ;;  %v3899_v25 = vsel %vm310_vm0, %v3837_v7, 0.0 }
 0x20d   : > { %v3897_v57 = vsel %vm310_vm0, %v3836_v9, 0.0 }
 0x20e   : > { %v3797_v28 = vadd.f32 %v3796_v52, %v3795_v10  ;;  %v3898_v24 = vadd.f32 %v3897_v57, %v3896_v55 }
 0x210   : > { %v3798_v8 = vrot.slane %v3797_v28, 4  ;;  %v3900_v45 = vadd.f32 %v3899_v25, %v3898_v24 }
 0x212   : > { %v3799_v11 = vadd.f32 %v3798_v8, %v3797_v28  ;;  %v3901_v46 = vrot.slane %v3900_v45, 4 }
 0x214   : > { %v3800_v13 = vrot.slane %v3799_v11, 2  ;;  %v3902_v15 = vadd.f32 %v3901_v46, %v3900_v45 }
 0x216   : > { %v3801_v17 = vadd.f32 %v3800_v13, %v3799_v11  ;;  %v3903_v19 = vrot.slane %v3902_v15, 2 }
 0x218   : > { %v3802_v21 = vrot.slane %v3801_v17, 1  ;;  %v3904_v22 = vadd.f32 %v3903_v19, %v3902_v15 }
 0x21a   : > { %v3803_v37 = vadd.f32 %v3802_v21, %v3801_v17  ;;  %v3905_v33 = vrot.slane %v3904_v22, 1 }
 0x21c   : > { %3805 = vst.msk [vmem:[%s239_s29] sm:$0x1] %vm3804_vm1, %v3803_v37  ;;  %v3906_v47 = vadd.f32 %v3905_v33, %v3904_v22 }
 0x21e   : > { %3907 = vst.msk [vmem:[%s242_s7] sm:$0x1] %vm3804_vm1, %v3906_v47 }
 0x21f PF: > { %s16_s18 = sadd.s32 1, %s5533_s18  }
 0x220   : > { %p13_p5 = scmp.ge.s32.totalorder %s16_s18, 4  }
 0x222   :  { %15 = sbr.rel (!%p13_p5) target bundleno = 1 (0x1), region = 96 }

</bundles_post_ra>
